<compile_context>
chip_gen: v7x
topology: tpu7x:2x2x1
jax: 0.10.0
libtpu: 0.0.40
codegen_flags: <defaults>
</compile_context>

<pallas_src>
import functools

import jax
import jax.numpy as jnp
from jax.experimental import pallas as pl
from jax.experimental.pallas import tpu as pltpu


# ---------------------------------------------------------------------------
# Kernel 1: row-tiled linear  y = x @ W + b   (weight/bias resident across grid)
# Used once for the fused forward+backward GRU input projection.
# ---------------------------------------------------------------------------
def _linear_kernel(x_ref, w_ref, b_ref, o_ref):
    acc = jnp.dot(x_ref[...], w_ref[...], preferred_element_type=jnp.float32)
    o_ref[...] = (acc + b_ref[...]).astype(o_ref.dtype)


def _row_block(n_rows, target=256):
    # Prefer >= 2 grid steps so megacore (v7x) can shard rows across cores.
    cap = min(target, n_rows // 2) if n_rows >= 16 else target
    for b in (256, 128, 64, 32, 16, 8):
        if b <= cap and n_rows % b == 0:
            return b
    return n_rows  # full extent (always legal as a block)


def linear_rows(x, w, b, block_rows=None):
    """x: [R, E], w: [E, G], b: [G]  ->  [R, G]"""
    R, E = x.shape
    G = w.shape[1]
    br = _row_block(R) if block_rows is None else block_rows
    assert R % br == 0
    return pl.pallas_call(
        _linear_kernel,
        out_shape=jax.ShapeDtypeStruct((R, G), x.dtype),
        grid=(R // br,),
        in_specs=[
            pl.BlockSpec((br, E), lambda i: (i, 0)),
            pl.BlockSpec((E, G), lambda i: (0, 0)),   # resident weight
            pl.BlockSpec((1, G), lambda i: (0, 0)),   # resident bias
        ],
        out_specs=pl.BlockSpec((br, G), lambda i: (i, 0)),
        compiler_params=pltpu.CompilerParams(dimension_semantics=("parallel",)),
    )(x, w, b.reshape(1, G))


# ---------------------------------------------------------------------------
# Kernel 2: whole-sequence-resident bidirectional GRU.
#   xp_ref  : [T, B, 6H]  fused input projection (fwd gates | bwd gates)
#   whh_ref : [2H, 6H]    block-diag(whh_f, whh_b)  (one MXU push per step)
#   bhh_ref : [1, 6H]     cat(bhh_f, bhh_b)
#   out_ref : [T, B, 2H]  fwd hidden in lanes [:H] at t, bwd in [H:] at T-1-t
#   sent_ref: [B, 2H]     cat(forward_last, backward_last)
# ---------------------------------------------------------------------------
def _gru_kernel(xp_ref, whh_ref, bhh_ref, out_ref, sent_ref, *, T, H):
    B = out_ref.shape[1]
    whh = whh_ref[...]          # hoisted, resident
    bhh = bhh_ref[...]

    def gates(xp, hh, h_prev):
        r = jax.nn.sigmoid(xp[:, :H] + hh[:, :H])
        z = jax.nn.sigmoid(xp[:, H:2 * H] + hh[:, H:2 * H])
        n = jnp.tanh(xp[:, 2 * H:] + r * hh[:, 2 * H:])
        return (1.0 - z) * n + z * h_prev

    h_cat = jnp.zeros((B, 2 * H), jnp.float32)       # [h_fwd | h_bwd]
    # Fully-unrolled static time loop (whole sequence is VMEM resident).
    for t in range(T):
        hh = jnp.dot(h_cat, whh, preferred_element_type=jnp.float32) + bhh
        xf = xp_ref[t]                               # [B, 6H]
        xb = xp_ref[T - 1 - t]
        hf = gates(xf[:, :3 * H], hh[:, :3 * H], h_cat[:, :H])
        hb = gates(xb[:, 3 * H:], hh[:, 3 * H:], h_cat[:, H:])
        out_ref[t, :, :H] = hf.astype(out_ref.dtype)
        out_ref[T - 1 - t, :, H:] = hb.astype(out_ref.dtype)
        h_cat = jnp.concatenate([hf, hb], axis=-1)

    sent_ref[...] = h_cat.astype(sent_ref.dtype)     # [fwd_last | bwd_last]


def gru_bidir(xproj, whh_cat, bhh_cat):
    """xproj: [T, B, 6H]. Returns (outputs [T,B,2H], sent [B,2H])."""
    T, B, G6 = xproj.shape
    H = G6 // 6
    kernel = functools.partial(_gru_kernel, T=T, H=H)
    return pl.pallas_call(
        kernel,
        out_shape=(jax.ShapeDtypeStruct((T, B, 2 * H), xproj.dtype),
                   jax.ShapeDtypeStruct((B, 2 * H), xproj.dtype)),
        grid=(1,),
        in_specs=[
            pl.BlockSpec((T, B, G6), lambda i: (0, 0, 0)),
            pl.BlockSpec((2 * H, G6), lambda i: (0, 0)),   # resident block-diag W_hh
            pl.BlockSpec((1, G6), lambda i: (0, 0)),        # resident b_hh
        ],
        out_specs=(pl.BlockSpec((T, B, 2 * H), lambda i: (0, 0, 0)),
                   pl.BlockSpec((B, 2 * H), lambda i: (0, 0))),
        compiler_params=pltpu.CompilerParams(dimension_semantics=("arbitrary",)),
    )(xproj, whh_cat, bhh_cat.reshape(1, G6))


# ---------------------------------------------------------------------------
# Kernel 3: fused selective gate (sent-term linear folded in).
#   gate = sigmoid(y @ Wg_out + sent @ Wg_sent + bg);  out = y * gate
# ---------------------------------------------------------------------------
def _selgate_kernel(y_ref, sent_ref, wout_ref, wsent_ref, bg_ref, o_ref):
    tt, b, g = y_ref.shape
    y = y_ref[...]                                              # [tt, B, 2H]
    sent_term = (jnp.dot(sent_ref[...], wsent_ref[...],
                         preferred_element_type=jnp.float32) + bg_ref[...])  # [B, 2H]
    # Reshape is a free relayout when B % 8 == 0 (sublane multiple); for other
    # batch sizes it may materialize a VMEM copy (perf-only hazard).
    s = jnp.dot(y.reshape(tt * b, g), wout_ref[...],
                preferred_element_type=jnp.float32).reshape(tt, b, g)
    gate = jax.nn.sigmoid(s + sent_term[None])
    o_ref[...] = (y * gate).astype(o_ref.dtype)


def _time_block(T, B, max_rows=2048):
    cap = max(1, max_rows // max(B, 1))
    for cand in range(min(T, cap), 0, -1):
        if T % cand == 0:
            return cand
    return 1


def selective_gate(outputs, sent, wg_out, wg_sent, bg, block_t=None):
    """outputs: [T,B,2H], sent: [B,2H], wg_out/wg_sent: [2H,2H], bg: [2H]."""
    T, B, G = outputs.shape
    bt = _time_block(T, B) if block_t is None else block_t
    assert T % bt == 0
    return pl.pallas_call(
        _selgate_kernel,
        out_shape=jax.ShapeDtypeStruct((T, B, G), outputs.dtype),
        grid=(T // bt,),
        in_specs=[
            pl.BlockSpec((bt, B, G), lambda i: (i, 0, 0)),
            pl.BlockSpec((B, G), lambda i: (0, 0)),    # resident sent
            pl.BlockSpec((G, G), lambda i: (0, 0)),    # resident Wg_out
            pl.BlockSpec((G, G), lambda i: (0, 0)),    # resident Wg_sent
            pl.BlockSpec((1, G), lambda i: (0, 0)),    # resident bg
        ],
        out_specs=pl.BlockSpec((bt, B, G), lambda i: (i, 0, 0)),
        compiler_params=pltpu.CompilerParams(dimension_semantics=("parallel",)),
    )(outputs, sent, wg_out, wg_sent, bg.reshape(1, G))


# ---------------------------------------------------------------------------
# Encoder forward (single GRU layer).
# ---------------------------------------------------------------------------
def encoder_forward(tokens, p):
    """tokens: [T, B] int32.  Returns (hidden_t [2,B,H], gated outputs [T,B,2H])."""
    T, B = tokens.shape
    E = p["emb"].shape[1]
    H = p["whh_f"].shape[0]

    # Embedding lookup (row 0 of the table is the zero PAD row).
    emb = jnp.take(p["emb"], tokens, axis=0)                       # [T, B, E]

    # Fused forward+backward input projection: one row-tiled Pallas matmul.
    wih = jnp.concatenate([p["wih_f"], p["wih_b"]], axis=1)        # [E, 6H]
    bih = jnp.concatenate([p["bih_f"], p["bih_b"]])                # [6H]
    xproj = linear_rows(emb.reshape(T * B, E), wih, bih).reshape(T, B, 6 * H)

    # Block-diagonal hidden-to-hidden weight -> one fused MXU push per timestep.
    whh = jnp.zeros((2 * H, 6 * H), p["whh_f"].dtype)
    whh = whh.at[:H, :3 * H].set(p["whh_f"]).at[H:, 3 * H:].set(p["whh_b"])
    bhh = jnp.concatenate([p["bhh_f"], p["bhh_b"]])                # [6H]

    # Bidirectional GRU recurrence; outputs already in natural time order,
    # lane-dense [T,B,2H]; sent == cat(forward_last, backward_last).
    outputs, sent = gru_bidir(xproj, whh, bhh)
    hidden_t = jnp.stack([sent[:, :H], sent[:, H:]], axis=0)       # [2, B, H]

    # Selective gate: split Wg so the 4H concat never materializes; sent-term
    # linear is computed inside the gate kernel.
    wg_out, wg_sent = p["wg"][:2 * H], p["wg"][2 * H:]
    gated = selective_gate(outputs, sent, wg_out, wg_sent, p["bg"])  # [T, B, 2H]
    return hidden_t, gated


# ---------------------------------------------------------------------------
# Pure-JAX reference (same math, lax.scan recurrence) for validation.
# ---------------------------------------------------------------------------
def _gru_direction_ref(emb, wih, bih, whh, bhh, reverse):
    T, B, _ = emb.shape
    H = whh.shape[0]
    xs = jnp.flip(emb, axis=0) if reverse else emb
    xp = (xs.reshape(T * B, -1) @ wih + bih).reshape(T, B, 3 * H)

    def step(h, x_t):
        hh = h @ whh + bhh
        r = jax.nn.sigmoid(x_t[:, :H] + hh[:, :H])
        z = jax.nn.sigmoid(x_t[:, H:2 * H] + hh[:, H:2 * H])
        n = jnp.tanh(x_t[:, 2 * H:] + r * hh[:, 2 * H:])
        h_new = (1.0 - z) * n + z * h
        return h_new, h_new

    h0 = jnp.zeros((B, H), jnp.float32)
    h_last, outs = jax.lax.scan(step, h0, xp)
    if reverse:
        outs = jnp.flip(outs, axis=0)
    return outs, h_last


def encoder_reference(tokens, p):
    T, B = tokens.shape
    H = p["whh_f"].shape[0]
    emb = jnp.take(p["emb"], tokens, axis=0)
    out_f, h_f = _gru_direction_ref(emb, p["wih_f"], p["bih_f"],
                                    p["whh_f"], p["bhh_f"], False)
    out_b, h_b = _gru_direction_ref(emb, p["wih_b"], p["bih_b"],
                                    p["whh_b"], p["bhh_b"], True)
    outputs = jnp.concatenate([out_f, out_b], axis=-1)
    hidden_t = jnp.stack([h_f, h_b], axis=0)
    sent = jnp.concatenate([h_f, h_b], axis=-1)
    exp_buf = jnp.concatenate(
        [outputs, jnp.broadcast_to(sent[None], (T, B, 2 * H))], axis=-1)
    gate = jax.nn.sigmoid(exp_buf.reshape(T * B, 4 * H) @ p["wg"] + p["bg"])
    return hidden_t, outputs * gate.reshape(T, B, 2 * H)


def init_params(key, vocab, word_vec, hidden):
    E, H = word_vec, hidden
    ks = jax.random.split(key, 11)
    emb = jax.random.normal(ks[0], (vocab, E), jnp.float32) * 0.1
    emb = emb.at[0].set(0.0)                       # padding_idx = PAD = 0
    b = 1.0 / (H ** 0.5)
    bg = 1.0 / ((4 * H) ** 0.5)

    def u(k, shape, bb):
        return jax.random.uniform(k, shape, jnp.float32, -bb, bb)

    return dict(
        emb=emb,
        # GRU weights stored pre-transposed for x @ W layout, gate order (r, z, n)
        wih_f=u(ks[1], (E, 3 * H), b), whh_f=u(ks[2], (H, 3 * H), b),
        bih_f=u(ks[3], (3 * H,), b),   bhh_f=u(ks[4], (3 * H,), b),
        wih_b=u(ks[5], (E, 3 * H), b), whh_b=u(ks[6], (H, 3 * H), b),
        bih_b=u(ks[7], (3 * H,), b),   bhh_b=u(ks[8], (3 * H,), b),
        # selective gate: [4H, 2H] (transpose of nn.Linear.weight), bias [2H]
        wg=u(ks[9], (4 * H, 2 * H), bg),
        bg=u(ks[10], (2 * H,), bg),
    )


if __name__ == "__main__":
    # Small shapes consistent with the module: seq T=8, batch B=8,
    # word_vec_size=64, enc_rnn_size=128 -> hidden H=64 (2H = 128 lanes).
    T, B = 8, 8
    vocab, word_vec, hidden = 50, 64, 64

    key = jax.random.PRNGKey(0)
    k_tok, k_par = jax.random.split(key)
    tokens = jax.random.randint(k_tok, (T, B), 1, vocab, dtype=jnp.int32)
    params = init_params(k_par, vocab, word_vec, hidden)

    hidden_t, outputs = jax.jit(encoder_forward)(tokens, params)
    hidden_t, outputs = jax.block_until_ready((hidden_t, outputs))

    ref_hidden, ref_out = encoder_reference(tokens, params)
    assert hidden_t.shape == (2, B, hidden)
    assert outputs.shape == (T, B, 2 * hidden)
    assert jnp.allclose(hidden_t, ref_hidden, atol=1e-4, rtol=1e-4)
    assert jnp.allclose(outputs, ref_out, atol=1e-4, rtol=1e-4)

    print("KERNEL_OK")
</pallas_src>

<mosaic_0001>
module attributes {stable_mosaic.version = 11 : i64} {
  func.func @_gru_kernel(%arg0: i32, %arg1: memref<8x8x384xf32, #tpu.memory_space<vmem>>, %arg2: memref<128x384xf32, #tpu.memory_space<vmem>>, %arg3: memref<1x384xf32, #tpu.memory_space<vmem>>, %arg4: memref<8x8x128xf32, #tpu.memory_space<vmem>>, %arg5: memref<8x128xf32, #tpu.memory_space<vmem>>) attributes {dimension_semantics = [#tpu.dimension_semantics<arbitrary>], iteration_bounds = array<i64: 1>, scalar_prefetch = 0 : i64, scratch_operands = 0 : i64, tpu.core_type = #tpu.core_type<tc>, window_params = [{pipeline_mode = #tpu.pipeline_mode<synchronous>, transform_indices = @transform_0, window_bounds = array<i64: 8, 8, 384>}, {pipeline_mode = #tpu.pipeline_mode<synchronous>, transform_indices = @transform_1, window_bounds = array<i64: 128, 384>}, {pipeline_mode = #tpu.pipeline_mode<synchronous>, transform_indices = @transform_2, window_bounds = array<i64: 1, 384>}, {pipeline_mode = #tpu.pipeline_mode<synchronous>, transform_indices = @transform_3, window_bounds = array<i64: 8, 8, 128>}, {pipeline_mode = #tpu.pipeline_mode<synchronous>, transform_indices = @transform_4, window_bounds = array<i64: 8, 128>}]} {
    %c0 = arith.constant 0 : index
    %c0_0 = arith.constant 0 : index
    %0 = vector.load %arg2[%c0, %c0_0] : memref<128x384xf32, #tpu.memory_space<vmem>>, vector<128x384xf32>
    %c0_1 = arith.constant 0 : index
    %c0_2 = arith.constant 0 : index
    %1 = vector.load %arg3[%c0_1, %c0_2] : memref<1x384xf32, #tpu.memory_space<vmem>>, vector<1x384xf32>
    %cst = arith.constant 0.000000e+00 : f32
    %2 = vector.broadcast %cst : f32 to vector<8x128xf32>
    %cst_3 = arith.constant dense<0.000000e+00> : vector<8x384xf32>
    %3 = tpu.matmul %2, %0, %cst_3 {dimension_numbers = #tpu.dot_dimension_numbers<[1], [0], [0], [1], [0, 0, 1, 1], [], []>} : vector<8x128xf32>, vector<128x384xf32>, vector<8x384xf32> -> vector<8x384xf32>
    %4 = vector.broadcast %1 : vector<1x384xf32> to vector<8x384xf32>
    %5 = arith.addf %3, %4 : vector<8x384xf32>
    %c0_4 = arith.constant 0 : index
    %c0_5 = arith.constant 0 : index
    %c0_6 = arith.constant 0 : index
    %6 = vector.load %arg1[%c0_4, %c0_5, %c0_6] : memref<8x8x384xf32, #tpu.memory_space<vmem>>, vector<1x8x384xf32>
    %7 = vector.shape_cast %6 : vector<1x8x384xf32> to vector<8x384xf32>
    %c7 = arith.constant 7 : index
    %c0_7 = arith.constant 0 : index
    %c0_8 = arith.constant 0 : index
    %8 = vector.load %arg1[%c7, %c0_7, %c0_8] : memref<8x8x384xf32, #tpu.memory_space<vmem>>, vector<1x8x384xf32>
    %9 = vector.shape_cast %8 : vector<1x8x384xf32> to vector<8x384xf32>
    %10 = vector.extract_strided_slice %7 {offsets = [0, 0], sizes = [8, 192], strides = [1, 1]} : vector<8x384xf32> to vector<8x192xf32>
    %11 = vector.extract_strided_slice %5 {offsets = [0, 0], sizes = [8, 192], strides = [1, 1]} : vector<8x384xf32> to vector<8x192xf32>
    %12 = vector.extract_strided_slice %2 {offsets = [0, 0], sizes = [8, 64], strides = [1, 1]} : vector<8x128xf32> to vector<8x64xf32>
    %13 = vector.extract_strided_slice %10 {offsets = [0, 0], sizes = [8, 64], strides = [1, 1]} : vector<8x192xf32> to vector<8x64xf32>
    %14 = vector.extract_strided_slice %11 {offsets = [0, 0], sizes = [8, 64], strides = [1, 1]} : vector<8x192xf32> to vector<8x64xf32>
    %15 = arith.addf %13, %14 : vector<8x64xf32>
    %16 = arith.negf %15 : vector<8x64xf32>
    %17 = math.exp %16 : vector<8x64xf32>
    %cst_9 = arith.constant 1.000000e+00 : f32
    %18 = vector.broadcast %cst_9 : f32 to vector<8x64xf32>
    %19 = arith.addf %18, %17 : vector<8x64xf32>
    %20 = arith.divf %18, %19 : vector<8x64xf32>
    %21 = vector.extract_strided_slice %10 {offsets = [0, 64], sizes = [8, 64], strides = [1, 1]} : vector<8x192xf32> to vector<8x64xf32>
    %22 = vector.extract_strided_slice %11 {offsets = [0, 64], sizes = [8, 64], strides = [1, 1]} : vector<8x192xf32> to vector<8x64xf32>
    %23 = arith.addf %21, %22 : vector<8x64xf32>
    %24 = arith.negf %23 : vector<8x64xf32>
    %25 = math.exp %24 : vector<8x64xf32>
    %cst_10 = arith.constant 1.000000e+00 : f32
    %26 = vector.broadcast %cst_10 : f32 to vector<8x64xf32>
    %27 = arith.addf %26, %25 : vector<8x64xf32>
    %28 = arith.divf %26, %27 : vector<8x64xf32>
    %29 = vector.extract_strided_slice %10 {offsets = [0, 128], sizes = [8, 64], strides = [1, 1]} : vector<8x192xf32> to vector<8x64xf32>
    %30 = vector.extract_strided_slice %11 {offsets = [0, 128], sizes = [8, 64], strides = [1, 1]} : vector<8x192xf32> to vector<8x64xf32>
    %31 = arith.mulf %20, %30 : vector<8x64xf32>
    %32 = arith.addf %29, %31 : vector<8x64xf32>
    %33 = math.tanh %32 : vector<8x64xf32>
    %cst_11 = arith.constant 1.000000e+00 : f32
    %34 = vector.broadcast %cst_11 : f32 to vector<8x64xf32>
    %35 = arith.subf %34, %28 : vector<8x64xf32>
    %36 = arith.mulf %35, %33 : vector<8x64xf32>
    %37 = arith.mulf %28, %12 : vector<8x64xf32>
    %38 = arith.addf %36, %37 : vector<8x64xf32>
    %39 = vector.extract_strided_slice %9 {offsets = [0, 192], sizes = [8, 192], strides = [1, 1]} : vector<8x384xf32> to vector<8x192xf32>
    %40 = vector.extract_strided_slice %5 {offsets = [0, 192], sizes = [8, 192], strides = [1, 1]} : vector<8x384xf32> to vector<8x192xf32>
    %41 = vector.extract_strided_slice %2 {offsets = [0, 64], sizes = [8, 64], strides = [1, 1]} : vector<8x128xf32> to vector<8x64xf32>
    %42 = vector.extract_strided_slice %39 {offsets = [0, 0], sizes = [8, 64], strides = [1, 1]} : vector<8x192xf32> to vector<8x64xf32>
    %43 = vector.extract_strided_slice %40 {offsets = [0, 0], sizes = [8, 64], strides = [1, 1]} : vector<8x192xf32> to vector<8x64xf32>
    %44 = arith.addf %42, %43 : vector<8x64xf32>
    %45 = arith.negf %44 : vector<8x64xf32>
    %46 = math.exp %45 : vector<8x64xf32>
    %cst_12 = arith.constant 1.000000e+00 : f32
    %47 = vector.broadcast %cst_12 : f32 to vector<8x64xf32>
    %48 = arith.addf %47, %46 : vector<8x64xf32>
    %49 = arith.divf %47, %48 : vector<8x64xf32>
    %50 = vector.extract_strided_slice %39 {offsets = [0, 64], sizes = [8, 64], strides = [1, 1]} : vector<8x192xf32> to vector<8x64xf32>
    %51 = vector.extract_strided_slice %40 {offsets = [0, 64], sizes = [8, 64], strides = [1, 1]} : vector<8x192xf32> to vector<8x64xf32>
    %52 = arith.addf %50, %51 : vector<8x64xf32>
    %53 = arith.negf %52 : vector<8x64xf32>
    %54 = math.exp %53 : vector<8x64xf32>
    %cst_13 = arith.constant 1.000000e+00 : f32
    %55 = vector.broadcast %cst_13 : f32 to vector<8x64xf32>
    %56 = arith.addf %55, %54 : vector<8x64xf32>
    %57 = arith.divf %55, %56 : vector<8x64xf32>
    %58 = vector.extract_strided_slice %39 {offsets = [0, 128], sizes = [8, 64], strides = [1, 1]} : vector<8x192xf32> to vector<8x64xf32>
    %59 = vector.extract_strided_slice %40 {offsets = [0, 128], sizes = [8, 64], strides = [1, 1]} : vector<8x192xf32> to vector<8x64xf32>
    %60 = arith.mulf %49, %59 : vector<8x64xf32>
    %61 = arith.addf %58, %60 : vector<8x64xf32>
    %62 = math.tanh %61 : vector<8x64xf32>
    %cst_14 = arith.constant 1.000000e+00 : f32
    %63 = vector.broadcast %cst_14 : f32 to vector<8x64xf32>
    %64 = arith.subf %63, %57 : vector<8x64xf32>
    %65 = arith.mulf %64, %62 : vector<8x64xf32>
    %66 = arith.mulf %57, %41 : vector<8x64xf32>
    %67 = arith.addf %65, %66 : vector<8x64xf32>
    %c0_15 = arith.constant 0 : index
    %c0_16 = arith.constant 0 : index
    %c0_17 = arith.constant 0 : index
    %68 = vector.load %arg4[%c0_15, %c0_16, %c0_17] : memref<8x8x128xf32, #tpu.memory_space<vmem>>, vector<1x8x64xf32>
    %69 = vector.shape_cast %68 : vector<1x8x64xf32> to vector<8x64xf32>
    %70 = vector.shape_cast %38 : vector<8x64xf32> to vector<1x8x64xf32>
    tpu.vector_store %arg4[%c0_15, %c0_16, %c0_17], %70 {strides = array<i32>} : memref<8x8x128xf32, #tpu.memory_space<vmem>>, vector<1x8x64xf32>,
    %c7_18 = arith.constant 7 : index
    %c0_19 = arith.constant 0 : index
    %c64 = arith.constant 64 : index
    %71 = vector.load %arg4[%c7_18, %c0_19, %c64] : memref<8x8x128xf32, #tpu.memory_space<vmem>>, vector<1x8x64xf32>
    %72 = vector.shape_cast %71 : vector<1x8x64xf32> to vector<8x64xf32>
    %73 = vector.shape_cast %67 : vector<8x64xf32> to vector<1x8x64xf32>
    tpu.vector_store %arg4[%c7_18, %c0_19, %c64], %73 {strides = array<i32>} : memref<8x8x128xf32, #tpu.memory_space<vmem>>, vector<1x8x64xf32>,
    %74 = tpu.concatenate %38, %67 in 1 : vector<8x64xf32>, vector<8x64xf32> -> vector<8x128xf32>
    %cst_20 = arith.constant dense<0.000000e+00> : vector<8x384xf32>
    %75 = tpu.matmul %74, %0, %cst_20 {dimension_numbers = #tpu.dot_dimension_numbers<[1], [0], [0], [1], [0, 0, 1, 1], [], []>} : vector<8x128xf32>, vector<128x384xf32>, vector<8x384xf32> -> vector<8x384xf32>
    %76 = vector.broadcast %1 : vector<1x384xf32> to vector<8x384xf32>
    %77 = arith.addf %75, %76 : vector<8x384xf32>
    %c1 = arith.constant 1 : index
    %c0_21 = arith.constant 0 : index
    %c0_22 = arith.constant 0 : index
    %78 = vector.load %arg1[%c1, %c0_21, %c0_22] : memref<8x8x384xf32, #tpu.memory_space<vmem>>, vector<1x8x384xf32>
    %79 = vector.shape_cast %78 : vector<1x8x384xf32> to vector<8x384xf32>
    %c6 = arith.constant 6 : index
    %c0_23 = arith.constant 0 : index
    %c0_24 = arith.constant 0 : index
    %80 = vector.load %arg1[%c6, %c0_23, %c0_24] : memref<8x8x384xf32, #tpu.memory_space<vmem>>, vector<1x8x384xf32>
    %81 = vector.shape_cast %80 : vector<1x8x384xf32> to vector<8x384xf32>
    %82 = vector.extract_strided_slice %79 {offsets = [0, 0], sizes = [8, 192], strides = [1, 1]} : vector<8x384xf32> to vector<8x192xf32>
    %83 = vector.extract_strided_slice %77 {offsets = [0, 0], sizes = [8, 192], strides = [1, 1]} : vector<8x384xf32> to vector<8x192xf32>
    %84 = vector.extract_strided_slice %74 {offsets = [0, 0], sizes = [8, 64], strides = [1, 1]} : vector<8x128xf32> to vector<8x64xf32>
    %85 = vector.extract_strided_slice %82 {offsets = [0, 0], sizes = [8, 64], strides = [1, 1]} : vector<8x192xf32> to vector<8x64xf32>
    %86 = vector.extract_strided_slice %83 {offsets = [0, 0], sizes = [8, 64], strides = [1, 1]} : vector<8x192xf32> to vector<8x64xf32>
    %87 = arith.addf %85, %86 : vector<8x64xf32>
    %88 = arith.negf %87 : vector<8x64xf32>
    %89 = math.exp %88 : vector<8x64xf32>
    %cst_25 = arith.constant 1.000000e+00 : f32
    %90 = vector.broadcast %cst_25 : f32 to vector<8x64xf32>
    %91 = arith.addf %90, %89 : vector<8x64xf32>
    %92 = arith.divf %90, %91 : vector<8x64xf32>
    %93 = vector.extract_strided_slice %82 {offsets = [0, 64], sizes = [8, 64], strides = [1, 1]} : vector<8x192xf32> to vector<8x64xf32>
    %94 = vector.extract_strided_slice %83 {offsets = [0, 64], sizes = [8, 64], strides = [1, 1]} : vector<8x192xf32> to vector<8x64xf32>
    %95 = arith.addf %93, %94 : vector<8x64xf32>
    %96 = arith.negf %95 : vector<8x64xf32>
    %97 = math.exp %96 : vector<8x64xf32>
    %cst_26 = arith.constant 1.000000e+00 : f32
    %98 = vector.broadcast %cst_26 : f32 to vector<8x64xf32>
    %99 = arith.addf %98, %97 : vector<8x64xf32>
    %100 = arith.divf %98, %99 : vector<8x64xf32>
    %101 = vector.extract_strided_slice %82 {offsets = [0, 128], sizes = [8, 64], strides = [1, 1]} : vector<8x192xf32> to vector<8x64xf32>
    %102 = vector.extract_strided_slice %83 {offsets = [0, 128], sizes = [8, 64], strides = [1, 1]} : vector<8x192xf32> to vector<8x64xf32>
    %103 = arith.mulf %92, %102 : vector<8x64xf32>
    %104 = arith.addf %101, %103 : vector<8x64xf32>
    %105 = math.tanh %104 : vector<8x64xf32>
    %cst_27 = arith.constant 1.000000e+00 : f32
    %106 = vector.broadcast %cst_27 : f32 to vector<8x64xf32>
    %107 = arith.subf %106, %100 : vector<8x64xf32>
    %108 = arith.mulf %107, %105 : vector<8x64xf32>
    %109 = arith.mulf %100, %84 : vector<8x64xf32>
    %110 = arith.addf %108, %109 : vector<8x64xf32>
    %111 = vector.extract_strided_slice %81 {offsets = [0, 192], sizes = [8, 192], strides = [1, 1]} : vector<8x384xf32> to vector<8x192xf32>
    %112 = vector.extract_strided_slice %77 {offsets = [0, 192], sizes = [8, 192], strides = [1, 1]} : vector<8x384xf32> to vector<8x192xf32>
    %113 = vector.extract_strided_slice %74 {offsets = [0, 64], sizes = [8, 64], strides = [1, 1]} : vector<8x128xf32> to vector<8x64xf32>
    %114 = vector.extract_strided_slice %111 {offsets = [0, 0], sizes = [8, 64], strides = [1, 1]} : vector<8x192xf32> to vector<8x64xf32>
    %115 = vector.extract_strided_slice %112 {offsets = [0, 0], sizes = [8, 64], strides = [1, 1]} : vector<8x192xf32> to vector<8x64xf32>
    %116 = arith.addf %114, %115 : vector<8x64xf32>
    %117 = arith.negf %116 : vector<8x64xf32>
    %118 = math.exp %117 : vector<8x64xf32>
    %cst_28 = arith.constant 1.000000e+00 : f32
    %119 = vector.broadcast %cst_28 : f32 to vector<8x64xf32>
    %120 = arith.addf %119, %118 : vector<8x64xf32>
    %121 = arith.divf %119, %120 : vector<8x64xf32>
    %122 = vector.extract_strided_slice %111 {offsets = [0, 64], sizes = [8, 64], strides = [1, 1]} : vector<8x192xf32> to vector<8x64xf32>
    %123 = vector.extract_strided_slice %112 {offsets = [0, 64], sizes = [8, 64], strides = [1, 1]} : vector<8x192xf32> to vector<8x64xf32>
    %124 = arith.addf %122, %123 : vector<8x64xf32>
    %125 = arith.negf %124 : vector<8x64xf32>
    %126 = math.exp %125 : vector<8x64xf32>
    %cst_29 = arith.constant 1.000000e+00 : f32
    %127 = vector.broadcast %cst_29 : f32 to vector<8x64xf32>
    %128 = arith.addf %127, %126 : vector<8x64xf32>
    %129 = arith.divf %127, %128 : vector<8x64xf32>
    %130 = vector.extract_strided_slice %111 {offsets = [0, 128], sizes = [8, 64], strides = [1, 1]} : vector<8x192xf32> to vector<8x64xf32>
    %131 = vector.extract_strided_slice %112 {offsets = [0, 128], sizes = [8, 64], strides = [1, 1]} : vector<8x192xf32> to vector<8x64xf32>
    %132 = arith.mulf %121, %131 : vector<8x64xf32>
    %133 = arith.addf %130, %132 : vector<8x64xf32>
    %134 = math.tanh %133 : vector<8x64xf32>
    %cst_30 = arith.constant 1.000000e+00 : f32
    %135 = vector.broadcast %cst_30 : f32 to vector<8x64xf32>
    %136 = arith.subf %135, %129 : vector<8x64xf32>
    %137 = arith.mulf %136, %134 : vector<8x64xf32>
    %138 = arith.mulf %129, %113 : vector<8x64xf32>
    %139 = arith.addf %137, %138 : vector<8x64xf32>
    %c1_31 = arith.constant 1 : index
    %c0_32 = arith.constant 0 : index
    %c0_33 = arith.constant 0 : index
    %140 = vector.load %arg4[%c1_31, %c0_32, %c0_33] : memref<8x8x128xf32, #tpu.memory_space<vmem>>, vector<1x8x64xf32>
    %141 = vector.shape_cast %140 : vector<1x8x64xf32> to vector<8x64xf32>
    %142 = vector.shape_cast %110 : vector<8x64xf32> to vector<1x8x64xf32>
    tpu.vector_store %arg4[%c1_31, %c0_32, %c0_33], %142 {strides = array<i32>} : memref<8x8x128xf32, #tpu.memory_space<vmem>>, vector<1x8x64xf32>,
    %c6_34 = arith.constant 6 : index
    %c0_35 = arith.constant 0 : index
    %c64_36 = arith.constant 64 : index
    %143 = vector.load %arg4[%c6_34, %c0_35, %c64_36] : memref<8x8x128xf32, #tpu.memory_space<vmem>>, vector<1x8x64xf32>
    %144 = vector.shape_cast %143 : vector<1x8x64xf32> to vector<8x64xf32>
    %145 = vector.shape_cast %139 : vector<8x64xf32> to vector<1x8x64xf32>
    tpu.vector_store %arg4[%c6_34, %c0_35, %c64_36], %145 {strides = array<i32>} : memref<8x8x128xf32, #tpu.memory_space<vmem>>, vector<1x8x64xf32>,
    %146 = tpu.concatenate %110, %139 in 1 : vector<8x64xf32>, vector<8x64xf32> -> vector<8x128xf32>
    %cst_37 = arith.constant dense<0.000000e+00> : vector<8x384xf32>
    %147 = tpu.matmul %146, %0, %cst_37 {dimension_numbers = #tpu.dot_dimension_numbers<[1], [0], [0], [1], [0, 0, 1, 1], [], []>} : vector<8x128xf32>, vector<128x384xf32>, vector<8x384xf32> -> vector<8x384xf32>
    %148 = vector.broadcast %1 : vector<1x384xf32> to vector<8x384xf32>
    %149 = arith.addf %147, %148 : vector<8x384xf32>
    %c2 = arith.constant 2 : index
    %c0_38 = arith.constant 0 : index
    %c0_39 = arith.constant 0 : index
    %150 = vector.load %arg1[%c2, %c0_38, %c0_39] : memref<8x8x384xf32, #tpu.memory_space<vmem>>, vector<1x8x384xf32>
    %151 = vector.shape_cast %150 : vector<1x8x384xf32> to vector<8x384xf32>
    %c5 = arith.constant 5 : index
    %c0_40 = arith.constant 0 : index
    %c0_41 = arith.constant 0 : index
    %152 = vector.load %arg1[%c5, %c0_40, %c0_41] : memref<8x8x384xf32, #tpu.memory_space<vmem>>, vector<1x8x384xf32>
    %153 = vector.shape_cast %152 : vector<1x8x384xf32> to vector<8x384xf32>
    %154 = vector.extract_strided_slice %151 {offsets = [0, 0], sizes = [8, 192], strides = [1, 1]} : vector<8x384xf32> to vector<8x192xf32>
    %155 = vector.extract_strided_slice %149 {offsets = [0, 0], sizes = [8, 192], strides = [1, 1]} : vector<8x384xf32> to vector<8x192xf32>
    %156 = vector.extract_strided_slice %146 {offsets = [0, 0], sizes = [8, 64], strides = [1, 1]} : vector<8x128xf32> to vector<8x64xf32>
    %157 = vector.extract_strided_slice %154 {offsets = [0, 0], sizes = [8, 64], strides = [1, 1]} : vector<8x192xf32> to vector<8x64xf32>
    %158 = vector.extract_strided_slice %155 {offsets = [0, 0], sizes = [8, 64], strides = [1, 1]} : vector<8x192xf32> to vector<8x64xf32>
    %159 = arith.addf %157, %158 : vector<8x64xf32>
    %160 = arith.negf %159 : vector<8x64xf32>
    %161 = math.exp %160 : vector<8x64xf32>
    %cst_42 = arith.constant 1.000000e+00 : f32
    %162 = vector.broadcast %cst_42 : f32 to vector<8x64xf32>
    %163 = arith.addf %162, %161 : vector<8x64xf32>
    %164 = arith.divf %162, %163 : vector<8x64xf32>
    %165 = vector.extract_strided_slice %154 {offsets = [0, 64], sizes = [8, 64], strides = [1, 1]} : vector<8x192xf32> to vector<8x64xf32>
    %166 = vector.extract_strided_slice %155 {offsets = [0, 64], sizes = [8, 64], strides = [1, 1]} : vector<8x192xf32> to vector<8x64xf32>
    %167 = arith.addf %165, %166 : vector<8x64xf32>
    %168 = arith.negf %167 : vector<8x64xf32>
    %169 = math.exp %168 : vector<8x64xf32>
    %cst_43 = arith.constant 1.000000e+00 : f32
    %170 = vector.broadcast %cst_43 : f32 to vector<8x64xf32>
    %171 = arith.addf %170, %169 : vector<8x64xf32>
    %172 = arith.divf %170, %171 : vector<8x64xf32>
    %173 = vector.extract_strided_slice %154 {offsets = [0, 128], sizes = [8, 64], strides = [1, 1]} : vector<8x192xf32> to vector<8x64xf32>
    %174 = vector.extract_strided_slice %155 {offsets = [0, 128], sizes = [8, 64], strides = [1, 1]} : vector<8x192xf32> to vector<8x64xf32>
    %175 = arith.mulf %164, %174 : vector<8x64xf32>
    %176 = arith.addf %173, %175 : vector<8x64xf32>
    %177 = math.tanh %176 : vector<8x64xf32>
    %cst_44 = arith.constant 1.000000e+00 : f32
    %178 = vector.broadcast %cst_44 : f32 to vector<8x64xf32>
    %179 = arith.subf %178, %172 : vector<8x64xf32>
    %180 = arith.mulf %179, %177 : vector<8x64xf32>
    %181 = arith.mulf %172, %156 : vector<8x64xf32>
    %182 = arith.addf %180, %181 : vector<8x64xf32>
    %183 = vector.extract_strided_slice %153 {offsets = [0, 192], sizes = [8, 192], strides = [1, 1]} : vector<8x384xf32> to vector<8x192xf32>
    %184 = vector.extract_strided_slice %149 {offsets = [0, 192], sizes = [8, 192], strides = [1, 1]} : vector<8x384xf32> to vector<8x192xf32>
    %185 = vector.extract_strided_slice %146 {offsets = [0, 64], sizes = [8, 64], strides = [1, 1]} : vector<8x128xf32> to vector<8x64xf32>
    %186 = vector.extract_strided_slice %183 {offsets = [0, 0], sizes = [8, 64], strides = [1, 1]} : vector<8x192xf32> to vector<8x64xf32>
    %187 = vector.extract_strided_slice %184 {offsets = [0, 0], sizes = [8, 64], strides = [1, 1]} : vector<8x192xf32> to vector<8x64xf32>
    %188 = arith.addf %186, %187 : vector<8x64xf32>
    %189 = arith.negf %188 : vector<8x64xf32>
    %190 = math.exp %189 : vector<8x64xf32>
    %cst_45 = arith.constant 1.000000e+00 : f32
    %191 = vector.broadcast %cst_45 : f32 to vector<8x64xf32>
    %192 = arith.addf %191, %190 : vector<8x64xf32>
    %193 = arith.divf %191, %192 : vector<8x64xf32>
    %194 = vector.extract_strided_slice %183 {offsets = [0, 64], sizes = [8, 64], strides = [1, 1]} : vector<8x192xf32> to vector<8x64xf32>
    %195 = vector.extract_strided_slice %184 {offsets = [0, 64], sizes = [8, 64], strides = [1, 1]} : vector<8x192xf32> to vector<8x64xf32>
    %196 = arith.addf %194, %195 : vector<8x64xf32>
    %197 = arith.negf %196 : vector<8x64xf32>
    %198 = math.exp %197 : vector<8x64xf32>
    %cst_46 = arith.constant 1.000000e+00 : f32
    %199 = vector.broadcast %cst_46 : f32 to vector<8x64xf32>
    %200 = arith.addf %199, %198 : vector<8x64xf32>
    %201 = arith.divf %199, %200 : vector<8x64xf32>
    %202 = vector.extract_strided_slice %183 {offsets = [0, 128], sizes = [8, 64], strides = [1, 1]} : vector<8x192xf32> to vector<8x64xf32>
    %203 = vector.extract_strided_slice %184 {offsets = [0, 128], sizes = [8, 64], strides = [1, 1]} : vector<8x192xf32> to vector<8x64xf32>
    %204 = arith.mulf %193, %203 : vector<8x64xf32>
    %205 = arith.addf %202, %204 : vector<8x64xf32>
    %206 = math.tanh %205 : vector<8x64xf32>
    %cst_47 = arith.constant 1.000000e+00 : f32
    %207 = vector.broadcast %cst_47 : f32 to vector<8x64xf32>
    %208 = arith.subf %207, %201 : vector<8x64xf32>
    %209 = arith.mulf %208, %206 : vector<8x64xf32>
    %210 = arith.mulf %201, %185 : vector<8x64xf32>
    %211 = arith.addf %209, %210 : vector<8x64xf32>
    %c2_48 = arith.constant 2 : index
    %c0_49 = arith.constant 0 : index
    %c0_50 = arith.constant 0 : index
    %212 = vector.load %arg4[%c2_48, %c0_49, %c0_50] : memref<8x8x128xf32, #tpu.memory_space<vmem>>, vector<1x8x64xf32>
    %213 = vector.shape_cast %212 : vector<1x8x64xf32> to vector<8x64xf32>
    %214 = vector.shape_cast %182 : vector<8x64xf32> to vector<1x8x64xf32>
    tpu.vector_store %arg4[%c2_48, %c0_49, %c0_50], %214 {strides = array<i32>} : memref<8x8x128xf32, #tpu.memory_space<vmem>>, vector<1x8x64xf32>,
    %c5_51 = arith.constant 5 : index
    %c0_52 = arith.constant 0 : index
    %c64_53 = arith.constant 64 : index
    %215 = vector.load %arg4[%c5_51, %c0_52, %c64_53] : memref<8x8x128xf32, #tpu.memory_space<vmem>>, vector<1x8x64xf32>
    %216 = vector.shape_cast %215 : vector<1x8x64xf32> to vector<8x64xf32>
    %217 = vector.shape_cast %211 : vector<8x64xf32> to vector<1x8x64xf32>
    tpu.vector_store %arg4[%c5_51, %c0_52, %c64_53], %217 {strides = array<i32>} : memref<8x8x128xf32, #tpu.memory_space<vmem>>, vector<1x8x64xf32>,
    %218 = tpu.concatenate %182, %211 in 1 : vector<8x64xf32>, vector<8x64xf32> -> vector<8x128xf32>
    %cst_54 = arith.constant dense<0.000000e+00> : vector<8x384xf32>
    %219 = tpu.matmul %218, %0, %cst_54 {dimension_numbers = #tpu.dot_dimension_numbers<[1], [0], [0], [1], [0, 0, 1, 1], [], []>} : vector<8x128xf32>, vector<128x384xf32>, vector<8x384xf32> -> vector<8x384xf32>
    %220 = vector.broadcast %1 : vector<1x384xf32> to vector<8x384xf32>
    %221 = arith.addf %219, %220 : vector<8x384xf32>
    %c3 = arith.constant 3 : index
    %c0_55 = arith.constant 0 : index
    %c0_56 = arith.constant 0 : index
    %222 = vector.load %arg1[%c3, %c0_55, %c0_56] : memref<8x8x384xf32, #tpu.memory_space<vmem>>, vector<1x8x384xf32>
    %223 = vector.shape_cast %222 : vector<1x8x384xf32> to vector<8x384xf32>
    %c4 = arith.constant 4 : index
    %c0_57 = arith.constant 0 : index
    %c0_58 = arith.constant 0 : index
    %224 = vector.load %arg1[%c4, %c0_57, %c0_58] : memref<8x8x384xf32, #tpu.memory_space<vmem>>, vector<1x8x384xf32>
    %225 = vector.shape_cast %224 : vector<1x8x384xf32> to vector<8x384xf32>
    %226 = vector.extract_strided_slice %223 {offsets = [0, 0], sizes = [8, 192], strides = [1, 1]} : vector<8x384xf32> to vector<8x192xf32>
    %227 = vector.extract_strided_slice %221 {offsets = [0, 0], sizes = [8, 192], strides = [1, 1]} : vector<8x384xf32> to vector<8x192xf32>
    %228 = vector.extract_strided_slice %218 {offsets = [0, 0], sizes = [8, 64], strides = [1, 1]} : vector<8x128xf32> to vector<8x64xf32>
    %229 = vector.extract_strided_slice %226 {offsets = [0, 0], sizes = [8, 64], strides = [1, 1]} : vector<8x192xf32> to vector<8x64xf32>
    %230 = vector.extract_strided_slice %227 {offsets = [0, 0], sizes = [8, 64], strides = [1, 1]} : vector<8x192xf32> to vector<8x64xf32>
    %231 = arith.addf %229, %230 : vector<8x64xf32>
    %232 = arith.negf %231 : vector<8x64xf32>
    %233 = math.exp %232 : vector<8x64xf32>
    %cst_59 = arith.constant 1.000000e+00 : f32
    %234 = vector.broadcast %cst_59 : f32 to vector<8x64xf32>
    %235 = arith.addf %234, %233 : vector<8x64xf32>
    %236 = arith.divf %234, %235 : vector<8x64xf32>
    %237 = vector.extract_strided_slice %226 {offsets = [0, 64], sizes = [8, 64], strides = [1, 1]} : vector<8x192xf32> to vector<8x64xf32>
    %238 = vector.extract_strided_slice %227 {offsets = [0, 64], sizes = [8, 64], strides = [1, 1]} : vector<8x192xf32> to vector<8x64xf32>
    %239 = arith.addf %237, %238 : vector<8x64xf32>
    %240 = arith.negf %239 : vector<8x64xf32>
    %241 = math.exp %240 : vector<8x64xf32>
    %cst_60 = arith.constant 1.000000e+00 : f32
    %242 = vector.broadcast %cst_60 : f32 to vector<8x64xf32>
    %243 = arith.addf %242, %241 : vector<8x64xf32>
    %244 = arith.divf %242, %243 : vector<8x64xf32>
    %245 = vector.extract_strided_slice %226 {offsets = [0, 128], sizes = [8, 64], strides = [1, 1]} : vector<8x192xf32> to vector<8x64xf32>
    %246 = vector.extract_strided_slice %227 {offsets = [0, 128], sizes = [8, 64], strides = [1, 1]} : vector<8x192xf32> to vector<8x64xf32>
    %247 = arith.mulf %236, %246 : vector<8x64xf32>
    %248 = arith.addf %245, %247 : vector<8x64xf32>
    %249 = math.tanh %248 : vector<8x64xf32>
    %cst_61 = arith.constant 1.000000e+00 : f32
    %250 = vector.broadcast %cst_61 : f32 to vector<8x64xf32>
    %251 = arith.subf %250, %244 : vector<8x64xf32>
    %252 = arith.mulf %251, %249 : vector<8x64xf32>
    %253 = arith.mulf %244, %228 : vector<8x64xf32>
    %254 = arith.addf %252, %253 : vector<8x64xf32>
    %255 = vector.extract_strided_slice %225 {offsets = [0, 192], sizes = [8, 192], strides = [1, 1]} : vector<8x384xf32> to vector<8x192xf32>
    %256 = vector.extract_strided_slice %221 {offsets = [0, 192], sizes = [8, 192], strides = [1, 1]} : vector<8x384xf32> to vector<8x192xf32>
    %257 = vector.extract_strided_slice %218 {offsets = [0, 64], sizes = [8, 64], strides = [1, 1]} : vector<8x128xf32> to vector<8x64xf32>
    %258 = vector.extract_strided_slice %255 {offsets = [0, 0], sizes = [8, 64], strides = [1, 1]} : vector<8x192xf32> to vector<8x64xf32>
    %259 = vector.extract_strided_slice %256 {offsets = [0, 0], sizes = [8, 64], strides = [1, 1]} : vector<8x192xf32> to vector<8x64xf32>
    %260 = arith.addf %258, %259 : vector<8x64xf32>
    %261 = arith.negf %260 : vector<8x64xf32>
    %262 = math.exp %261 : vector<8x64xf32>
    %cst_62 = arith.constant 1.000000e+00 : f32
    %263 = vector.broadcast %cst_62 : f32 to vector<8x64xf32>
    %264 = arith.addf %263, %262 : vector<8x64xf32>
    %265 = arith.divf %263, %264 : vector<8x64xf32>
    %266 = vector.extract_strided_slice %255 {offsets = [0, 64], sizes = [8, 64], strides = [1, 1]} : vector<8x192xf32> to vector<8x64xf32>
    %267 = vector.extract_strided_slice %256 {offsets = [0, 64], sizes = [8, 64], strides = [1, 1]} : vector<8x192xf32> to vector<8x64xf32>
    %268 = arith.addf %266, %267 : vector<8x64xf32>
    %269 = arith.negf %268 : vector<8x64xf32>
    %270 = math.exp %269 : vector<8x64xf32>
    %cst_63 = arith.constant 1.000000e+00 : f32
    %271 = vector.broadcast %cst_63 : f32 to vector<8x64xf32>
    %272 = arith.addf %271, %270 : vector<8x64xf32>
    %273 = arith.divf %271, %272 : vector<8x64xf32>
    %274 = vector.extract_strided_slice %255 {offsets = [0, 128], sizes = [8, 64], strides = [1, 1]} : vector<8x192xf32> to vector<8x64xf32>
    %275 = vector.extract_strided_slice %256 {offsets = [0, 128], sizes = [8, 64], strides = [1, 1]} : vector<8x192xf32> to vector<8x64xf32>
    %276 = arith.mulf %265, %275 : vector<8x64xf32>
    %277 = arith.addf %274, %276 : vector<8x64xf32>
    %278 = math.tanh %277 : vector<8x64xf32>
    %cst_64 = arith.constant 1.000000e+00 : f32
    %279 = vector.broadcast %cst_64 : f32 to vector<8x64xf32>
    %280 = arith.subf %279, %273 : vector<8x64xf32>
    %281 = arith.mulf %280, %278 : vector<8x64xf32>
    %282 = arith.mulf %273, %257 : vector<8x64xf32>
    %283 = arith.addf %281, %282 : vector<8x64xf32>
    %c3_65 = arith.constant 3 : index
    %c0_66 = arith.constant 0 : index
    %c0_67 = arith.constant 0 : index
    %284 = vector.load %arg4[%c3_65, %c0_66, %c0_67] : memref<8x8x128xf32, #tpu.memory_space<vmem>>, vector<1x8x64xf32>
    %285 = vector.shape_cast %284 : vector<1x8x64xf32> to vector<8x64xf32>
    %286 = vector.shape_cast %254 : vector<8x64xf32> to vector<1x8x64xf32>
    tpu.vector_store %arg4[%c3_65, %c0_66, %c0_67], %286 {strides = array<i32>} : memref<8x8x128xf32, #tpu.memory_space<vmem>>, vector<1x8x64xf32>,
    %c4_68 = arith.constant 4 : index
    %c0_69 = arith.constant 0 : index
    %c64_70 = arith.constant 64 : index
    %287 = vector.load %arg4[%c4_68, %c0_69, %c64_70] : memref<8x8x128xf32, #tpu.memory_space<vmem>>, vector<1x8x64xf32>
    %288 = vector.shape_cast %287 : vector<1x8x64xf32> to vector<8x64xf32>
    %289 = vector.shape_cast %283 : vector<8x64xf32> to vector<1x8x64xf32>
    tpu.vector_store %arg4[%c4_68, %c0_69, %c64_70], %289 {strides = array<i32>} : memref<8x8x128xf32, #tpu.memory_space<vmem>>, vector<1x8x64xf32>,
    %290 = tpu.concatenate %254, %283 in 1 : vector<8x64xf32>, vector<8x64xf32> -> vector<8x128xf32>
    %cst_71 = arith.constant dense<0.000000e+00> : vector<8x384xf32>
    %291 = tpu.matmul %290, %0, %cst_71 {dimension_numbers = #tpu.dot_dimension_numbers<[1], [0], [0], [1], [0, 0, 1, 1], [], []>} : vector<8x128xf32>, vector<128x384xf32>, vector<8x384xf32> -> vector<8x384xf32>
    %292 = vector.broadcast %1 : vector<1x384xf32> to vector<8x384xf32>
    %293 = arith.addf %291, %292 : vector<8x384xf32>
    %c4_72 = arith.constant 4 : index
    %c0_73 = arith.constant 0 : index
    %c0_74 = arith.constant 0 : index
    %294 = vector.load %arg1[%c4_72, %c0_73, %c0_74] : memref<8x8x384xf32, #tpu.memory_space<vmem>>, vector<1x8x384xf32>
    %295 = vector.shape_cast %294 : vector<1x8x384xf32> to vector<8x384xf32>
    %c3_75 = arith.constant 3 : index
    %c0_76 = arith.constant 0 : index
    %c0_77 = arith.constant 0 : index
    %296 = vector.load %arg1[%c3_75, %c0_76, %c0_77] : memref<8x8x384xf32, #tpu.memory_space<vmem>>, vector<1x8x384xf32>
    %297 = vector.shape_cast %296 : vector<1x8x384xf32> to vector<8x384xf32>
    %298 = vector.extract_strided_slice %295 {offsets = [0, 0], sizes = [8, 192], strides = [1, 1]} : vector<8x384xf32> to vector<8x192xf32>
    %299 = vector.extract_strided_slice %293 {offsets = [0, 0], sizes = [8, 192], strides = [1, 1]} : vector<8x384xf32> to vector<8x192xf32>
    %300 = vector.extract_strided_slice %290 {offsets = [0, 0], sizes = [8, 64], strides = [1, 1]} : vector<8x128xf32> to vector<8x64xf32>
    %301 = vector.extract_strided_slice %298 {offsets = [0, 0], sizes = [8, 64], strides = [1, 1]} : vector<8x192xf32> to vector<8x64xf32>
    %302 = vector.extract_strided_slice %299 {offsets = [0, 0], sizes = [8, 64], strides = [1, 1]} : vector<8x192xf32> to vector<8x64xf32>
    %303 = arith.addf %301, %302 : vector<8x64xf32>
    %304 = arith.negf %303 : vector<8x64xf32>
    %305 = math.exp %304 : vector<8x64xf32>
    %cst_78 = arith.constant 1.000000e+00 : f32
    %306 = vector.broadcast %cst_78 : f32 to vector<8x64xf32>
    %307 = arith.addf %306, %305 : vector<8x64xf32>
    %308 = arith.divf %306, %307 : vector<8x64xf32>
    %309 = vector.extract_strided_slice %298 {offsets = [0, 64], sizes = [8, 64], strides = [1, 1]} : vector<8x192xf32> to vector<8x64xf32>
    %310 = vector.extract_strided_slice %299 {offsets = [0, 64], sizes = [8, 64], strides = [1, 1]} : vector<8x192xf32> to vector<8x64xf32>
    %311 = arith.addf %309, %310 : vector<8x64xf32>
    %312 = arith.negf %311 : vector<8x64xf32>
    %313 = math.exp %312 : vector<8x64xf32>
    %cst_79 = arith.constant 1.000000e+00 : f32
    %314 = vector.broadcast %cst_79 : f32 to vector<8x64xf32>
    %315 = arith.addf %314, %313 : vector<8x64xf32>
    %316 = arith.divf %314, %315 : vector<8x64xf32>
    %317 = vector.extract_strided_slice %298 {offsets = [0, 128], sizes = [8, 64], strides = [1, 1]} : vector<8x192xf32> to vector<8x64xf32>
    %318 = vector.extract_strided_slice %299 {offsets = [0, 128], sizes = [8, 64], strides = [1, 1]} : vector<8x192xf32> to vector<8x64xf32>
    %319 = arith.mulf %308, %318 : vector<8x64xf32>
    %320 = arith.addf %317, %319 : vector<8x64xf32>
    %321 = math.tanh %320 : vector<8x64xf32>
    %cst_80 = arith.constant 1.000000e+00 : f32
    %322 = vector.broadcast %cst_80 : f32 to vector<8x64xf32>
    %323 = arith.subf %322, %316 : vector<8x64xf32>
    %324 = arith.mulf %323, %321 : vector<8x64xf32>
    %325 = arith.mulf %316, %300 : vector<8x64xf32>
    %326 = arith.addf %324, %325 : vector<8x64xf32>
    %327 = vector.extract_strided_slice %297 {offsets = [0, 192], sizes = [8, 192], strides = [1, 1]} : vector<8x384xf32> to vector<8x192xf32>
    %328 = vector.extract_strided_slice %293 {offsets = [0, 192], sizes = [8, 192], strides = [1, 1]} : vector<8x384xf32> to vector<8x192xf32>
    %329 = vector.extract_strided_slice %290 {offsets = [0, 64], sizes = [8, 64], strides = [1, 1]} : vector<8x128xf32> to vector<8x64xf32>
    %330 = vector.extract_strided_slice %327 {offsets = [0, 0], sizes = [8, 64], strides = [1, 1]} : vector<8x192xf32> to vector<8x64xf32>
    %331 = vector.extract_strided_slice %328 {offsets = [0, 0], sizes = [8, 64], strides = [1, 1]} : vector<8x192xf32> to vector<8x64xf32>
    %332 = arith.addf %330, %331 : vector<8x64xf32>
    %333 = arith.negf %332 : vector<8x64xf32>
    %334 = math.exp %333 : vector<8x64xf32>
    %cst_81 = arith.constant 1.000000e+00 : f32
    %335 = vector.broadcast %cst_81 : f32 to vector<8x64xf32>
    %336 = arith.addf %335, %334 : vector<8x64xf32>
    %337 = arith.divf %335, %336 : vector<8x64xf32>
    %338 = vector.extract_strided_slice %327 {offsets = [0, 64], sizes = [8, 64], strides = [1, 1]} : vector<8x192xf32> to vector<8x64xf32>
    %339 = vector.extract_strided_slice %328 {offsets = [0, 64], sizes = [8, 64], strides = [1, 1]} : vector<8x192xf32> to vector<8x64xf32>
    %340 = arith.addf %338, %339 : vector<8x64xf32>
    %341 = arith.negf %340 : vector<8x64xf32>
    %342 = math.exp %341 : vector<8x64xf32>
    %cst_82 = arith.constant 1.000000e+00 : f32
    %343 = vector.broadcast %cst_82 : f32 to vector<8x64xf32>
    %344 = arith.addf %343, %342 : vector<8x64xf32>
    %345 = arith.divf %343, %344 : vector<8x64xf32>
    %346 = vector.extract_strided_slice %327 {offsets = [0, 128], sizes = [8, 64], strides = [1, 1]} : vector<8x192xf32> to vector<8x64xf32>
    %347 = vector.extract_strided_slice %328 {offsets = [0, 128], sizes = [8, 64], strides = [1, 1]} : vector<8x192xf32> to vector<8x64xf32>
    %348 = arith.mulf %337, %347 : vector<8x64xf32>
    %349 = arith.addf %346, %348 : vector<8x64xf32>
    %350 = math.tanh %349 : vector<8x64xf32>
    %cst_83 = arith.constant 1.000000e+00 : f32
    %351 = vector.broadcast %cst_83 : f32 to vector<8x64xf32>
    %352 = arith.subf %351, %345 : vector<8x64xf32>
    %353 = arith.mulf %352, %350 : vector<8x64xf32>
    %354 = arith.mulf %345, %329 : vector<8x64xf32>
    %355 = arith.addf %353, %354 : vector<8x64xf32>
    %c4_84 = arith.constant 4 : index
    %c0_85 = arith.constant 0 : index
    %c0_86 = arith.constant 0 : index
    %356 = vector.load %arg4[%c4_84, %c0_85, %c0_86] : memref<8x8x128xf32, #tpu.memory_space<vmem>>, vector<1x8x64xf32>
    %357 = vector.shape_cast %356 : vector<1x8x64xf32> to vector<8x64xf32>
    %358 = vector.shape_cast %326 : vector<8x64xf32> to vector<1x8x64xf32>
    tpu.vector_store %arg4[%c4_84, %c0_85, %c0_86], %358 {strides = array<i32>} : memref<8x8x128xf32, #tpu.memory_space<vmem>>, vector<1x8x64xf32>,
    %c3_87 = arith.constant 3 : index
    %c0_88 = arith.constant 0 : index
    %c64_89 = arith.constant 64 : index
    %359 = vector.load %arg4[%c3_87, %c0_88, %c64_89] : memref<8x8x128xf32, #tpu.memory_space<vmem>>, vector<1x8x64xf32>
    %360 = vector.shape_cast %359 : vector<1x8x64xf32> to vector<8x64xf32>
    %361 = vector.shape_cast %355 : vector<8x64xf32> to vector<1x8x64xf32>
    tpu.vector_store %arg4[%c3_87, %c0_88, %c64_89], %361 {strides = array<i32>} : memref<8x8x128xf32, #tpu.memory_space<vmem>>, vector<1x8x64xf32>,
    %362 = tpu.concatenate %326, %355 in 1 : vector<8x64xf32>, vector<8x64xf32> -> vector<8x128xf32>
    %cst_90 = arith.constant dense<0.000000e+00> : vector<8x384xf32>
    %363 = tpu.matmul %362, %0, %cst_90 {dimension_numbers = #tpu.dot_dimension_numbers<[1], [0], [0], [1], [0, 0, 1, 1], [], []>} : vector<8x128xf32>, vector<128x384xf32>, vector<8x384xf32> -> vector<8x384xf32>
    %364 = vector.broadcast %1 : vector<1x384xf32> to vector<8x384xf32>
    %365 = arith.addf %363, %364 : vector<8x384xf32>
    %c5_91 = arith.constant 5 : index
    %c0_92 = arith.constant 0 : index
    %c0_93 = arith.constant 0 : index
    %366 = vector.load %arg1[%c5_91, %c0_92, %c0_93] : memref<8x8x384xf32, #tpu.memory_space<vmem>>, vector<1x8x384xf32>
    %367 = vector.shape_cast %366 : vector<1x8x384xf32> to vector<8x384xf32>
    %c2_94 = arith.constant 2 : index
    %c0_95 = arith.constant 0 : index
    %c0_96 = arith.constant 0 : index
    %368 = vector.load %arg1[%c2_94, %c0_95, %c0_96] : memref<8x8x384xf32, #tpu.memory_space<vmem>>, vector<1x8x384xf32>
    %369 = vector.shape_cast %368 : vector<1x8x384xf32> to vector<8x384xf32>
    %370 = vector.extract_strided_slice %367 {offsets = [0, 0], sizes = [8, 192], strides = [1, 1]} : vector<8x384xf32> to vector<8x192xf32>
    %371 = vector.extract_strided_slice %365 {offsets = [0, 0], sizes = [8, 192], strides = [1, 1]} : vector<8x384xf32> to vector<8x192xf32>
    %372 = vector.extract_strided_slice %362 {offsets = [0, 0], sizes = [8, 64], strides = [1, 1]} : vector<8x128xf32> to vector<8x64xf32>
    %373 = vector.extract_strided_slice %370 {offsets = [0, 0], sizes = [8, 64], strides = [1, 1]} : vector<8x192xf32> to vector<8x64xf32>
    %374 = vector.extract_strided_slice %371 {offsets = [0, 0], sizes = [8, 64], strides = [1, 1]} : vector<8x192xf32> to vector<8x64xf32>
    %375 = arith.addf %373, %374 : vector<8x64xf32>
    %376 = arith.negf %375 : vector<8x64xf32>
    %377 = math.exp %376 : vector<8x64xf32>
    %cst_97 = arith.constant 1.000000e+00 : f32
    %378 = vector.broadcast %cst_97 : f32 to vector<8x64xf32>
    %379 = arith.addf %378, %377 : vector<8x64xf32>
    %380 = arith.divf %378, %379 : vector<8x64xf32>
    %381 = vector.extract_strided_slice %370 {offsets = [0, 64], sizes = [8, 64], strides = [1, 1]} : vector<8x192xf32> to vector<8x64xf32>
    %382 = vector.extract_strided_slice %371 {offsets = [0, 64], sizes = [8, 64], strides = [1, 1]} : vector<8x192xf32> to vector<8x64xf32>
    %383 = arith.addf %381, %382 : vector<8x64xf32>
    %384 = arith.negf %383 : vector<8x64xf32>
    %385 = math.exp %384 : vector<8x64xf32>
    %cst_98 = arith.constant 1.000000e+00 : f32
    %386 = vector.broadcast %cst_98 : f32 to vector<8x64xf32>
    %387 = arith.addf %386, %385 : vector<8x64xf32>
    %388 = arith.divf %386, %387 : vector<8x64xf32>
    %389 = vector.extract_strided_slice %370 {offsets = [0, 128], sizes = [8, 64], strides = [1, 1]} : vector<8x192xf32> to vector<8x64xf32>
    %390 = vector.extract_strided_slice %371 {offsets = [0, 128], sizes = [8, 64], strides = [1, 1]} : vector<8x192xf32> to vector<8x64xf32>
    %391 = arith.mulf %380, %390 : vector<8x64xf32>
    %392 = arith.addf %389, %391 : vector<8x64xf32>
    %393 = math.tanh %392 : vector<8x64xf32>
    %cst_99 = arith.constant 1.000000e+00 : f32
    %394 = vector.broadcast %cst_99 : f32 to vector<8x64xf32>
    %395 = arith.subf %394, %388 : vector<8x64xf32>
    %396 = arith.mulf %395, %393 : vector<8x64xf32>
    %397 = arith.mulf %388, %372 : vector<8x64xf32>
    %398 = arith.addf %396, %397 : vector<8x64xf32>
    %399 = vector.extract_strided_slice %369 {offsets = [0, 192], sizes = [8, 192], strides = [1, 1]} : vector<8x384xf32> to vector<8x192xf32>
    %400 = vector.extract_strided_slice %365 {offsets = [0, 192], sizes = [8, 192], strides = [1, 1]} : vector<8x384xf32> to vector<8x192xf32>
    %401 = vector.extract_strided_slice %362 {offsets = [0, 64], sizes = [8, 64], strides = [1, 1]} : vector<8x128xf32> to vector<8x64xf32>
    %402 = vector.extract_strided_slice %399 {offsets = [0, 0], sizes = [8, 64], strides = [1, 1]} : vector<8x192xf32> to vector<8x64xf32>
    %403 = vector.extract_strided_slice %400 {offsets = [0, 0], sizes = [8, 64], strides = [1, 1]} : vector<8x192xf32> to vector<8x64xf32>
    %404 = arith.addf %402, %403 : vector<8x64xf32>
    %405 = arith.negf %404 : vector<8x64xf32>
    %406 = math.exp %405 : vector<8x64xf32>
    %cst_100 = arith.constant 1.000000e+00 : f32
    %407 = vector.broadcast %cst_100 : f32 to vector<8x64xf32>
    %408 = arith.addf %407, %406 : vector<8x64xf32>
    %409 = arith.divf %407, %408 : vector<8x64xf32>
    %410 = vector.extract_strided_slice %399 {offsets = [0, 64], sizes = [8, 64], strides = [1, 1]} : vector<8x192xf32> to vector<8x64xf32>
    %411 = vector.extract_strided_slice %400 {offsets = [0, 64], sizes = [8, 64], strides = [1, 1]} : vector<8x192xf32> to vector<8x64xf32>
    %412 = arith.addf %410, %411 : vector<8x64xf32>
    %413 = arith.negf %412 : vector<8x64xf32>
    %414 = math.exp %413 : vector<8x64xf32>
    %cst_101 = arith.constant 1.000000e+00 : f32
    %415 = vector.broadcast %cst_101 : f32 to vector<8x64xf32>
    %416 = arith.addf %415, %414 : vector<8x64xf32>
    %417 = arith.divf %415, %416 : vector<8x64xf32>
    %418 = vector.extract_strided_slice %399 {offsets = [0, 128], sizes = [8, 64], strides = [1, 1]} : vector<8x192xf32> to vector<8x64xf32>
    %419 = vector.extract_strided_slice %400 {offsets = [0, 128], sizes = [8, 64], strides = [1, 1]} : vector<8x192xf32> to vector<8x64xf32>
    %420 = arith.mulf %409, %419 : vector<8x64xf32>
    %421 = arith.addf %418, %420 : vector<8x64xf32>
    %422 = math.tanh %421 : vector<8x64xf32>
    %cst_102 = arith.constant 1.000000e+00 : f32
    %423 = vector.broadcast %cst_102 : f32 to vector<8x64xf32>
    %424 = arith.subf %423, %417 : vector<8x64xf32>
    %425 = arith.mulf %424, %422 : vector<8x64xf32>
    %426 = arith.mulf %417, %401 : vector<8x64xf32>
    %427 = arith.addf %425, %426 : vector<8x64xf32>
    %c5_103 = arith.constant 5 : index
    %c0_104 = arith.constant 0 : index
    %c0_105 = arith.constant 0 : index
    %428 = vector.load %arg4[%c5_103, %c0_104, %c0_105] : memref<8x8x128xf32, #tpu.memory_space<vmem>>, vector<1x8x64xf32>
    %429 = vector.shape_cast %428 : vector<1x8x64xf32> to vector<8x64xf32>
    %430 = vector.shape_cast %398 : vector<8x64xf32> to vector<1x8x64xf32>
    tpu.vector_store %arg4[%c5_103, %c0_104, %c0_105], %430 {strides = array<i32>} : memref<8x8x128xf32, #tpu.memory_space<vmem>>, vector<1x8x64xf32>,
    %c2_106 = arith.constant 2 : index
    %c0_107 = arith.constant 0 : index
    %c64_108 = arith.constant 64 : index
    %431 = vector.load %arg4[%c2_106, %c0_107, %c64_108] : memref<8x8x128xf32, #tpu.memory_space<vmem>>, vector<1x8x64xf32>
    %432 = vector.shape_cast %431 : vector<1x8x64xf32> to vector<8x64xf32>
    %433 = vector.shape_cast %427 : vector<8x64xf32> to vector<1x8x64xf32>
    tpu.vector_store %arg4[%c2_106, %c0_107, %c64_108], %433 {strides = array<i32>} : memref<8x8x128xf32, #tpu.memory_space<vmem>>, vector<1x8x64xf32>,
    %434 = tpu.concatenate %398, %427 in 1 : vector<8x64xf32>, vector<8x64xf32> -> vector<8x128xf32>
    %cst_109 = arith.constant dense<0.000000e+00> : vector<8x384xf32>
    %435 = tpu.matmul %434, %0, %cst_109 {dimension_numbers = #tpu.dot_dimension_numbers<[1], [0], [0], [1], [0, 0, 1, 1], [], []>} : vector<8x128xf32>, vector<128x384xf32>, vector<8x384xf32> -> vector<8x384xf32>
    %436 = vector.broadcast %1 : vector<1x384xf32> to vector<8x384xf32>
    %437 = arith.addf %435, %436 : vector<8x384xf32>
    %c6_110 = arith.constant 6 : index
    %c0_111 = arith.constant 0 : index
    %c0_112 = arith.constant 0 : index
    %438 = vector.load %arg1[%c6_110, %c0_111, %c0_112] : memref<8x8x384xf32, #tpu.memory_space<vmem>>, vector<1x8x384xf32>
    %439 = vector.shape_cast %438 : vector<1x8x384xf32> to vector<8x384xf32>
    %c1_113 = arith.constant 1 : index
    %c0_114 = arith.constant 0 : index
    %c0_115 = arith.constant 0 : index
    %440 = vector.load %arg1[%c1_113, %c0_114, %c0_115] : memref<8x8x384xf32, #tpu.memory_space<vmem>>, vector<1x8x384xf32>
    %441 = vector.shape_cast %440 : vector<1x8x384xf32> to vector<8x384xf32>
    %442 = vector.extract_strided_slice %439 {offsets = [0, 0], sizes = [8, 192], strides = [1, 1]} : vector<8x384xf32> to vector<8x192xf32>
    %443 = vector.extract_strided_slice %437 {offsets = [0, 0], sizes = [8, 192], strides = [1, 1]} : vector<8x384xf32> to vector<8x192xf32>
    %444 = vector.extract_strided_slice %434 {offsets = [0, 0], sizes = [8, 64], strides = [1, 1]} : vector<8x128xf32> to vector<8x64xf32>
    %445 = vector.extract_strided_slice %442 {offsets = [0, 0], sizes = [8, 64], strides = [1, 1]} : vector<8x192xf32> to vector<8x64xf32>
    %446 = vector.extract_strided_slice %443 {offsets = [0, 0], sizes = [8, 64], strides = [1, 1]} : vector<8x192xf32> to vector<8x64xf32>
    %447 = arith.addf %445, %446 : vector<8x64xf32>
    %448 = arith.negf %447 : vector<8x64xf32>
    %449 = math.exp %448 : vector<8x64xf32>
    %cst_116 = arith.constant 1.000000e+00 : f32
    %450 = vector.broadcast %cst_116 : f32 to vector<8x64xf32>
    %451 = arith.addf %450, %449 : vector<8x64xf32>
    %452 = arith.divf %450, %451 : vector<8x64xf32>
    %453 = vector.extract_strided_slice %442 {offsets = [0, 64], sizes = [8, 64], strides = [1, 1]} : vector<8x192xf32> to vector<8x64xf32>
    %454 = vector.extract_strided_slice %443 {offsets = [0, 64], sizes = [8, 64], strides = [1, 1]} : vector<8x192xf32> to vector<8x64xf32>
    %455 = arith.addf %453, %454 : vector<8x64xf32>
    %456 = arith.negf %455 : vector<8x64xf32>
    %457 = math.exp %456 : vector<8x64xf32>
    %cst_117 = arith.constant 1.000000e+00 : f32
    %458 = vector.broadcast %cst_117 : f32 to vector<8x64xf32>
    %459 = arith.addf %458, %457 : vector<8x64xf32>
    %460 = arith.divf %458, %459 : vector<8x64xf32>
    %461 = vector.extract_strided_slice %442 {offsets = [0, 128], sizes = [8, 64], strides = [1, 1]} : vector<8x192xf32> to vector<8x64xf32>
    %462 = vector.extract_strided_slice %443 {offsets = [0, 128], sizes = [8, 64], strides = [1, 1]} : vector<8x192xf32> to vector<8x64xf32>
    %463 = arith.mulf %452, %462 : vector<8x64xf32>
    %464 = arith.addf %461, %463 : vector<8x64xf32>
    %465 = math.tanh %464 : vector<8x64xf32>
    %cst_118 = arith.constant 1.000000e+00 : f32
    %466 = vector.broadcast %cst_118 : f32 to vector<8x64xf32>
    %467 = arith.subf %466, %460 : vector<8x64xf32>
    %468 = arith.mulf %467, %465 : vector<8x64xf32>
    %469 = arith.mulf %460, %444 : vector<8x64xf32>
    %470 = arith.addf %468, %469 : vector<8x64xf32>
    %471 = vector.extract_strided_slice %441 {offsets = [0, 192], sizes = [8, 192], strides = [1, 1]} : vector<8x384xf32> to vector<8x192xf32>
    %472 = vector.extract_strided_slice %437 {offsets = [0, 192], sizes = [8, 192], strides = [1, 1]} : vector<8x384xf32> to vector<8x192xf32>
    %473 = vector.extract_strided_slice %434 {offsets = [0, 64], sizes = [8, 64], strides = [1, 1]} : vector<8x128xf32> to vector<8x64xf32>
    %474 = vector.extract_strided_slice %471 {offsets = [0, 0], sizes = [8, 64], strides = [1, 1]} : vector<8x192xf32> to vector<8x64xf32>
    %475 = vector.extract_strided_slice %472 {offsets = [0, 0], sizes = [8, 64], strides = [1, 1]} : vector<8x192xf32> to vector<8x64xf32>
    %476 = arith.addf %474, %475 : vector<8x64xf32>
    %477 = arith.negf %476 : vector<8x64xf32>
    %478 = math.exp %477 : vector<8x64xf32>
    %cst_119 = arith.constant 1.000000e+00 : f32
    %479 = vector.broadcast %cst_119 : f32 to vector<8x64xf32>
    %480 = arith.addf %479, %478 : vector<8x64xf32>
    %481 = arith.divf %479, %480 : vector<8x64xf32>
    %482 = vector.extract_strided_slice %471 {offsets = [0, 64], sizes = [8, 64], strides = [1, 1]} : vector<8x192xf32> to vector<8x64xf32>
    %483 = vector.extract_strided_slice %472 {offsets = [0, 64], sizes = [8, 64], strides = [1, 1]} : vector<8x192xf32> to vector<8x64xf32>
    %484 = arith.addf %482, %483 : vector<8x64xf32>
    %485 = arith.negf %484 : vector<8x64xf32>
    %486 = math.exp %485 : vector<8x64xf32>
    %cst_120 = arith.constant 1.000000e+00 : f32
    %487 = vector.broadcast %cst_120 : f32 to vector<8x64xf32>
    %488 = arith.addf %487, %486 : vector<8x64xf32>
    %489 = arith.divf %487, %488 : vector<8x64xf32>
    %490 = vector.extract_strided_slice %471 {offsets = [0, 128], sizes = [8, 64], strides = [1, 1]} : vector<8x192xf32> to vector<8x64xf32>
    %491 = vector.extract_strided_slice %472 {offsets = [0, 128], sizes = [8, 64], strides = [1, 1]} : vector<8x192xf32> to vector<8x64xf32>
    %492 = arith.mulf %481, %491 : vector<8x64xf32>
    %493 = arith.addf %490, %492 : vector<8x64xf32>
    %494 = math.tanh %493 : vector<8x64xf32>
    %cst_121 = arith.constant 1.000000e+00 : f32
    %495 = vector.broadcast %cst_121 : f32 to vector<8x64xf32>
    %496 = arith.subf %495, %489 : vector<8x64xf32>
    %497 = arith.mulf %496, %494 : vector<8x64xf32>
    %498 = arith.mulf %489, %473 : vector<8x64xf32>
    %499 = arith.addf %497, %498 : vector<8x64xf32>
    %c6_122 = arith.constant 6 : index
    %c0_123 = arith.constant 0 : index
    %c0_124 = arith.constant 0 : index
    %500 = vector.load %arg4[%c6_122, %c0_123, %c0_124] : memref<8x8x128xf32, #tpu.memory_space<vmem>>, vector<1x8x64xf32>
    %501 = vector.shape_cast %500 : vector<1x8x64xf32> to vector<8x64xf32>
    %502 = vector.shape_cast %470 : vector<8x64xf32> to vector<1x8x64xf32>
    tpu.vector_store %arg4[%c6_122, %c0_123, %c0_124], %502 {strides = array<i32>} : memref<8x8x128xf32, #tpu.memory_space<vmem>>, vector<1x8x64xf32>,
    %c1_125 = arith.constant 1 : index
    %c0_126 = arith.constant 0 : index
    %c64_127 = arith.constant 64 : index
    %503 = vector.load %arg4[%c1_125, %c0_126, %c64_127] : memref<8x8x128xf32, #tpu.memory_space<vmem>>, vector<1x8x64xf32>
    %504 = vector.shape_cast %503 : vector<1x8x64xf32> to vector<8x64xf32>
    %505 = vector.shape_cast %499 : vector<8x64xf32> to vector<1x8x64xf32>
    tpu.vector_store %arg4[%c1_125, %c0_126, %c64_127], %505 {strides = array<i32>} : memref<8x8x128xf32, #tpu.memory_space<vmem>>, vector<1x8x64xf32>,
    %506 = tpu.concatenate %470, %499 in 1 : vector<8x64xf32>, vector<8x64xf32> -> vector<8x128xf32>
    %cst_128 = arith.constant dense<0.000000e+00> : vector<8x384xf32>
    %507 = tpu.matmul %506, %0, %cst_128 {dimension_numbers = #tpu.dot_dimension_numbers<[1], [0], [0], [1], [0, 0, 1, 1], [], []>} : vector<8x128xf32>, vector<128x384xf32>, vector<8x384xf32> -> vector<8x384xf32>
    %508 = vector.broadcast %1 : vector<1x384xf32> to vector<8x384xf32>
    %509 = arith.addf %507, %508 : vector<8x384xf32>
    %c7_129 = arith.constant 7 : index
    %c0_130 = arith.constant 0 : index
    %c0_131 = arith.constant 0 : index
    %510 = vector.load %arg1[%c7_129, %c0_130, %c0_131] : memref<8x8x384xf32, #tpu.memory_space<vmem>>, vector<1x8x384xf32>
    %511 = vector.shape_cast %510 : vector<1x8x384xf32> to vector<8x384xf32>
    %c0_132 = arith.constant 0 : index
    %c0_133 = arith.constant 0 : index
    %c0_134 = arith.constant 0 : index
    %512 = vector.load %arg1[%c0_132, %c0_133, %c0_134] : memref<8x8x384xf32, #tpu.memory_space<vmem>>, vector<1x8x384xf32>
    %513 = vector.shape_cast %512 : vector<1x8x384xf32> to vector<8x384xf32>
    %514 = vector.extract_strided_slice %511 {offsets = [0, 0], sizes = [8, 192], strides = [1, 1]} : vector<8x384xf32> to vector<8x192xf32>
    %515 = vector.extract_strided_slice %509 {offsets = [0, 0], sizes = [8, 192], strides = [1, 1]} : vector<8x384xf32> to vector<8x192xf32>
    %516 = vector.extract_strided_slice %506 {offsets = [0, 0], sizes = [8, 64], strides = [1, 1]} : vector<8x128xf32> to vector<8x64xf32>
    %517 = vector.extract_strided_slice %514 {offsets = [0, 0], sizes = [8, 64], strides = [1, 1]} : vector<8x192xf32> to vector<8x64xf32>
    %518 = vector.extract_strided_slice %515 {offsets = [0, 0], sizes = [8, 64], strides = [1, 1]} : vector<8x192xf32> to vector<8x64xf32>
    %519 = arith.addf %517, %518 : vector<8x64xf32>
    %520 = arith.negf %519 : vector<8x64xf32>
    %521 = math.exp %520 : vector<8x64xf32>
    %cst_135 = arith.constant 1.000000e+00 : f32
    %522 = vector.broadcast %cst_135 : f32 to vector<8x64xf32>
    %523 = arith.addf %522, %521 : vector<8x64xf32>
    %524 = arith.divf %522, %523 : vector<8x64xf32>
    %525 = vector.extract_strided_slice %514 {offsets = [0, 64], sizes = [8, 64], strides = [1, 1]} : vector<8x192xf32> to vector<8x64xf32>
    %526 = vector.extract_strided_slice %515 {offsets = [0, 64], sizes = [8, 64], strides = [1, 1]} : vector<8x192xf32> to vector<8x64xf32>
    %527 = arith.addf %525, %526 : vector<8x64xf32>
    %528 = arith.negf %527 : vector<8x64xf32>
    %529 = math.exp %528 : vector<8x64xf32>
    %cst_136 = arith.constant 1.000000e+00 : f32
    %530 = vector.broadcast %cst_136 : f32 to vector<8x64xf32>
    %531 = arith.addf %530, %529 : vector<8x64xf32>
    %532 = arith.divf %530, %531 : vector<8x64xf32>
    %533 = vector.extract_strided_slice %514 {offsets = [0, 128], sizes = [8, 64], strides = [1, 1]} : vector<8x192xf32> to vector<8x64xf32>
    %534 = vector.extract_strided_slice %515 {offsets = [0, 128], sizes = [8, 64], strides = [1, 1]} : vector<8x192xf32> to vector<8x64xf32>
    %535 = arith.mulf %524, %534 : vector<8x64xf32>
    %536 = arith.addf %533, %535 : vector<8x64xf32>
    %537 = math.tanh %536 : vector<8x64xf32>
    %cst_137 = arith.constant 1.000000e+00 : f32
    %538 = vector.broadcast %cst_137 : f32 to vector<8x64xf32>
    %539 = arith.subf %538, %532 : vector<8x64xf32>
    %540 = arith.mulf %539, %537 : vector<8x64xf32>
    %541 = arith.mulf %532, %516 : vector<8x64xf32>
    %542 = arith.addf %540, %541 : vector<8x64xf32>
    %543 = vector.extract_strided_slice %513 {offsets = [0, 192], sizes = [8, 192], strides = [1, 1]} : vector<8x384xf32> to vector<8x192xf32>
    %544 = vector.extract_strided_slice %509 {offsets = [0, 192], sizes = [8, 192], strides = [1, 1]} : vector<8x384xf32> to vector<8x192xf32>
    %545 = vector.extract_strided_slice %506 {offsets = [0, 64], sizes = [8, 64], strides = [1, 1]} : vector<8x128xf32> to vector<8x64xf32>
    %546 = vector.extract_strided_slice %543 {offsets = [0, 0], sizes = [8, 64], strides = [1, 1]} : vector<8x192xf32> to vector<8x64xf32>
    %547 = vector.extract_strided_slice %544 {offsets = [0, 0], sizes = [8, 64], strides = [1, 1]} : vector<8x192xf32> to vector<8x64xf32>
    %548 = arith.addf %546, %547 : vector<8x64xf32>
    %549 = arith.negf %548 : vector<8x64xf32>
    %550 = math.exp %549 : vector<8x64xf32>
    %cst_138 = arith.constant 1.000000e+00 : f32
    %551 = vector.broadcast %cst_138 : f32 to vector<8x64xf32>
    %552 = arith.addf %551, %550 : vector<8x64xf32>
    %553 = arith.divf %551, %552 : vector<8x64xf32>
    %554 = vector.extract_strided_slice %543 {offsets = [0, 64], sizes = [8, 64], strides = [1, 1]} : vector<8x192xf32> to vector<8x64xf32>
    %555 = vector.extract_strided_slice %544 {offsets = [0, 64], sizes = [8, 64], strides = [1, 1]} : vector<8x192xf32> to vector<8x64xf32>
    %556 = arith.addf %554, %555 : vector<8x64xf32>
    %557 = arith.negf %556 : vector<8x64xf32>
    %558 = math.exp %557 : vector<8x64xf32>
    %cst_139 = arith.constant 1.000000e+00 : f32
    %559 = vector.broadcast %cst_139 : f32 to vector<8x64xf32>
    %560 = arith.addf %559, %558 : vector<8x64xf32>
    %561 = arith.divf %559, %560 : vector<8x64xf32>
    %562 = vector.extract_strided_slice %543 {offsets = [0, 128], sizes = [8, 64], strides = [1, 1]} : vector<8x192xf32> to vector<8x64xf32>
    %563 = vector.extract_strided_slice %544 {offsets = [0, 128], sizes = [8, 64], strides = [1, 1]} : vector<8x192xf32> to vector<8x64xf32>
    %564 = arith.mulf %553, %563 : vector<8x64xf32>
    %565 = arith.addf %562, %564 : vector<8x64xf32>
    %566 = math.tanh %565 : vector<8x64xf32>
    %cst_140 = arith.constant 1.000000e+00 : f32
    %567 = vector.broadcast %cst_140 : f32 to vector<8x64xf32>
    %568 = arith.subf %567, %561 : vector<8x64xf32>
    %569 = arith.mulf %568, %566 : vector<8x64xf32>
    %570 = arith.mulf %561, %545 : vector<8x64xf32>
    %571 = arith.addf %569, %570 : vector<8x64xf32>
    %c7_141 = arith.constant 7 : index
    %c0_142 = arith.constant 0 : index
    %c0_143 = arith.constant 0 : index
    %572 = vector.load %arg4[%c7_141, %c0_142, %c0_143] : memref<8x8x128xf32, #tpu.memory_space<vmem>>, vector<1x8x64xf32>
    %573 = vector.shape_cast %572 : vector<1x8x64xf32> to vector<8x64xf32>
    %574 = vector.shape_cast %542 : vector<8x64xf32> to vector<1x8x64xf32>
    tpu.vector_store %arg4[%c7_141, %c0_142, %c0_143], %574 {strides = array<i32>} : memref<8x8x128xf32, #tpu.memory_space<vmem>>, vector<1x8x64xf32>,
    %c0_144 = arith.constant 0 : index
    %c0_145 = arith.constant 0 : index
    %c64_146 = arith.constant 64 : index
    %575 = vector.load %arg4[%c0_144, %c0_145, %c64_146] : memref<8x8x128xf32, #tpu.memory_space<vmem>>, vector<1x8x64xf32>
    %576 = vector.shape_cast %575 : vector<1x8x64xf32> to vector<8x64xf32>
    %577 = vector.shape_cast %571 : vector<8x64xf32> to vector<1x8x64xf32>
    tpu.vector_store %arg4[%c0_144, %c0_145, %c64_146], %577 {strides = array<i32>} : memref<8x8x128xf32, #tpu.memory_space<vmem>>, vector<1x8x64xf32>,
    %578 = tpu.concatenate %542, %571 in 1 : vector<8x64xf32>, vector<8x64xf32> -> vector<8x128xf32>
    %c0_147 = arith.constant 0 : index
    %c0_148 = arith.constant 0 : index
    %579 = vector.load %arg5[%c0_147, %c0_148] : memref<8x128xf32, #tpu.memory_space<vmem>>, vector<8x128xf32>
    tpu.vector_store %arg5[%c0_147, %c0_148], %578 {strides = array<i32>} : memref<8x128xf32, #tpu.memory_space<vmem>>, vector<8x128xf32>,
    return
  }
  func.func @transform_0(%arg0: i32) -> (i32, i32, i32) {
    %c0_i32 = arith.constant 0 : i32
    %c0_i32_0 = arith.constant 0 : i32
    %c0_i32_1 = arith.constant 0 : i32
    %c0_i32_2 = arith.constant 0 : i32
    return %c0_i32, %c0_i32_0, %c0_i32_1 : i32, i32, i32
  }
  func.func @transform_1(%arg0: i32) -> (i32, i32) {
    %c0_i32 = arith.constant 0 : i32
    %c0_i32_0 = arith.constant 0 : i32
    %c0_i32_1 = arith.constant 0 : i32
    return %c0_i32, %c0_i32_0 : i32, i32
  }
  func.func @transform_2(%arg0: i32) -> (i32, i32) {
    %c0_i32 = arith.constant 0 : i32
    %c0_i32_0 = arith.constant 0 : i32
    %c0_i32_1 = arith.constant 0 : i32
    return %c0_i32, %c0_i32_0 : i32, i32
  }
  func.func @transform_3(%arg0: i32) -> (i32, i32, i32) {
    %c0_i32 = arith.constant 0 : i32
    %c0_i32_0 = arith.constant 0 : i32
    %c0_i32_1 = arith.constant 0 : i32
    %c0_i32_2 = arith.constant 0 : i32
    return %c0_i32, %c0_i32_0, %c0_i32_1 : i32, i32, i32
  }
  func.func @transform_4(%arg0: i32) -> (i32, i32) {
    %c0_i32 = arith.constant 0 : i32
    %c0_i32_0 = arith.constant 0 : i32
    %c0_i32_1 = arith.constant 0 : i32
    return %c0_i32, %c0_i32_0 : i32, i32
  }
}

module attributes {stable_mosaic.version = 11 : i64} {
  func.func @_linear_kernel(%arg0: i32, %arg1: memref<32x64xf32, #tpu.memory_space<vmem>>, %arg2: memref<64x384xf32, #tpu.memory_space<vmem>>, %arg3: memref<1x384xf32, #tpu.memory_space<vmem>>, %arg4: memref<32x384xf32, #tpu.memory_space<vmem>>) attributes {dimension_semantics = [#tpu.dimension_semantics<parallel>], iteration_bounds = array<i64: 2>, scalar_prefetch = 0 : i64, scratch_operands = 0 : i64, tpu.core_type = #tpu.core_type<tc>, window_params = [{transform_indices = @transform_0, window_bounds = array<i64: 32, 64>}, {pipeline_mode = #tpu.pipeline_mode<synchronous>, transform_indices = @transform_1, window_bounds = array<i64: 64, 384>}, {pipeline_mode = #tpu.pipeline_mode<synchronous>, transform_indices = @transform_2, window_bounds = array<i64: 1, 384>}, {transform_indices = @transform_3, window_bounds = array<i64: 32, 384>}]} {
    %c0 = arith.constant 0 : index
    %c0_0 = arith.constant 0 : index
    %0 = vector.load %arg1[%c0, %c0_0] : memref<32x64xf32, #tpu.memory_space<vmem>>, vector<32x64xf32>
    %c0_1 = arith.constant 0 : index
    %c0_2 = arith.constant 0 : index
    %1 = vector.load %arg2[%c0_1, %c0_2] : memref<64x384xf32, #tpu.memory_space<vmem>>, vector<64x384xf32>
    %cst = arith.constant dense<0.000000e+00> : vector<32x384xf32>
    %2 = tpu.matmul %0, %1, %cst {dimension_numbers = #tpu.dot_dimension_numbers<[1], [0], [0], [1], [0, 0, 1, 1], [], []>} : vector<32x64xf32>, vector<64x384xf32>, vector<32x384xf32> -> vector<32x384xf32>
    %c0_3 = arith.constant 0 : index
    %c0_4 = arith.constant 0 : index
    %3 = vector.load %arg3[%c0_3, %c0_4] : memref<1x384xf32, #tpu.memory_space<vmem>>, vector<1x384xf32>
    %4 = vector.broadcast %3 : vector<1x384xf32> to vector<32x384xf32>
    %5 = arith.addf %2, %4 : vector<32x384xf32>
    %c0_5 = arith.constant 0 : index
    %c0_6 = arith.constant 0 : index
    %6 = vector.load %arg4[%c0_5, %c0_6] : memref<32x384xf32, #tpu.memory_space<vmem>>, vector<32x384xf32>
    tpu.vector_store %arg4[%c0_5, %c0_6], %5 {strides = array<i32>} : memref<32x384xf32, #tpu.memory_space<vmem>>, vector<32x384xf32>,
    return
  }
  func.func @transform_0(%arg0: i32) -> (i32, i32) {
    %c0_i32 = arith.constant 0 : i32
    %c0_i32_0 = arith.constant 0 : i32
    return %arg0, %c0_i32 : i32, i32
  }
  func.func @transform_1(%arg0: i32) -> (i32, i32) {
    %c0_i32 = arith.constant 0 : i32
    %c0_i32_0 = arith.constant 0 : i32
    %c0_i32_1 = arith.constant 0 : i32
    return %c0_i32, %c0_i32_0 : i32, i32
  }
  func.func @transform_2(%arg0: i32) -> (i32, i32) {
    %c0_i32 = arith.constant 0 : i32
    %c0_i32_0 = arith.constant 0 : i32
    %c0_i32_1 = arith.constant 0 : i32
    return %c0_i32, %c0_i32_0 : i32, i32
  }
  func.func @transform_3(%arg0: i32) -> (i32, i32) {
    %c0_i32 = arith.constant 0 : i32
    %c0_i32_0 = arith.constant 0 : i32
    return %arg0, %c0_i32 : i32, i32
  }
}

module attributes {stable_mosaic.version = 11 : i64} {
  func.func @_selgate_kernel(%arg0: i32, %arg1: memref<8x8x128xf32, #tpu.memory_space<vmem>>, %arg2: memref<8x128xf32, #tpu.memory_space<vmem>>, %arg3: memref<128x128xf32, #tpu.memory_space<vmem>>, %arg4: memref<128x128xf32, #tpu.memory_space<vmem>>, %arg5: memref<1x128xf32, #tpu.memory_space<vmem>>, %arg6: memref<8x8x128xf32, #tpu.memory_space<vmem>>) attributes {dimension_semantics = [#tpu.dimension_semantics<parallel>], iteration_bounds = array<i64: 1>, scalar_prefetch = 0 : i64, scratch_operands = 0 : i64, tpu.core_type = #tpu.core_type<tc>, window_params = [{transform_indices = @transform_0, window_bounds = array<i64: 8, 8, 128>}, {pipeline_mode = #tpu.pipeline_mode<synchronous>, transform_indices = @transform_1, window_bounds = array<i64: 8, 128>}, {pipeline_mode = #tpu.pipeline_mode<synchronous>, transform_indices = @transform_2, window_bounds = array<i64: 128, 128>}, {pipeline_mode = #tpu.pipeline_mode<synchronous>, transform_indices = @transform_3, window_bounds = array<i64: 128, 128>}, {pipeline_mode = #tpu.pipeline_mode<synchronous>, transform_indices = @transform_4, window_bounds = array<i64: 1, 128>}, {transform_indices = @transform_5, window_bounds = array<i64: 8, 8, 128>}]} {
    %c0 = arith.constant 0 : index
    %c0_0 = arith.constant 0 : index
    %c0_1 = arith.constant 0 : index
    %0 = vector.load %arg1[%c0, %c0_0, %c0_1] : memref<8x8x128xf32, #tpu.memory_space<vmem>>, vector<8x8x128xf32>
    %c0_2 = arith.constant 0 : index
    %c0_3 = arith.constant 0 : index
    %1 = vector.load %arg2[%c0_2, %c0_3] : memref<8x128xf32, #tpu.memory_space<vmem>>, vector<8x128xf32>
    %c0_4 = arith.constant 0 : index
    %c0_5 = arith.constant 0 : index
    %2 = vector.load %arg4[%c0_4, %c0_5] : memref<128x128xf32, #tpu.memory_space<vmem>>, vector<128x128xf32>
    %cst = arith.constant dense<0.000000e+00> : vector<8x128xf32>
    %3 = tpu.matmul %1, %2, %cst {dimension_numbers = #tpu.dot_dimension_numbers<[1], [0], [0], [1], [0, 0, 1, 1], [], []>} : vector<8x128xf32>, vector<128x128xf32>, vector<8x128xf32> -> vector<8x128xf32>
    %c0_6 = arith.constant 0 : index
    %c0_7 = arith.constant 0 : index
    %4 = vector.load %arg5[%c0_6, %c0_7] : memref<1x128xf32, #tpu.memory_space<vmem>>, vector<1x128xf32>
    %5 = vector.broadcast %4 : vector<1x128xf32> to vector<8x128xf32>
    %6 = arith.addf %3, %5 : vector<8x128xf32>
    %7 = vector.shape_cast %0 : vector<8x8x128xf32> to vector<64x128xf32>
    %c0_8 = arith.constant 0 : index
    %c0_9 = arith.constant 0 : index
    %8 = vector.load %arg3[%c0_8, %c0_9] : memref<128x128xf32, #tpu.memory_space<vmem>>, vector<128x128xf32>
    %cst_10 = arith.constant dense<0.000000e+00> : vector<64x128xf32>
    %9 = tpu.matmul %7, %8, %cst_10 {dimension_numbers = #tpu.dot_dimension_numbers<[1], [0], [0], [1], [0, 0, 1, 1], [], []>} : vector<64x128xf32>, vector<128x128xf32>, vector<64x128xf32> -> vector<64x128xf32>
    %10 = vector.shape_cast %9 : vector<64x128xf32> to vector<8x8x128xf32>
    %11 = vector.shape_cast %6 : vector<8x128xf32> to vector<1x8x128xf32>
    %12 = vector.broadcast %11 : vector<1x8x128xf32> to vector<8x8x128xf32>
    %13 = arith.addf %10, %12 : vector<8x8x128xf32>
    %14 = arith.negf %13 : vector<8x8x128xf32>
    %15 = math.exp %14 : vector<8x8x128xf32>
    %cst_11 = arith.constant 1.000000e+00 : f32
    %16 = vector.broadcast %cst_11 : f32 to vector<8x8x128xf32>
    %17 = arith.addf %16, %15 : vector<8x8x128xf32>
    %18 = arith.divf %16, %17 : vector<8x8x128xf32>
    %19 = arith.mulf %0, %18 : vector<8x8x128xf32>
    %c0_12 = arith.constant 0 : index
    %c0_13 = arith.constant 0 : index
    %c0_14 = arith.constant 0 : index
    %20 = vector.load %arg6[%c0_12, %c0_13, %c0_14] : memref<8x8x128xf32, #tpu.memory_space<vmem>>, vector<8x8x128xf32>
    tpu.vector_store %arg6[%c0_12, %c0_13, %c0_14], %19 {strides = array<i32>} : memref<8x8x128xf32, #tpu.memory_space<vmem>>, vector<8x8x128xf32>,
    return
  }
  func.func @transform_0(%arg0: i32) -> (i32, i32, i32) {
    %c0_i32 = arith.constant 0 : i32
    %c0_i32_0 = arith.constant 0 : i32
    %c0_i32_1 = arith.constant 0 : i32
    return %arg0, %c0_i32, %c0_i32_0 : i32, i32, i32
  }
  func.func @transform_1(%arg0: i32) -> (i32, i32) {
    %c0_i32 = arith.constant 0 : i32
    %c0_i32_0 = arith.constant 0 : i32
    %c0_i32_1 = arith.constant 0 : i32
    return %c0_i32, %c0_i32_0 : i32, i32
  }
  func.func @transform_2(%arg0: i32) -> (i32, i32) {
    %c0_i32 = arith.constant 0 : i32
    %c0_i32_0 = arith.constant 0 : i32
    %c0_i32_1 = arith.constant 0 : i32
    return %c0_i32, %c0_i32_0 : i32, i32
  }
  func.func @transform_3(%arg0: i32) -> (i32, i32) {
    %c0_i32 = arith.constant 0 : i32
    %c0_i32_0 = arith.constant 0 : i32
    %c0_i32_1 = arith.constant 0 : i32
    return %c0_i32, %c0_i32_0 : i32, i32
  }
  func.func @transform_4(%arg0: i32) -> (i32, i32) {
    %c0_i32 = arith.constant 0 : i32
    %c0_i32_0 = arith.constant 0 : i32
    %c0_i32_1 = arith.constant 0 : i32
    return %c0_i32, %c0_i32_0 : i32, i32
  }
  func.func @transform_5(%arg0: i32) -> (i32, i32, i32) {
    %c0_i32 = arith.constant 0 : i32
    %c0_i32_0 = arith.constant 0 : i32
    %c0_i32_1 = arith.constant 0 : i32
    return %arg0, %c0_i32, %c0_i32_0 : i32, i32, i32
  }
}

</mosaic_0001>

<bundles_post_ra>
// kernel: encoder_forward.5
= control target key start
LH: loop header
LB: loop body
LE: loop exit
PB: predicated region body
PF: predicated region fallthrough
CT: control target
= control target key end

     0   :  { %v579_v3 = vmov 0.0|0.0   ;;  %vm580_vm0 = vmmov 0   ;;  %v581_v8 = vmov 0.0   ;;  %s793_s0 = inlined_call_operand.vmem [shape: f32[8,8,128], index: 0, kind: input, shape index: {}]   ;;  %s794_s1 = inlined_call_operand.vmem [shape: f32[8,128], index: 1, kind: input, shape index: {}]   ;;  %s795_s2 = inlined_call_operand.vmem [shape: f32[128,128], index: 2, kind: input, shape index: {}]   ;;  %s796_s3 = inlined_call_operand.vmem [shape: f32[128,128], index: 3, kind: input, shape index: {}]   ;;  %s797_s4 = inlined_call_operand.vmem [shape: f32[1,128], index: 4, kind: input, shape index: {}]   ;;  %s798_s5 = inlined_call_operand.hbm [shape: f32[8,8,128], index: 5, kind: output, shape index: {}]  }
   0x1   :  { %v30_v0 = vld [vmem:[%s796_s3] sm:$0xff]  ;;  %v31_v1 = vld [vmem:[%s796_s3 + $0x8] sm:$0xff]  ;;  %461 = vmatprep.subr.bf16.mxu0 %v579_v3  ;;  %v32_v6 = vld [vmem:[%s796_s3 + $0x10] sm:$0xff]  ;;  %414 = vmatprep.mubr.msk.f32.mxu0 %vm580_vm0, %v581_v8 }
   0x2   :  { %v123_v2 = vld [vmem:[%s795_s2] sm:$0xff]  ;;  %v462_v4 = vpack.c.bf16 %v31_v1, %v30_v0  ;;  %v124_v5 = vld [vmem:[%s795_s2 + $0x8] sm:$0xff]  ;;  %v33_v7 = vld [vmem:[%s796_s3 + $0x18] sm:$0xff] }
   0x3   :  { %v485_v9 = vpack.c.bf16 %v124_v5, %v123_v2  ;;  %v125_v10 = vld [vmem:[%s795_s2 + $0x10] sm:$0xff]  ;;  %v126_v11 = vld [vmem:[%s795_s2 + $0x18] sm:$0xff]  ;;  %v465_v12 = vpack.c.bf16 %v33_v7, %v32_v6  ;;  %v127_v14 = vld [vmem:[%s795_s2 + $0x20] sm:$0xff] }
   0x4   :  { %463 = vmatpush3.bf16.msra.mxu0 %v462_v4  ;;  %v489_v13 = vpack.c.bf16 %v126_v11, %v125_v10  ;;  %v128_v15 = vld [vmem:[%s795_s2 + $0x28] sm:$0xff]  ;;  %v34_v16 = vld [vmem:[%s796_s3 + $0x20] sm:$0xff]  ;;  %v129_v20 = vld [vmem:[%s795_s2 + $0x30] sm:$0xff] }
   0x5   :  { %486 = vmatprep.subr.bf16.mxu1 %v485_v9  ;;  %464 = vmatprep.subr.bf16.mxu0 %v579_v3  ;;  %v35_v17 = vld [vmem:[%s796_s3 + $0x28] sm:$0xff]  ;;  %v493_v18 = vpack.c.bf16 %v128_v15, %v127_v14  ;;  %v130_v21 = vld [vmem:[%s795_s2 + $0x38] sm:$0xff]  ;;  %v36_v22 = vld [vmem:[%s796_s3 + $0x30] sm:$0xff] }
   0x6   :  { %488 = vmatpush3.bf16.msra.mxu1 %v485_v9  ;;  %v468_v19 = vpack.c.bf16 %v35_v17, %v34_v16  ;;  %v37_v23 = vld [vmem:[%s796_s3 + $0x38] sm:$0xff]  ;;  %v497_v24 = vpack.c.bf16 %v130_v21, %v129_v20  ;;  %v131_v26 = vld [vmem:[%s795_s2 + $0x40] sm:$0xff]  ;;  %v132_v27 = vld [vmem:[%s795_s2 + $0x48] sm:$0xff] }
   0x7   :  { %490 = vmatprep.subr.bf16.mxu1 %v489_v13  ;;  %v471_v25 = vpack.c.bf16 %v37_v23, %v36_v22  ;;  %v675_v28 = vld [vmem:[%s793_s0] sm:$0xff]  ;;  %v39_v30 = vld [vmem:[%s796_s3 + $0x48] sm:$0xff]  ;;  %v501_v31 = vpack.c.bf16 %v132_v27, %v131_v26 }
   0x8   :  { %466 = vmatpush3.bf16.msra.mxu0 %v465_v12  ;;  %v38_v29 = vld [vmem:[%s796_s3 + $0x40] sm:$0xff]  ;;  %449 = vmatprep.mubr.f32.mxu1 %v675_v28 }
   0x9   :  { %467 = vmatprep.subr.bf16.mxu0 %v579_v3 }
   0xa   :  { %492 = vmatpush3.bf16.msra.mxu1 %v489_v13 }
   0xb   :  { %494 = vmatprep.subr.bf16.mxu1 %v493_v18 }
   0xc   :  { %469 = vmatpush3.bf16.msra.mxu0 %v468_v19 }
   0xd   :  { %470 = vmatprep.subr.bf16.mxu0 %v579_v3 }
   0xe   :  { %496 = vmatpush3.bf16.msra.mxu1 %v493_v18 }
   0xf   :  { %498 = vmatprep.subr.bf16.mxu1 %v497_v24 }
  0x10   :  { %10 = vsyncpa [#allocation3], 0  ;;  %472 = vmatpush3.bf16.msra.mxu0 %v471_v25  ;;  %v474_v32 = vpack.c.bf16 %v39_v30, %v38_v29  ;;  %v133_v33 = vld [vmem:[%s795_s2 + $0x50] sm:$0xff]  ;;  %v134_v34 = vld [vmem:[%s795_s2 + $0x58] sm:$0xff] }
  0x11   :  { %473 = vmatprep.subr.bf16.mxu0 %v579_v3  ;;  %v40_v35 = vld [vmem:[%s796_s3 + $0x50] sm:$0xff]  ;;  %v41_v36 = vld [vmem:[%s796_s3 + $0x58] sm:$0xff]  ;;  %v505_v37 = vpack.c.bf16 %v134_v34, %v133_v33  ;;  %v135_v39 = vld [vmem:[%s795_s2 + $0x60] sm:$0xff] }
  0x12   :  { %500 = vmatpush3.bf16.msra.mxu1 %v497_v24  ;;  %v477_v38 = vpack.c.bf16 %v41_v36, %v40_v35  ;;  %v136_v40 = vld [vmem:[%s795_s2 + $0x68] sm:$0xff]  ;;  %v42_v41 = vld [vmem:[%s796_s3 + $0x60] sm:$0xff]  ;;  %v137_v45 = vld [vmem:[%s795_s2 + $0x70] sm:$0xff] }
  0x13   :  { %502 = vmatprep.subr.bf16.mxu1 %v501_v31  ;;  %v43_v42 = vld [vmem:[%s796_s3 + $0x68] sm:$0xff]  ;;  %v509_v43 = vpack.c.bf16 %v136_v40, %v135_v39  ;;  %v138_v46 = vld [vmem:[%s795_s2 + $0x78] sm:$0xff]  ;;  %v44_v47 = vld [vmem:[%s796_s3 + $0x70] sm:$0xff] }
  0x14   :  { %475 = vmatpush3.bf16.msra.mxu0 %v474_v32  ;;  %v480_v44 = vpack.c.bf16 %v43_v42, %v42_v41  ;;  %v45_v48 = vld [vmem:[%s796_s3 + $0x78] sm:$0xff]  ;;  %v513_v49 = vpack.c.bf16 %v138_v46, %v137_v45  ;;  %v29_v51 = vld [vmem:[%s794_s1] sm:$0xff]  ;;  %v731_v52 = vld [vmem:[%s793_s0 + $0x8] sm:$0xff] }
  0x15   :  { %476 = vmatprep.subr.bf16.mxu0 %v579_v3  ;;  %v483_v50 = vpack.c.bf16 %v45_v48, %v44_v47  ;;  %v736_v53 = vld [vmem:[%s793_s0 + $0x10] sm:$0xff]  ;;  %v743_v54 = vld [vmem:[%s793_s0 + $0x18] sm:$0xff]  ;;  %v748_v55 = vld [vmem:[%s793_s0 + $0x20] sm:$0xff] }
  0x16   :  { %504 = vmatpush3.bf16.msra.mxu1 %v501_v31  ;;  %v755_v56 = vld [vmem:[%s793_s0 + $0x28] sm:$0xff]  ;;  %v760_v57 = vld [vmem:[%s793_s0 + $0x30] sm:$0xff]  ;;  %v767_v58 = vld [vmem:[%s793_s0 + $0x38] sm:$0xff]  ;;  %s582_s0 = smov [#allocation2]  }
  0x17   :  { %506 = vmatprep.subr.bf16.mxu1 %v505_v37  ;;  %v332_v59 = vld [vmem:[%s797_s4] ss:$0 sm:$0xff]  ;;  %s321_s4 = sshll.u32 %s582_s0, 4  ;;  %s322_s4 = int_to_ptr.vmem [resolvable:$true] %s321_s4 }
  0x18   :  { %478 = vmatpush3.bf16.msra.mxu0 %v477_v38  ;;  %s555_s24 = scalar_lea.vmem %s322_s4, 1024  ;;  %p560_p1 = scmp.lt.s32.totalorder %s322_s4, %s322_s4 }
  0x19   :  { %479 = vmatprep.subr.bf16.mxu0 %v579_v3  ;;  %p556_p0 = scmp.ne.s32.totalorder %s322_s4, %s555_s24  ;;  %p561_p2 = scmp.lt.s32.totalorder %s555_s24, %s555_s24 }
  0x1a   :  { %508 = vmatpush3.bf16.msra.mxu1 %v505_v37 }
  0x1b   :  { %510 = vmatprep.subr.bf16.mxu1 %v509_v43  ;;  %p562_p3 = por %p561_p2, %p560_p1 }
  0x1c   :  { %481 = vmatpush3.bf16.msra.mxu0 %v480_v44 }
  0x1d   :  { %482 = vmatprep.subr.bf16.mxu0 %v579_v3  ;;  %p563_p4 = pnand %p562_p3, %p556_p0 }
  0x1e   :  { %512 = vmatpush3.bf16.msra.mxu1 %v509_v43 }
  0x1f   :  { %514 = vmatprep.subr.bf16.mxu1 %v513_v49 }
  0x20   :  { %484 = vmatpush3.bf16.msra.mxu0 %v483_v50 }
  0x22   :  { %516 = vmatpush3.bf16.msra.mxu1 %v513_v49 }
  0x23   :  { %415 = vmatmul.mubr.f32.vlgmr.msra.gmra.mrb[0].mxu0 %v29_v51 }
  0x25   :  { %450 = vmatmul.mubr.f32.vlgmr.msra.gmra.mrb[0].mxu1 %v731_v52 }
  0x26   :  { %452 = vmatprep.mubr.f32.mxu1 %v736_v53 }
  0x29   :  { %453 = vmatmul.mubr.f32.gmra.mrb[2].mxu1 %v743_v54 }
  0x2a   :  { %455 = vmatprep.mubr.f32.mxu1 %v748_v55 }
  0x2d   :  { %456 = vmatmul.mubr.f32.gmra.mrb[4].mxu1 %v755_v56 }
  0x2e   :  { %458 = vmatprep.mubr.f32.mxu1 %v760_v57 }
  0x31   :  { %459 = vmatmul.mubr.f32.gmra.mrb[6].mxu1 %v767_v58 }
  0xf6   :  { %v119_v60 = vpop.f32.mrb[0].mxu0 }
  0xf7   :  { %v120_v61 = vadd.f32 %v332_v59, %v119_v60  ;;  %v416_v62 = vpop.f32.mrb[1].mxu0 }
  0xf8   :  { %v451_v63 = vpop.f32.mrb[0].mxu1 }
  0xf9   :  { %v245_v0 = vadd.f32 %v451_v63, %v120_v61  ;;  %v205_v1 = vpop.f32.mrb[1].mxu1 }
  0xfa   :  { %v244_v2 = vadd.f32 %v205_v1, %v120_v61 }
  0xfb   :  { %v334_v3 = vmul.f32 -1.442695, %v245_v0 }
  0xfc   :  { %v333_v4 = vmul.f32 -1.442695, %v244_v2  ;;  %v454_v5 = vpop.f32.mrb[2].mxu1 }
  0xfd   :  { %523 = vpow2.f32 %v334_v3  ;;  %v247_v6 = vadd.f32 %v454_v5, %v120_v61  ;;  %v215_v7 = vpop.f32.mrb[3].mxu1 }
  0xfe   :  { %525 = vpow2.f32 %v333_v4  ;;  %v246_v8 = vadd.f32 %v215_v7, %v120_v61 }
  0xff   :  { %v336_v9 = vmul.f32 -1.442695, %v247_v6 }
 0x100   :  { %v335_v10 = vmul.f32 -1.442695, %v246_v8  ;;  %v457_v11 = vpop.f32.mrb[4].mxu1 }
 0x101   :  { %527 = vpow2.f32 %v336_v9  ;;  %v249_v12 = vadd.f32 %v457_v11, %v120_v61  ;;  %v225_v13 = vpop.f32.mrb[5].mxu1 }
 0x102   :  { %529 = vpow2.f32 %v335_v10  ;;  %v248_v14 = vadd.f32 %v225_v13, %v120_v61 }
 0x103   :  { %v338_v15 = vmul.f32 -1.442695, %v249_v12 }
 0x104   :  { %v337_v16 = vmul.f32 -1.442695, %v248_v14  ;;  %v460_v17 = vpop.f32.mrb[6].mxu1 }
 0x105   :  { %531 = vpow2.f32 %v338_v15  ;;  %v251_v18 = vadd.f32 %v460_v17, %v120_v61  ;;  %v235_v19 = vpop.f32.mrb[7].mxu1 }
 0x106   :  { %533 = vpow2.f32 %v337_v16  ;;  %v250_v20 = vadd.f32 %v235_v19, %v120_v61 }
 0x107   :  { %v524_v21 = vpop.eup %523  ;;  %v340_v22 = vmul.f32 -1.442695, %v251_v18 }
 0x108   :  { %v526_v23 = vpop.eup %525  ;;  %v277_v24 = vadd.f32 1.0, %v524_v21  ;;  %v339_v25 = vmul.f32 -1.442695, %v250_v20 }
 0x109   :  { %v276_v26 = vadd.f32 1.0, %v526_v23  ;;  %535 = vpow2.f32 %v340_v22 }
 0x10a   :  { %537 = vrcp.f32 %v277_v24 }
 0x10b   :  { %v528_v27 = vpop.eup %527  ;;  %539 = vrcp.f32 %v276_v26 }
 0x10c   :  { %v530_v29 = vpop.eup %529  ;;  %v279_v30 = vadd.f32 1.0, %v528_v27  ;;  %541 = vpow2.f32 %v339_v25 }
 0x10d   :  { %v278_v31 = vadd.f32 1.0, %v530_v29 }
 0x10e   :  { %543 = vrcp.f32 %v279_v30 }
 0x10f   :  { %v532_v32 = vpop.eup %531  ;;  %545 = vrcp.f32 %v278_v31 }
 0x110   :  { %v534_v33 = vpop.eup %533  ;;  %v281_v34 = vadd.f32 1.0, %v532_v32 }
 0x111   :  { %v280_v35 = vadd.f32 1.0, %v534_v33 }
 0x112   :  { %547 = vrcp.f32 %v281_v34 }
 0x113   :  { %v536_v36 = vpop.eup %535  ;;  %549 = vrcp.f32 %v280_v35 }
 0x114   :  { %v538_v37 = vpop.eup %537  ;;  %v283_v38 = vadd.f32 1.0, %v536_v36 }
 0x115   :  { %v540_v39 = vpop.eup %539  ;;  %v301_v40 = vmul.f32 %v538_v37, %v731_v52 }
 0x116   :  { %v542_v41 = vpop.eup %541  ;;  %v300_v42 = vmul.f32 %v540_v39, %v675_v28  ;;  %551 = vrcp.f32 %v283_v38 }
 0x117   :  { %309 = vst [vmem:[#allocation2 + $0x8] sm:$0xff] %v301_v40  ;;  %v282_v43 = vadd.f32 1.0, %v542_v41 }
 0x118   :  { %v544_v44 = vpop.eup %543  ;;  %308 = vst [vmem:[#allocation2] sm:$0xff] %v300_v42 }
 0x119   :  { %v546_v45 = vpop.eup %545  ;;  %v303_v46 = vmul.f32 %v544_v44, %v743_v54  ;;  %553 = vrcp.f32 %v282_v43 }
 0x11a   :  { %v302_v47 = vmul.f32 %v546_v45, %v736_v53 }
 0x11b   :  { %311 = vst [vmem:[#allocation2 + $0x18] sm:$0xff] %v303_v46 }
 0x11c   :  { %v548_v48 = vpop.eup %547  ;;  %310 = vst [vmem:[#allocation2 + $0x10] sm:$0xff] %v302_v47 }
 0x11d   :  { %v550_v49 = vpop.eup %549  ;;  %v305_v50 = vmul.f32 %v548_v48, %v755_v56 }
 0x11e   :  { %v304_v51 = vmul.f32 %v550_v49, %v748_v55 }
 0x11f   :  { %313 = vst [vmem:[#allocation2 + $0x28] sm:$0xff] %v305_v50 }
 0x120   :  { %v552_v28 = vpop.eup %551  ;;  %312 = vst [vmem:[#allocation2 + $0x20] sm:$0xff] %v304_v51 }
 0x121   :  { %v307_v52 = vmul.f32 %v552_v28, %v767_v58 }
 0x123   :  { %v554_v59 = vpop.eup %553  ;;  %315 = vst [vmem:[#allocation2 + $0x38] sm:$0xff] %v307_v52 }
 0x124   :  { %v306_v53 = vmul.f32 %v554_v59, %v760_v57 }
 0x126   :  { %314 = vst [vmem:[#allocation2 + $0x30] sm:$0xff] %v306_v53 }
 0x127   :  { %566 = shalt.err (!%p563_p4)
}
 0x128   :  { %s567_s27 = scalar_lea.hbm %s798_s5, 1024 }
 0x129   :  { %p568_p5 = scmp.ne.s32.totalorder %s798_s5, %s567_s27  ;;  %p571_p6 = scmp.lt.u32.totalorder %s567_s27, %s798_s5 }
 0x12b   :  { %p573_p7 = pnand %p571_p6, %p568_p5 }
 0x12d   :  { %576 = shalt.err (!%p573_p7)
}
 0x12e   :  { %s583_s7 = smov 128   ;;  %s584_s8 = smov 8  }
 0x12f   :  { %327 = dma.vmem_to_hbm [thread:$0]  %s322_s4, 1024, %s798_s5, [#allocation3], %s583_s7, %s583_s7, %s584_s8  }
 0x130   :  { %577 = dma.done.wait [#allocation3], 1024  }
 0x131   :  { %578 = vsyncadd [#allocation3], 4294966272 }
 0x132   :  { %331 = vsyncpa [#allocation3], 1 }

// kernel: encoder_forward.3
= control target key start
LH: loop header
LB: loop body
LE: loop exit
PB: predicated region body
PF: predicated region fallthrough
CT: control target
= control target key end

     0   :  { %s602_s12 = smov 0   ;;  %s730_s0 = inlined_call_operand.vmem [shape: f32[64,64], index: 0, kind: input, shape index: {}]   ;;  %s731_s1 = inlined_call_operand.vmem [shape: f32[64,384], index: 1, kind: input, shape index: {}]   ;;  %s732_s2 = inlined_call_operand.vmem [shape: f32[1,384], index: 2, kind: input, shape index: {}]   ;;  %s733_s3 = inlined_call_operand.vmem [shape: f32[64,384], index: 3, kind: output, shape index: {}]  }
   0x1 LB: > { %s478_s13 = sadd.s32 4294967295, %s579_s12   ;;  %p482_p0 = scmp.ge.s32.totalorder %s579_s12, 1  ;;  %s579_s12 = sphi %s602_s12, %s13_s12  }
   0x2   : > { %p138_p1 = scmp.lt.s32.totalorder %s579_s12, 3 }
   0x4   : > { %p139_p2 = pnand %p482_p0, %p138_p1 }
   0x5   : > { %v181_v0 = vld [vmem:[%s731_s1 + $0x8] sm:$0xff] (!%p139_p2)  ;;  %v184_v1 = vld [vmem:[%s731_s1 + $0x20] sm:$0xff] (!%p139_p2)  ;;  %s483_s20 = sshll.u32 (!%p139_p2), %s478_s13, 2  ;;  %v183_v4 = vld [vmem:[%s731_s1 + $0x18] sm:$0xff] (!%p139_p2)  ;;  %v581_v7 = vmov (!%p139_p2), 0.0   ;;  %vm221_vm0 = vcmask (!%p139_p2), 523264   ;;  %v206_v41 = vlaneseq (!%p139_p2) }
   0x6   : > { %142 = sbr.rel (%p139_p2) target bundleno = 252 (0xfc), region = 32  ;;  %v180_v2 = vld [vmem:[%s731_s1] sm:$0xff] (!%p139_p2)  ;;  %v531_v3 = vpack.c.bf16 (!%p139_p2), %v184_v1, %v181_v0  ;;  %v187_v5 = vld [vmem:[%s731_s1 + $0x38] sm:$0xff] (!%p139_p2)  ;;  %v190_v6 = vld [vmem:[%s731_s1 + $0x50] sm:$0xff] (!%p139_p2)  ;;  %298 = vmatprep.mubr.f32.mxu0 (!%p139_p2), %v581_v7  ;;  %p164_p3 = scmp.lt.s32.totalorder (!%p139_p2), %s483_s20, 7 }
   0x7   : > { %v533_v8 = vpack.c.bf16 (!%p139_p2), %v183_v4, %v180_v2  ;;  %v535_v9 = vpack.c.bf16 (!%p139_p2), %v190_v6, %v187_v5  ;;  %v186_v10 = vld [vmem:[%s731_s1 + $0x30] sm:$0xff] (!%p139_p2)  ;;  %v189_v11 = vld [vmem:[%s731_s1 + $0x48] sm:$0xff] (!%p139_p2)  ;;  %v196_v15 = vld [vmem:[%s731_s1 + $0x80] sm:$0xff] (!%p139_p2)  ;;  %v207_v42 = vshrl.u32 (!%p139_p2), %v206_v41, 7 }
   0x8   : > { %v182_v12 = vld [vmem:[%s731_s1 + $0x10] sm:$0xff] (!%p139_p2)  ;;  %532 = vmatprep.subr.bf16.mxu0 (!%p139_p2), %v531_v3  ;;  %v185_v13 = vld [vmem:[%s731_s1 + $0x28] sm:$0xff] (!%p139_p2)  ;;  %v537_v16 = vpack.c.bf16 (!%p139_p2), %v189_v11, %v186_v10  ;;  %v188_v18 = vld [vmem:[%s731_s1 + $0x40] sm:$0xff] (!%p139_p2) }
   0x9   : > { %v193_v14 = vld [vmem:[%s731_s1 + $0x68] sm:$0xff] (!%p139_p2)  ;;  %534 = vmatpush1.bf16.msra.mxu0 (!%p139_p2), %v533_v8  ;;  %v547_v17 = vpack.c.bf16 (!%p139_p2), %v185_v13, %v182_v12  ;;  %v192_v20 = vld [vmem:[%s731_s1 + $0x60] sm:$0xff] (!%p139_p2)  ;;  %v195_v21 = vld [vmem:[%s731_s1 + $0x78] sm:$0xff] (!%p139_p2)  ;;  %v208_v43 = vsub.s32 (!%p139_p2), 0, %v207_v42  ;;  %v212_v45 = vsub.s32 (!%p139_p2), 1, %v207_v42  ;;  %v216_v46 = vsub.s32 (!%p139_p2), 2, %v207_v42 }
   0xa   : > { %536 = vmatprep.subr.bf16.mxu0 (!%p139_p2), %v535_v9  ;;  %v539_v19 = vpack.c.bf16 (!%p139_p2), %v196_v15, %v193_v14  ;;  %v191_v22 = vld [vmem:[%s731_s1 + $0x58] sm:$0xff] (!%p139_p2)  ;;  %v202_v25 = vld [vmem:[%s731_s1 + $0xb0] sm:$0xff] (!%p139_p2)  ;;  %v197_v27 = vld [vmem:[%s731_s1 + $0x88] sm:$0xff] (!%p139_p2)  ;;  %v541_v28 = vpack.c.bf16 (!%p139_p2), %v195_v21, %v192_v20 }
   0xb   : > { %548 = vmatprep.subr.bf16.mxu1 (!%p139_p2), %v547_v17  ;;  %v551_v23 = vpack.c.bf16 (!%p139_p2), %v191_v22, %v188_v18  ;;  %v199_v24 = vld [vmem:[%s731_s1 + $0x98] sm:$0xff] (!%p139_p2)  ;;  %v194_v26 = vld [vmem:[%s731_s1 + $0x70] sm:$0xff] (!%p139_p2)  ;;  %v201_v33 = vld [vmem:[%s731_s1 + $0xa8] sm:$0xff] (!%p139_p2) }
   0xc   : > { %550 = vmatpush3.bf16.msra.mxu1 (!%p139_p2), %v547_v17  ;;  %v198_v29 = vld [vmem:[%s731_s1 + $0x90] sm:$0xff] (!%p139_p2)  ;;  %v555_v30 = vpack.c.bf16 (!%p139_p2), %v197_v27, %v194_v26  ;;  %v543_v32 = vpack.c.bf16 (!%p139_p2), %v202_v25, %v199_v24  ;;  %v200_v34 = vld [vmem:[%s731_s1 + $0xa0] sm:$0xff] (!%p139_p2)  ;;  %v203_v35 = vld [vmem:[%s731_s1 + $0xb8] sm:$0xff] (!%p139_p2) }
   0xd   : > { %s735_s20 = smov (!%p164_p3, %s483_s20), 7  ;;  %538 = vmatpush1.bf16.msra.mxu0 %v537_v16  ;;  %552 = vmatprep.subr.bf16.mxu1 %v551_v23  ;;  %v545_v36 = vpack.c.bf16 %v201_v33, %v198_v29  ;;  %v559_v37 = vpack.c.bf16 %v203_v35, %v200_v34  ;;  %v204_v44 = vld [vmem:[%s732_s2] sm:$0x7] }
   0xe   : > { %s484_s22 = sshll.u32 %s735_s20, 3  ;;  %540 = vmatprep.subr.bf16.mxu0 %v539_v19  ;;  %s563_s18 = smul.u32 24, %s735_s20  ;;  %v209_v47 = vrot.slane %v204_v44, %v208_v43  ;;  %v213_v48 = vrot.slane %v204_v44, %v212_v45  ;;  %v217_v50 = vrot.slane %v204_v44, %v216_v46 }
   0xf   : > { %s674_s4 = scalar_lea.vmem %s730_s0, %s484_s22 }
  0x10   : > { %v176_v31 = vld [vmem:[%s674_s4] sm:$0xff]  ;;  %554 = vmatpush3.bf16.msra.mxu1 %v551_v23  ;;  %v177_v38 = vld [vmem:[%s674_s4 + $0x8] sm:$0xff]  ;;  %v178_v39 = vld [vmem:[%s674_s4 + $0x10] sm:$0xff]  ;;  %s713_s22 = scalar_lea.vmem %s733_s3, %s563_s18 }
  0x11   : > { %525 = vmatprep.mubr.msk.f32.mxu1 %vm221_vm0, %v176_v31  ;;  %542 = vmatpush1.bf16.msra.mxu0 %v541_v28  ;;  %v179_v40 = vld [vmem:[%s674_s4 + $0x18] sm:$0xff] }
  0x12   : > { %556 = vmatprep.subr.bf16.mxu1 %v555_v30  ;;  %544 = vmatprep.subr.bf16.mxu0 %v543_v32 }
  0x14   : > { %558 = vmatpush3.bf16.msra.mxu1 %v555_v30 }
  0x15   : > { %546 = vmatpush1.bf16.msra.mxu0 %v545_v36  ;;  %560 = vmatprep.subr.bf16.mxu1 %v559_v37 }
  0x18   : > { %487 = vmatmul.mubr.msk.f32.vlgmr.msra.gmra.mrb[0].mxu0 %vm221_vm0, %v176_v31  ;;  %562 = vmatpush3.bf16.msra.mxu1 %v559_v37 }
  0x19   : > { %304 = vmatprep.mubr.f32.mxu0 %v581_v7 }
  0x1b   : > { %526 = vmatmul.mubr.msk.f32.vlgmr.msra.gmra.mrb[0].mxu1 %vm221_vm0, %v177_v38 }
  0x1c   : > { %488 = vmatmul.mubr.msk.f32.gmra.mrb[2].mxu0 %vm221_vm0, %v177_v38  ;;  %528 = vmatprep.mubr.msk.f32.mxu1 %vm221_vm0, %v178_v39 }
  0x1d   : > { %310 = vmatprep.mubr.f32.mxu0 %v581_v7 }
  0x1f   : > { %529 = vmatmul.mubr.msk.f32.gmra.mrb[2].mxu1 %vm221_vm0, %v179_v40 }
  0x20   : > { %489 = vmatmul.mubr.msk.f32.gmra.mrb[4].mxu0 %vm221_vm0, %v178_v39 }
  0x21   : > { %316 = vmatprep.mubr.f32.mxu0 %v581_v7 }
  0x24   : > { %490 = vmatmul.mubr.msk.f32.gmra.mrb[6].mxu0 %vm221_vm0, %v179_v40 }
  0xeb   : > { %v300_v49 = vpop.f32.mrb[0].mxu0 }
  0xec   : > { %v301_v51 = vadd.f32 %v300_v49, %v209_v47  ;;  %v302_v52 = vpop.f32.mrb[1].mxu0 }
  0xed   : > { %v303_v53 = vadd.f32 %v302_v52, %v213_v48 }
  0xee   : > { %408 = vst [vmem:[%s713_s22] sm:$0xff] %v301_v51  ;;  %v527_v54 = vpop.f32.mrb[0].mxu1 }
  0xef   : > { %409 = vst [vmem:[%s713_s22 + $0x8] sm:$0xff] %v303_v53  ;;  %v306_v55 = vpop.f32.mrb[2].mxu0  ;;  %v395_v56 = vadd.f32 %v527_v54, %v217_v50  ;;  %v389_v57 = vpop.f32.mrb[1].mxu1 }
  0xf0   : > { %v307_v58 = vadd.f32 %v306_v55, %v209_v47  ;;  %v308_v59 = vpop.f32.mrb[3].mxu0  ;;  %v390_v60 = vadd.f32 %v389_v57, %v217_v50 }
  0xf1   : > { %v309_v61 = vadd.f32 %v308_v59, %v213_v48  ;;  %413 = vst [vmem:[%s713_s22 + $0x28] sm:$0xff] %v395_v56 }
  0xf2   : > { %411 = vst [vmem:[%s713_s22 + $0x18] sm:$0xff] %v307_v58  ;;  %410 = vst [vmem:[%s713_s22 + $0x10] sm:$0xff] %v390_v60  ;;  %v530_v62 = vpop.f32.mrb[2].mxu1 }
  0xf3   : > { %412 = vst [vmem:[%s713_s22 + $0x20] sm:$0xff] %v309_v61  ;;  %v312_v63 = vpop.f32.mrb[4].mxu0  ;;  %v405_v0 = vadd.f32 %v530_v62, %v217_v50  ;;  %v399_v1 = vpop.f32.mrb[3].mxu1 }
  0xf4   : > { %v313_v2 = vadd.f32 %v312_v63, %v209_v47  ;;  %v314_v3 = vpop.f32.mrb[5].mxu0  ;;  %v400_v4 = vadd.f32 %v399_v1, %v217_v50 }
  0xf5   : > { %v315_v5 = vadd.f32 %v314_v3, %v213_v48  ;;  %419 = vst [vmem:[%s713_s22 + $0x58] sm:$0xff] %v405_v0 }
  0xf6   : > { %414 = vst [vmem:[%s713_s22 + $0x30] sm:$0xff] %v313_v2  ;;  %416 = vst [vmem:[%s713_s22 + $0x40] sm:$0xff] %v400_v4 }
  0xf7   : > { %415 = vst [vmem:[%s713_s22 + $0x38] sm:$0xff] %v315_v5  ;;  %v318_v6 = vpop.f32.mrb[6].mxu0 }
  0xf8   : > { %v319_v7 = vadd.f32 %v318_v6, %v209_v47  ;;  %v320_v8 = vpop.f32.mrb[7].mxu0 }
  0xf9   : > { %v321_v9 = vadd.f32 %v320_v8, %v213_v48 }
  0xfa   : > { %417 = vst [vmem:[%s713_s22 + $0x48] sm:$0xff] %v319_v7 }
  0xfb   : > { %418 = vst [vmem:[%s713_s22 + $0x50] sm:$0xff] %v321_v9 }
  0xfc PF: > { %s13_s12 = sadd.s32 1, %s579_s12  }
  0xfd   : > { %p10_p4 = scmp.ge.s32.totalorder %s13_s12, 4  }
  0xff   :  { %12 = sbr.rel (!%p10_p4) target bundleno = 1 (0x1), region = 62 }

// kernel: encoder_forward.4
= control target key start
LH: loop header
LB: loop body
LE: loop exit
PB: predicated region body
PF: predicated region fallthrough
CT: control target
= control target key end

     0   :  { %v2788_v3 = vmov 0.0|0.0   ;;  %v2789_v4 = vmov 0.0   ;;  %vm2790_vm0 = vmmov 0   ;;  %s2791_s15 = smov 64   ;;  %vm274_vm1 = vcmask 523264   ;;  %s3540_s1 = inlined_call_operand.vmem [shape: f32[128,384], index: 1, kind: input, shape index: {}]   ;;  %s3541_s2 = inlined_call_operand.vmem [shape: f32[1,384], index: 2, kind: input, shape index: {}]   ;;  %s3542_s0 = inlined_call_operand.vmem [shape: f32[8,8,384], index: 0, kind: input, shape index: {}]   ;;  %s3543_s3 = inlined_call_operand.vmem [shape: f32[8,8,128], index: 3, kind: output, shape index: {0}]   ;;  %s3544_s4 = inlined_call_operand.vmem [shape: f32[8,128], index: 4, kind: output, shape index: {1}]  }
   0x1   :  { %v17_v0 = vld [vmem:[%s3540_s1 + $0x8] sm:$0xff]  ;;  %v20_v1 = vld [vmem:[%s3540_s1 + $0x20] sm:$0xff]  ;;  %2240 = vmatprep.subr.bf16.mxu1 %v2788_v3  ;;  %145 = vmatprep.mubr.f32.mxu0 %v2789_v4  ;;  %v19_v6 = vld [vmem:[%s3540_s1 + $0x18] sm:$0xff]  ;;  %vm281_vm2 = vcmask 1048064  }
   0x2   :  { %v16_v2 = vld [vmem:[%s3540_s1] sm:$0xff]  ;;  %v2828_v5 = vpack.c.bf16 %v20_v1, %v17_v0  ;;  %v23_v7 = vld [vmem:[%s3540_s1 + $0x38] sm:$0xff]  ;;  %v26_v8 = vld [vmem:[%s3540_s1 + $0x50] sm:$0xff]  ;;  %1960 = vmatprep.mubr.msk.f32.mxu1 %vm2790_vm0, %v2789_v4 }
   0x3   :  { %v2841_v9 = vpack.c.bf16 %v19_v6, %v16_v2  ;;  %v2843_v10 = vpack.c.bf16 %v26_v8, %v23_v7  ;;  %v22_v11 = vld [vmem:[%s3540_s1 + $0x30] sm:$0xff]  ;;  %v25_v12 = vld [vmem:[%s3540_s1 + $0x48] sm:$0xff]  ;;  %v32_v14 = vld [vmem:[%s3540_s1 + $0x80] sm:$0xff] }
   0x4   :  { %v29_v13 = vld [vmem:[%s3540_s1 + $0x68] sm:$0xff]  ;;  %2209 = vmatprep.subr.bf16.mxu0 %v2828_v5  ;;  %v2859_v15 = vpack.c.bf16 %v25_v12, %v22_v11  ;;  %v28_v17 = vld [vmem:[%s3540_s1 + $0x60] sm:$0xff]  ;;  %v31_v18 = vld [vmem:[%s3540_s1 + $0x78] sm:$0xff] }
   0x5   :  { %2211 = vmatpush1.bf16.msra.mxu0 %v2841_v9  ;;  %v2862_v16 = vpack.c.bf16 %v32_v14, %v29_v13  ;;  %v35_v19 = vld [vmem:[%s3540_s1 + $0x98] sm:$0xff]  ;;  %v38_v20 = vld [vmem:[%s3540_s1 + $0xb0] sm:$0xff]  ;;  %v2877_v21 = vpack.c.bf16 %v31_v18, %v28_v17  ;;  %v37_v24 = vld [vmem:[%s3540_s1 + $0xa8] sm:$0xff]  ;;  %v66_v17 = vlaneseq }
   0x6   :  { %2213 = vmatprep.subr.bf16.mxu0 %v2843_v10  ;;  %v2880_v22 = vpack.c.bf16 %v38_v20, %v35_v19  ;;  %v34_v23 = vld [vmem:[%s3540_s1 + $0x90] sm:$0xff]  ;;  %v41_v25 = vld [vmem:[%s3540_s1 + $0xc8] sm:$0xff]  ;;  %v44_v26 = vld [vmem:[%s3540_s1 + $0xe0] sm:$0xff] }
   0x7   :  { %v18_v27 = vld [vmem:[%s3540_s1 + $0x10] sm:$0xff]  ;;  %v21_v28 = vld [vmem:[%s3540_s1 + $0x28] sm:$0xff]  ;;  %v24_v29 = vld [vmem:[%s3540_s1 + $0x40] sm:$0xff]  ;;  %v2907_v31 = vpack.c.bf16 %v37_v24, %v34_v23  ;;  %v2912_v33 = vpack.c.bf16 %v44_v26, %v41_v25  ;;  %v67_v18 = vshrl.u32 %v66_v17, 7 }
   0x8   :  { %v27_v30 = vld [vmem:[%s3540_s1 + $0x58] sm:$0xff]  ;;  %v2909_v32 = vpack.c.bf16 %v21_v28, %v18_v27  ;;  %v40_v34 = vld [vmem:[%s3540_s1 + $0xc0] sm:$0xff]  ;;  %v50_v37 = vld [vmem:[%s3540_s1 + $0x110] sm:$0xff] }
   0x9   :  { %2215 = vmatpush1.bf16.msra.mxu0 %v2859_v15  ;;  %v43_v35 = vld [vmem:[%s3540_s1 + $0xd8] sm:$0xff]  ;;  %v2927_v38 = vpack.c.bf16 %v27_v30, %v24_v29  ;;  %v30_v39 = vld [vmem:[%s3540_s1 + $0x70] sm:$0xff]  ;;  %v33_v40 = vld [vmem:[%s3540_s1 + $0x88] sm:$0xff]  ;;  %v68_v19 = vsub.s32 0, %v67_v18  ;;  %v72_v23 = vsub.s32 1, %v67_v18 }
   0xa   :  { %2217 = vmatprep.subr.bf16.mxu0 %v2862_v16  ;;  %v47_v36 = vld [vmem:[%s3540_s1 + $0xf8] sm:$0xff]  ;;  %2242 = vmatpush3.bf16.msra.mxu1 %v2909_v32  ;;  %v2937_v41 = vpack.c.bf16 %v43_v35, %v40_v34  ;;  %v46_v43 = vld [vmem:[%s3540_s1 + $0xf0] sm:$0xff]  ;;  %v49_v44 = vld [vmem:[%s3540_s1 + $0x108] sm:$0xff]  ;;  %v2955_v47 = vpack.c.bf16 %v33_v40, %v30_v39 }
   0xb   :  { %2243 = vmatprep.subr.bf16.mxu1 %v2788_v3  ;;  %v2940_v42 = vpack.c.bf16 %v50_v37, %v47_v36  ;;  %v53_v45 = vld [vmem:[%s3540_s1 + $0x128] sm:$0xff]  ;;  %v56_v46 = vld [vmem:[%s3540_s1 + $0x140] sm:$0xff]  ;;  %v39_v49 = vld [vmem:[%s3540_s1 + $0xb8] sm:$0xff]  ;;  %v2965_v50 = vpack.c.bf16 %v49_v44, %v46_v43  ;;  %v76_v36 = vsub.s32 2, %v67_v18 }
   0xc   :  { %v36_v48 = vld [vmem:[%s3540_s1 + $0xa0] sm:$0xff]  ;;  %v2968_v51 = vpack.c.bf16 %v56_v46, %v53_v45  ;;  %v55_v53 = vld [vmem:[%s3540_s1 + $0x138] sm:$0xff]  ;;  %v62_v55 = vld [vmem:[%s3540_s1 + $0x170] sm:$0xff] }
   0xd   :  { %2219 = vmatpush1.bf16.msra.mxu0 %v2877_v21  ;;  %v52_v52 = vld [vmem:[%s3540_s1 + $0x120] sm:$0xff]  ;;  %v59_v54 = vld [vmem:[%s3540_s1 + $0x158] sm:$0xff]  ;;  %v2983_v56 = vpack.c.bf16 %v39_v49, %v36_v48  ;;  %v42_v57 = vld [vmem:[%s3540_s1 + $0xd0] sm:$0xff] }
   0xe   :  { %2221 = vmatprep.subr.bf16.mxu0 %v2880_v22  ;;  %2245 = vmatpush3.bf16.msra.mxu1 %v2927_v38  ;;  %v45_v58 = vld [vmem:[%s3540_s1 + $0xe8] sm:$0xff]  ;;  %v2993_v59 = vpack.c.bf16 %v55_v53, %v52_v52  ;;  %v2996_v60 = vpack.c.bf16 %v62_v55, %v59_v54  ;;  %v58_v61 = vld [vmem:[%s3540_s1 + $0x150] sm:$0xff]  ;;  %v48_v0 = vld [vmem:[%s3540_s1 + $0x100] sm:$0xff] }
   0xf   :  { %2246 = vmatprep.subr.bf16.mxu1 %v2788_v3  ;;  %v61_v62 = vld [vmem:[%s3540_s1 + $0x168] sm:$0xff]  ;;  %v3005_v63 = vpack.c.bf16 %v45_v58, %v42_v57  ;;  %v51_v1 = vld [vmem:[%s3540_s1 + $0x118] sm:$0xff]  ;;  %v54_v7 = vld [vmem:[%s3540_s1 + $0x130] sm:$0xff] }
  0x10   :  { %v3015_v2 = vpack.c.bf16 %v61_v62, %v58_v61  ;;  %v3019_v6 = vpack.c.bf16 %v51_v1, %v48_v0  ;;  %v57_v8 = vld [vmem:[%s3540_s1 + $0x148] sm:$0xff]  ;;  %v60_v12 = vld [vmem:[%s3540_s1 + $0x160] sm:$0xff]  ;;  %v63_v13 = vld [vmem:[%s3540_s1 + $0x178] sm:$0xff] }
  0x11   :  { %2223 = vmatpush1.bf16.msra.mxu0 %v2907_v31  ;;  %v3031_v11 = vpack.c.bf16 %v57_v8, %v54_v7  ;;  %v3045_v14 = vpack.c.bf16 %v63_v13, %v60_v12  ;;  %v64_v20 = vld [vmem:[%s3541_s2] sm:$0x7]  ;;  %v1726_v30 = vld [vmem:[%s3542_s0 + $0xb0] sm:$0xff]  ;;  %v1727_v45 = vld [vmem:[%s3542_s0 + $0xb8] sm:$0xff] }
  0x12   :  { %2225 = vmatprep.subr.bf16.mxu0 %v2912_v33  ;;  %2248 = vmatpush3.bf16.msra.mxu1 %v2955_v47  ;;  %v3086_v24 = vrot.slane %v64_v20, %v68_v19  ;;  %v3088_v25 = vrot.slane %v64_v20, %v72_v23  ;;  %v222_v27 = vld [vmem:[%s3542_s0] sm:$0xff]  ;;  %v3098_v43 = vrot.slane %v64_v20, %v76_v36  ;;  %v223_v58 = vld [vmem:[%s3542_s0 + $0x8] sm:$0xff] }
  0x13   :  { %2249 = vmatprep.subr.bf16.mxu1 %v2788_v3 }
  0x15   :  { %2227 = vmatpush1.bf16.msra.mxu0 %v2937_v41 }
  0x16   :  { %2229 = vmatprep.subr.bf16.mxu0 %v2940_v42  ;;  %2251 = vmatpush3.bf16.msra.mxu1 %v2983_v56 }
  0x17   :  { %2252 = vmatprep.subr.bf16.mxu1 %v2788_v3 }
  0x19   :  { %2231 = vmatpush1.bf16.msra.mxu0 %v2965_v50 }
  0x1a   :  { %2233 = vmatprep.subr.bf16.mxu0 %v2968_v51  ;;  %2254 = vmatpush3.bf16.msra.mxu1 %v3005_v63 }
  0x1b   :  { %2255 = vmatprep.subr.bf16.mxu1 %v2788_v3 }
  0x1d   :  { %2235 = vmatpush1.bf16.msra.mxu0 %v2993_v59 }
  0x1e   :  { %2237 = vmatprep.subr.bf16.mxu0 %v2996_v60  ;;  %2257 = vmatpush3.bf16.msra.mxu1 %v3019_v6 }
  0x1f   :  { %2258 = vmatprep.subr.bf16.mxu1 %v2788_v3 }
  0x21   :  { %2239 = vmatpush1.bf16.msra.mxu0 %v3015_v2 }
  0x22   :  { %2265 = vmatprep.subr.bf16.mxu0 %v2828_v5  ;;  %2260 = vmatpush3.bf16.msra.mxu1 %v3031_v11 }
  0x23   :  { %2261 = vmatprep.subr.bf16.mxu1 %v2788_v3 }
  0x24   :  { %146 = vmatmul.mubr.f32.vlgmr.msra.gmra.mrb[0].mxu0 %v2789_v4 }
  0x25   :  { %2267 = vmatpush1.bf16.msra.mxu0 %v2841_v9  ;;  %348 = vmatprep.mubr.f32.mxu0 %v2789_v4 }
  0x26   :  { %2269 = vmatprep.subr.bf16.mxu0 %v2843_v10  ;;  %2263 = vmatpush3.bf16.msra.mxu1 %v3045_v14 }
  0x27   :  { %2296 = vmatprep.subr.bf16.mxu1 %v2788_v3 }
  0x29   :  { %2271 = vmatpush1.bf16.msra.mxu0 %v2859_v15  ;;  %1961 = vmatmul.mubr.f32.vlgmr.msra.gmra.mrb[0].mxu1 %v2789_v4 }
  0x2a   :  { %2273 = vmatprep.subr.bf16.mxu0 %v2862_v16  ;;  %2298 = vmatpush3.bf16.msra.mxu1 %v2909_v32 }
  0x2b   :  { %1995 = vmatprep.mubr.msk.f32.mxu1 %vm2790_vm0, %v2789_v4  ;;  %2299 = vmatprep.subr.bf16.mxu1 %v2788_v3 }
  0x2d   :  { %2275 = vmatpush1.bf16.msra.mxu0 %v2877_v21 }
  0x2e   :  { %2277 = vmatprep.subr.bf16.mxu0 %v2880_v22  ;;  %2301 = vmatpush3.bf16.msra.mxu1 %v2927_v38 }
  0x2f   :  { %2302 = vmatprep.subr.bf16.mxu1 %v2788_v3 }
  0x31   :  { %2279 = vmatpush1.bf16.msra.mxu0 %v2907_v31 }
  0x32   :  { %2281 = vmatprep.subr.bf16.mxu0 %v2912_v33  ;;  %2304 = vmatpush3.bf16.msra.mxu1 %v2955_v47 }
  0x33   :  { %2305 = vmatprep.subr.bf16.mxu1 %v2788_v3 }
  0x35   :  { %2283 = vmatpush1.bf16.msra.mxu0 %v2937_v41 }
  0x36   :  { %2285 = vmatprep.subr.bf16.mxu0 %v2940_v42  ;;  %2307 = vmatpush3.bf16.msra.mxu1 %v2983_v56 }
  0x37   :  { %2308 = vmatprep.subr.bf16.mxu1 %v2788_v3 }
  0x39   :  { %2287 = vmatpush1.bf16.msra.mxu0 %v2965_v50 }
  0x3a   :  { %2289 = vmatprep.subr.bf16.mxu0 %v2968_v51  ;;  %2310 = vmatpush3.bf16.msra.mxu1 %v3005_v63 }
  0x3b   :  { %2311 = vmatprep.subr.bf16.mxu1 %v2788_v3 }
  0x3d   :  { %2291 = vmatpush1.bf16.msra.mxu0 %v2993_v59 }
  0x3e   :  { %2293 = vmatprep.subr.bf16.mxu0 %v2996_v60  ;;  %2313 = vmatpush3.bf16.msra.mxu1 %v3019_v6 }
  0x3f   :  { %2314 = vmatprep.subr.bf16.mxu1 %v2788_v3 }
  0x41   :  { %2295 = vmatpush1.bf16.msra.mxu0 %v3015_v2 }
  0x42   :  { %2321 = vmatprep.subr.bf16.mxu0 %v2828_v5  ;;  %2316 = vmatpush3.bf16.msra.mxu1 %v3031_v11 }
  0x43   :  { %2317 = vmatprep.subr.bf16.mxu1 %v2788_v3 }
  0x46   :  { %2319 = vmatpush3.bf16.msra.mxu1 %v3045_v14 }
  0x47   :  { %2352 = vmatprep.subr.bf16.mxu1 %v2788_v3 }
  0xf7   :  { %v147_v26 = vpop.f32.mrb[0].mxu0 }
  0xf8   :  { %v148_v28 = vadd.f32 %v147_v26, %v3086_v24  ;;  %v149_v29 = vpop.f32.mrb[1].mxu0 }
  0xf9   :  { %v150_v34 = vadd.f32 %v149_v29, %v3088_v25 }
  0xfa   :  { %v227_v35 = vadd.f32 %v222_v27, %v148_v28 }
  0xfb   :  { %v245_v37 = vadd.f32 %v1726_v30, %v150_v34 }
  0xfc   :  { %v1728_v39 = vmul.f32 -1.442695, %v227_v35  ;;  %v218_v44 = vpop.f32.mrb[0].mxu1 }
  0xfd   :  { %v1729_v40 = vmul.f32 -1.442695, %v245_v37  ;;  %v219_v46 = vadd.f32 %v218_v44, %v3098_v43  ;;  %v1962_v48 = vpop.f32.mrb[1].mxu1 }
  0xfe   :  { %2660 = vpow2.f32 %v1728_v39 }
  0xff   :  { %2662 = vpow2.f32 %v1729_v40  ;;  %v252_v49 = vadd.f32 %v1727_v45, %v219_v46 }
 0x101   :  { %v1730_v13 = vmul.f32 -1.442695, %v252_v49  ;;  %v1735_v49 = vld [vmem:[%s3542_s0 + $0xa0] sm:$0xff] }
 0x108   :  { %v2661_v52 = vpop.eup %2660 }
 0x109   :  { %v2663_v53 = vpop.eup %2662  ;;  %v231_v54 = vadd.f32 1.0, %v2661_v52 }
 0x10a   :  { %v249_v55 = vadd.f32 1.0, %v2663_v53  ;;  %v3166_v53 = vld [vmem:[%s3542_s0 + $0x98] sm:$0xff] }
 0x10b   :  { %2664 = vrcp.f32 %v231_v54 }
 0x10c   :  { %2666 = vrcp.f32 %v249_v55 }
 0x115   :  { %v2665_v57 = vpop.eup %2664 }
 0x116   :  { %v2667_v61 = vpop.eup %2666  ;;  %v234_v62 = vmul.f32 %v2665_v57, %v150_v34  ;;  %v237_v19 = vsub.f32 1.0, %v2665_v57  ;;  %v243_v27 = vmul.f32 0.0, %v2665_v57 }
 0x117   :  { %v259_v0 = vmul.f32 %v2667_v61, %v219_v46 }
 0x118   :  { %v235_v1 = vadd.f32 %v234_v62, %v223_v58 }
 0x119   :  { %v260_v7 = vadd.f32 %v1727_v45, %v259_v0  ;;  %v1732_v45 = vld [vmem:[%s3542_s0 + $0x18] sm:$0xff] }
 0x11a   :  { %2668 = vtanh.f32 %v235_v1 }
 0x11b   :  { %2670 = vtanh.f32 %v260_v7 }
 0x11c   :  { %2672 = vpow2.f32 %v1730_v13 }
 0x124   :  { %v2669_v8 = vpop.eup %2668 }
 0x125   :  { %239 = vrot.lane.b32.xlu0 %v2669_v8, %s2791_s15  ;;  %v2671_v12 = vpop.eup %2670 }
 0x126   :  { %v2673_v17 = vpop.eup %2672 }
 0x127   :  { %v256_v18 = vadd.f32 1.0, %v2673_v17 }
 0x129   :  { %264 = vrot.lane.b32.xlu0 %v2671_v12, %s2791_s15  ;;  %2674 = vrcp.f32 %v256_v18  ;;  %v3174_v18 = vld [vmem:[%s3542_s0 + $0x20] sm:$0xff] }
 0x133   :  { %v2675_v20 = vpop.eup %2674 }
 0x134   :  { %v262_v28 = vsub.f32 1.0, %v2675_v20  ;;  %v268_v34 = vmul.f32 0.0, %v2675_v20 }
 0x197   :  { %v240_v23 = vpop.permute.xlu0 %239 }
 0x198   :  { %v242_v26 = vmul.f32 %v240_v23, %v237_v19 }
 0x19a   :  { %v244_v29 = vadd.f32 %v243_v27, %v242_v26 }
 0x19b   :  { %v265_v30 = vpop.permute.xlu0 %264 }
 0x19c   :  { %v267_v35 = vmul.f32 %v265_v30, %v262_v28  ;;  %271 = vrot.lane.b32.xlu1 %v244_v29, %s2791_s15 }
 0x19e   :  { %v269_v36 = vadd.f32 %v268_v34, %v267_v35 }
 0x1a0   :  { %277 = vrot.lane.b32.xlu1 %v269_v36, %s2791_s15 }
 0x20e   :  { %v272_v37 = vpop.permute.xlu1 %271 }
 0x20f   :  { %275 = vst.msk [vmem:[%s3543_s3] sm:$0xff] %vm274_vm1, %v272_v37 }
 0x212   :  { %v278_v39 = vpop.permute.xlu1 %277 }
 0x213   :  { %1731 = vst.msk [vmem:[%s3543_s3 + $0x38] sm:$0xff] %vm281_vm2, %v278_v39  ;;  %v283_v40 = vsel %vm274_vm1, %v272_v37, %v278_v39 }
 0x214   :  { %448 = vrot.lane.b32.xlu1 %v283_v40, %s2791_s15  ;;  %349 = vmatmul.mubr.f32.vlgmr.msra.gmra.mrb[2].mxu0 %v283_v40 }
 0x215   :  { %1996 = vmatmul.mubr.f32.vlgmr.msra.gmra.mrb[2].mxu1 %v283_v40  ;;  %2323 = vmatpush1.bf16.msra.mxu0 %v2841_v9 }
 0x216   :  { %2354 = vmatpush3.bf16.msra.mxu1 %v2909_v32  ;;  %2325 = vmatprep.subr.bf16.mxu0 %v2843_v10 }
 0x217   :  { %2355 = vmatprep.subr.bf16.mxu1 %v2788_v3  ;;  %555 = vmatprep.mubr.f32.mxu0 %v2789_v4 }
 0x218   :  { %2030 = vmatprep.mubr.msk.f32.mxu1 %vm2790_vm0, %v2789_v4 }
 0x219   :  { %2327 = vmatpush1.bf16.msra.mxu0 %v2859_v15 }
 0x21a   :  { %2357 = vmatpush3.bf16.msra.mxu1 %v2927_v38  ;;  %2329 = vmatprep.subr.bf16.mxu0 %v2862_v16 }
 0x21b   :  { %2358 = vmatprep.subr.bf16.mxu1 %v2788_v3 }
 0x21d   :  { %2331 = vmatpush1.bf16.msra.mxu0 %v2877_v21 }
 0x21e   :  { %2360 = vmatpush3.bf16.msra.mxu1 %v2955_v47  ;;  %2333 = vmatprep.subr.bf16.mxu0 %v2880_v22 }
 0x21f   :  { %2361 = vmatprep.subr.bf16.mxu1 %v2788_v3 }
 0x221   :  { %2335 = vmatpush1.bf16.msra.mxu0 %v2907_v31 }
 0x222   :  { %2363 = vmatpush3.bf16.msra.mxu1 %v2983_v56  ;;  %2337 = vmatprep.subr.bf16.mxu0 %v2912_v33 }
 0x223   :  { %2364 = vmatprep.subr.bf16.mxu1 %v2788_v3 }
 0x225   :  { %2339 = vmatpush1.bf16.msra.mxu0 %v2937_v41 }
 0x226   :  { %2366 = vmatpush3.bf16.msra.mxu1 %v3005_v63  ;;  %2341 = vmatprep.subr.bf16.mxu0 %v2940_v42 }
 0x227   :  { %2367 = vmatprep.subr.bf16.mxu1 %v2788_v3 }
 0x229   :  { %2343 = vmatpush1.bf16.msra.mxu0 %v2965_v50 }
 0x22a   :  { %2369 = vmatpush3.bf16.msra.mxu1 %v3019_v6  ;;  %2345 = vmatprep.subr.bf16.mxu0 %v2968_v51 }
 0x22b   :  { %2370 = vmatprep.subr.bf16.mxu1 %v2788_v3 }
 0x22d   :  { %2347 = vmatpush1.bf16.msra.mxu0 %v2993_v59 }
 0x22e   :  { %2372 = vmatpush3.bf16.msra.mxu1 %v3031_v11  ;;  %2349 = vmatprep.subr.bf16.mxu0 %v2996_v60 }
 0x22f   :  { %2373 = vmatprep.subr.bf16.mxu1 %v2788_v3 }
 0x231   :  { %2351 = vmatpush1.bf16.msra.mxu0 %v3015_v2 }
 0x232   :  { %2375 = vmatpush3.bf16.msra.mxu1 %v3045_v14  ;;  %2377 = vmatprep.subr.bf16.mxu0 %v2828_v5 }
 0x233   :  { %2408 = vmatprep.subr.bf16.mxu1 %v2788_v3 }
 0x286   :  { %v449_v39 = vpop.permute.xlu1 %448 }
 0x2e7   :  { %v350_v44 = vpop.f32.mrb[2].mxu0 }
 0x2e8   :  { %v351_v46 = vadd.f32 %v350_v44, %v3086_v24  ;;  %v421_v48 = vpop.f32.mrb[2].mxu1  ;;  %v352_v52 = vpop.f32.mrb[3].mxu0 }
 0x2e9   :  { %v422_v54 = vadd.f32 %v421_v48, %v3098_v43  ;;  %v353_v55 = vadd.f32 %v352_v52, %v3088_v25  ;;  %v1997_v57 = vpop.f32.mrb[3].mxu1 }
 0x2ea   :  { %v431_v58 = vadd.f32 %v1732_v45, %v351_v46 }
 0x2eb   :  { %v460_v61 = vadd.f32 %v1735_v49, %v422_v54  ;;  %v453_v62 = vadd.f32 %v3166_v53, %v353_v55 }
 0x2ec   :  { %v1736_v0 = vmul.f32 -1.442695, %v431_v58 }
 0x2ed   :  { %v1737_v1 = vmul.f32 -1.442695, %v453_v62  ;;  %v1738_v30 = vmul.f32 -1.442695, %v460_v61 }
 0x2ee   :  { %2676 = vpow2.f32 %v1736_v0  ;;  %v1741_v0 = vld [vmem:[%s3542_s0 + $0x30] sm:$0xff] }
 0x2ef   :  { %2678 = vpow2.f32 %v1737_v1 }
 0x2f8   :  { %v2677_v7 = vpop.eup %2676 }
 0x2f9   :  { %v435_v8 = vadd.f32 1.0, %v2677_v7  ;;  %v2679_v12 = vpop.eup %2678 }
 0x2fa   :  { %v457_v13 = vadd.f32 1.0, %v2679_v12 }
 0x2fb   :  { %2680 = vrcp.f32 %v435_v8  ;;  %v1744_v8 = vld [vmem:[%s3542_s0 + $0x88] sm:$0xff] }
 0x2fc   :  { %2682 = vrcp.f32 %v457_v13  ;;  %v3236_v13 = vld [vmem:[%s3542_s0 + $0x80] sm:$0xff] }
 0x305   :  { %v2681_v17 = vpop.eup %2680 }
 0x306   :  { %v438_v19 = vmul.f32 %v2681_v17, %v353_v55  ;;  %v2683_v20 = vpop.eup %2682  ;;  %v441_v36 = vsub.f32 1.0, %v2681_v17  ;;  %v451_v44 = vmul.f32 %v2681_v17, %v449_v39 }
 0x307   :  { %v467_v26 = vmul.f32 %v2683_v20, %v422_v54 }
 0x308   :  { %v439_v23 = vadd.f32 %v3174_v18, %v438_v19 }
 0x309   :  { %v468_v27 = vadd.f32 %v1735_v49, %v467_v26 }
 0x30a   :  { %2684 = vtanh.f32 %v439_v23 }
 0x30b   :  { %2686 = vtanh.f32 %v468_v27 }
 0x30c   :  { %2688 = vpow2.f32 %v1738_v30 }
 0x314   :  { %v2685_v28 = vpop.eup %2684 }
 0x315   :  { %443 = vrot.lane.b32.xlu0 %v2685_v28, %s2791_s15  ;;  %v2687_v29 = vpop.eup %2686 }
 0x316   :  { %v2689_v34 = vpop.eup %2688 }
 0x317   :  { %v464_v35 = vadd.f32 1.0, %v2689_v34 }
 0x319   :  { %472 = vrot.lane.b32.xlu0 %v2687_v29, %s2791_s15  ;;  %2690 = vrcp.f32 %v464_v35 }
 0x323   :  { %v2691_v37 = vpop.eup %2690 }
 0x324   :  { %v470_v48 = vsub.f32 1.0, %v2691_v37  ;;  %v476_v52 = vmul.f32 %v2691_v37, %v449_v39  ;;  %v3244_v39 = vld [vmem:[%s3542_s0 + $0x38] sm:$0xff] }
 0x387   :  { %v444_v40 = vpop.permute.xlu0 %443 }
 0x388   :  { %v446_v45 = vmul.f32 %v444_v40, %v441_v36 }
 0x38a   :  { %v452_v46 = vadd.f32 %v451_v44, %v446_v45 }
 0x38b   :  { %v473_v49 = vpop.permute.xlu0 %472 }
 0x38c   :  { %v475_v54 = vmul.f32 %v473_v49, %v470_v48  ;;  %479 = vrot.lane.b32.xlu1 %v452_v46, %s2791_s15 }
 0x38e   :  { %v477_v55 = vadd.f32 %v476_v52, %v475_v54 }
 0x390   :  { %485 = vrot.lane.b32.xlu0 %v477_v55, %s2791_s15 }
 0x3fe   :  { %v480_v57 = vpop.permute.xlu1 %479 }
 0x3ff   :  { %1739 = vst.msk [vmem:[%s3543_s3 + $0x8] sm:$0xff] %vm274_vm1, %v480_v57 }
 0x402   :  { %v486_v58 = vpop.permute.xlu0 %485 }
 0x403   :  { %1740 = vst.msk [vmem:[%s3543_s3 + $0x30] sm:$0xff] %vm281_vm2, %v486_v58  ;;  %v490_v61 = vsel %vm274_vm1, %v480_v57, %v486_v58 }
 0x404   :  { %655 = vrot.lane.b32.xlu0 %v490_v61, %s2791_s15  ;;  %556 = vmatmul.mubr.f32.vlgmr.msra.gmra.mrb[4].mxu0 %v490_v61 }
 0x405   :  { %2031 = vmatmul.mubr.f32.vlgmr.msra.gmra.mrb[4].mxu1 %v490_v61  ;;  %2379 = vmatpush1.bf16.msra.mxu0 %v2841_v9 }
 0x406   :  { %2410 = vmatpush3.bf16.msra.mxu1 %v2909_v32  ;;  %2381 = vmatprep.subr.bf16.mxu0 %v2843_v10 }
 0x407   :  { %2411 = vmatprep.subr.bf16.mxu1 %v2788_v3  ;;  %762 = vmatprep.mubr.f32.mxu0 %v2789_v4 }
 0x408   :  { %2065 = vmatprep.mubr.msk.f32.mxu1 %vm2790_vm0, %v2789_v4 }
 0x409   :  { %2383 = vmatpush1.bf16.msra.mxu0 %v2859_v15 }
 0x40a   :  { %2413 = vmatpush3.bf16.msra.mxu1 %v2927_v38  ;;  %2385 = vmatprep.subr.bf16.mxu0 %v2862_v16 }
 0x40b   :  { %2414 = vmatprep.subr.bf16.mxu1 %v2788_v3 }
 0x40d   :  { %2387 = vmatpush1.bf16.msra.mxu0 %v2877_v21 }
 0x40e   :  { %2416 = vmatpush3.bf16.msra.mxu1 %v2955_v47  ;;  %2389 = vmatprep.subr.bf16.mxu0 %v2880_v22 }
 0x40f   :  { %2417 = vmatprep.subr.bf16.mxu1 %v2788_v3 }
 0x411   :  { %2391 = vmatpush1.bf16.msra.mxu0 %v2907_v31 }
 0x412   :  { %2419 = vmatpush3.bf16.msra.mxu1 %v2983_v56  ;;  %2393 = vmatprep.subr.bf16.mxu0 %v2912_v33 }
 0x413   :  { %2420 = vmatprep.subr.bf16.mxu1 %v2788_v3 }
 0x415   :  { %2395 = vmatpush1.bf16.msra.mxu0 %v2937_v41 }
 0x416   :  { %2422 = vmatpush3.bf16.msra.mxu1 %v3005_v63  ;;  %2397 = vmatprep.subr.bf16.mxu0 %v2940_v42 }
 0x417   :  { %2423 = vmatprep.subr.bf16.mxu1 %v2788_v3 }
 0x419   :  { %2399 = vmatpush1.bf16.msra.mxu0 %v2965_v50 }
 0x41a   :  { %2425 = vmatpush3.bf16.msra.mxu1 %v3019_v6  ;;  %2401 = vmatprep.subr.bf16.mxu0 %v2968_v51 }
 0x41b   :  { %2426 = vmatprep.subr.bf16.mxu1 %v2788_v3 }
 0x41d   :  { %2403 = vmatpush1.bf16.msra.mxu0 %v2993_v59 }
 0x41e   :  { %2428 = vmatpush3.bf16.msra.mxu1 %v3031_v11  ;;  %2405 = vmatprep.subr.bf16.mxu0 %v2996_v60 }
 0x41f   :  { %2429 = vmatprep.subr.bf16.mxu1 %v2788_v3 }
 0x421   :  { %2407 = vmatpush1.bf16.msra.mxu0 %v3015_v2 }
 0x422   :  { %2431 = vmatpush3.bf16.msra.mxu1 %v3045_v14  ;;  %2433 = vmatprep.subr.bf16.mxu0 %v2828_v5 }
 0x423   :  { %2464 = vmatprep.subr.bf16.mxu1 %v2788_v3 }
 0x4d7   :  { %v557_v62 = vpop.f32.mrb[4].mxu0 }
 0x4d8   :  { %v558_v1 = vadd.f32 %v557_v62, %v3086_v24  ;;  %v628_v7 = vpop.f32.mrb[4].mxu1  ;;  %v559_v12 = vpop.f32.mrb[5].mxu0 }
 0x4d9   :  { %v629_v17 = vadd.f32 %v628_v7, %v3098_v43  ;;  %v560_v19 = vadd.f32 %v559_v12, %v3088_v25  ;;  %v2032_v20 = vpop.f32.mrb[5].mxu1  ;;  %v656_v62 = vpop.permute.xlu0 %655 }
 0x4da   :  { %v638_v23 = vadd.f32 %v1741_v0, %v558_v1 }
 0x4db   :  { %v667_v26 = vadd.f32 %v1744_v8, %v629_v17  ;;  %v660_v27 = vadd.f32 %v3236_v13, %v560_v19 }
 0x4dc   :  { %v1745_v28 = vmul.f32 -1.442695, %v638_v23 }
 0x4dd   :  { %v1746_v29 = vmul.f32 -1.442695, %v660_v27  ;;  %v1747_v54 = vmul.f32 -1.442695, %v667_v26 }
 0x4de   :  { %2692 = vpow2.f32 %v1745_v28 }
 0x4df   :  { %2694 = vpow2.f32 %v1746_v29 }
 0x4e8   :  { %v2693_v30 = vpop.eup %2692 }
 0x4e9   :  { %v642_v34 = vadd.f32 1.0, %v2693_v30  ;;  %v2695_v35 = vpop.eup %2694  ;;  %v1750_v30 = vld [vmem:[%s3542_s0 + $0x48] sm:$0xff] }
 0x4ea   :  { %v664_v36 = vadd.f32 1.0, %v2695_v35 }
 0x4eb   :  { %2696 = vrcp.f32 %v642_v34 }
 0x4ec   :  { %2698 = vrcp.f32 %v664_v36  ;;  %v1753_v36 = vld [vmem:[%s3542_s0 + $0x70] sm:$0xff] }
 0x4f5   :  { %v2697_v37 = vpop.eup %2696 }
 0x4f6   :  { %v645_v40 = vmul.f32 %v2697_v37, %v560_v19  ;;  %v2699_v44 = vpop.eup %2698  ;;  %v648_v58 = vsub.f32 1.0, %v2697_v37  ;;  %v658_v1 = vmul.f32 %v2697_v37, %v656_v62 }
 0x4f7   :  { %v674_v46 = vmul.f32 %v2699_v44, %v629_v17 }
 0x4f8   :  { %v646_v45 = vadd.f32 %v3244_v39, %v645_v40  ;;  %v3306_v40 = vld [vmem:[%s3542_s0 + $0x68] sm:$0xff] }
 0x4f9   :  { %v675_v48 = vadd.f32 %v1744_v8, %v674_v46 }
 0x4fa   :  { %2700 = vtanh.f32 %v646_v45 }
 0x4fb   :  { %2702 = vtanh.f32 %v675_v48 }
 0x4fc   :  { %2704 = vpow2.f32 %v1747_v54 }
 0x504   :  { %v2701_v49 = vpop.eup %2700 }
 0x505   :  { %650 = vrot.lane.b32.xlu1 %v2701_v49, %s2791_s15  ;;  %v2703_v52 = vpop.eup %2702 }
 0x506   :  { %v2705_v55 = vpop.eup %2704 }
 0x507   :  { %v671_v57 = vadd.f32 1.0, %v2705_v55 }
 0x509   :  { %679 = vrot.lane.b32.xlu1 %v2703_v52, %s2791_s15  ;;  %2706 = vrcp.f32 %v671_v57 }
 0x513   :  { %v2707_v61 = vpop.eup %2706 }
 0x514   :  { %v677_v8 = vsub.f32 1.0, %v2707_v61  ;;  %v683_v19 = vmul.f32 %v2707_v61, %v656_v62 }
 0x577   :  { %v651_v0 = vpop.permute.xlu1 %650 }
 0x578   :  { %v653_v7 = vmul.f32 %v651_v0, %v648_v58 }
 0x57a   :  { %v659_v12 = vadd.f32 %v658_v1, %v653_v7  ;;  %v3314_v1 = vld [vmem:[%s3542_s0 + $0x50] sm:$0xff] }
 0x57b   :  { %v680_v17 = vpop.permute.xlu1 %679 }
 0x57c   :  { %v682_v20 = vmul.f32 %v680_v17, %v677_v8  ;;  %686 = vrot.lane.b32.xlu0 %v659_v12, %s2791_s15 }
 0x57e   :  { %v684_v23 = vadd.f32 %v683_v19, %v682_v20 }
 0x580   :  { %692 = vrot.lane.b32.xlu1 %v684_v23, %s2791_s15 }
 0x5ee   :  { %v687_v26 = vpop.permute.xlu0 %686 }
 0x5ef   :  { %1748 = vst.msk [vmem:[%s3543_s3 + $0x10] sm:$0xff] %vm274_vm1, %v687_v26 }
 0x5f2   :  { %v693_v27 = vpop.permute.xlu1 %692 }
 0x5f3   :  { %1749 = vst.msk [vmem:[%s3543_s3 + $0x28] sm:$0xff] %vm281_vm2, %v693_v27  ;;  %v697_v28 = vsel %vm274_vm1, %v687_v26, %v693_v27 }
 0x5f4   :  { %862 = vrot.lane.b32.xlu1 %v697_v28, %s2791_s15  ;;  %763 = vmatmul.mubr.f32.vlgmr.msra.gmra.mrb[6].mxu0 %v697_v28 }
 0x5f5   :  { %2066 = vmatmul.mubr.f32.vlgmr.msra.gmra.mrb[6].mxu1 %v697_v28  ;;  %2435 = vmatpush1.bf16.msra.mxu0 %v2841_v9 }
 0x5f6   :  { %2466 = vmatpush3.bf16.msra.mxu1 %v2909_v32  ;;  %2437 = vmatprep.subr.bf16.mxu0 %v2843_v10 }
 0x5f7   :  { %2467 = vmatprep.subr.bf16.mxu1 %v2788_v3  ;;  %969 = vmatprep.mubr.f32.mxu0 %v2789_v4 }
 0x5f8   :  { %2100 = vmatprep.mubr.msk.f32.mxu1 %vm2790_vm0, %v2789_v4 }
 0x5f9   :  { %2439 = vmatpush1.bf16.msra.mxu0 %v2859_v15 }
 0x5fa   :  { %2469 = vmatpush3.bf16.msra.mxu1 %v2927_v38  ;;  %2441 = vmatprep.subr.bf16.mxu0 %v2862_v16 }
 0x5fb   :  { %2470 = vmatprep.subr.bf16.mxu1 %v2788_v3 }
 0x5fd   :  { %2443 = vmatpush1.bf16.msra.mxu0 %v2877_v21 }
 0x5fe   :  { %2472 = vmatpush3.bf16.msra.mxu1 %v2955_v47  ;;  %2445 = vmatprep.subr.bf16.mxu0 %v2880_v22 }
 0x5ff   :  { %2473 = vmatprep.subr.bf16.mxu1 %v2788_v3 }
 0x601   :  { %2447 = vmatpush1.bf16.msra.mxu0 %v2907_v31 }
 0x602   :  { %2475 = vmatpush3.bf16.msra.mxu1 %v2983_v56  ;;  %2449 = vmatprep.subr.bf16.mxu0 %v2912_v33 }
 0x603   :  { %2476 = vmatprep.subr.bf16.mxu1 %v2788_v3 }
 0x605   :  { %2451 = vmatpush1.bf16.msra.mxu0 %v2937_v41 }
 0x606   :  { %2478 = vmatpush3.bf16.msra.mxu1 %v3005_v63  ;;  %2453 = vmatprep.subr.bf16.mxu0 %v2940_v42 }
 0x607   :  { %2479 = vmatprep.subr.bf16.mxu1 %v2788_v3 }
 0x609   :  { %2455 = vmatpush1.bf16.msra.mxu0 %v2965_v50 }
 0x60a   :  { %2481 = vmatpush3.bf16.msra.mxu1 %v3019_v6  ;;  %2457 = vmatprep.subr.bf16.mxu0 %v2968_v51 }
 0x60b   :  { %2482 = vmatprep.subr.bf16.mxu1 %v2788_v3 }
 0x60d   :  { %2459 = vmatpush1.bf16.msra.mxu0 %v2993_v59 }
 0x60e   :  { %2484 = vmatpush3.bf16.msra.mxu1 %v3031_v11  ;;  %2461 = vmatprep.subr.bf16.mxu0 %v2996_v60 }
 0x60f   :  { %2485 = vmatprep.subr.bf16.mxu1 %v2788_v3 }
 0x611   :  { %2463 = vmatpush1.bf16.msra.mxu0 %v3015_v2 }
 0x612   :  { %2487 = vmatpush3.bf16.msra.mxu1 %v3045_v14  ;;  %2489 = vmatprep.subr.bf16.mxu0 %v2828_v5 }
 0x613   :  { %2520 = vmatprep.subr.bf16.mxu1 %v2788_v3 }
 0x6c7   :  { %v764_v29 = vpop.f32.mrb[6].mxu0 }
 0x6c8   :  { %v765_v34 = vadd.f32 %v764_v29, %v3086_v24  ;;  %v835_v35 = vpop.f32.mrb[6].mxu1  ;;  %v766_v37 = vpop.f32.mrb[7].mxu0 }
 0x6c9   :  { %v836_v44 = vadd.f32 %v835_v35, %v3098_v43  ;;  %v767_v45 = vadd.f32 %v766_v37, %v3088_v25  ;;  %v2067_v46 = vpop.f32.mrb[7].mxu1 }
 0x6ca   :  { %v845_v48 = vadd.f32 %v1750_v30, %v765_v34  ;;  %v863_v34 = vpop.permute.xlu1 %862 }
 0x6cb   :  { %v874_v49 = vadd.f32 %v1753_v36, %v836_v44  ;;  %v867_v52 = vadd.f32 %v3306_v40, %v767_v45 }
 0x6cc   :  { %v1754_v54 = vmul.f32 -1.442695, %v845_v48 }
 0x6cd   :  { %v1755_v55 = vmul.f32 -1.442695, %v867_v52  ;;  %v1756_v26 = vmul.f32 -1.442695, %v874_v49 }
 0x6ce   :  { %2708 = vpow2.f32 %v1754_v54 }
 0x6cf   :  { %2710 = vpow2.f32 %v1755_v55 }
 0x6d8   :  { %v2709_v57 = vpop.eup %2708 }
 0x6d9   :  { %v849_v58 = vadd.f32 1.0, %v2709_v57  ;;  %v2711_v61 = vpop.eup %2710 }
 0x6da   :  { %v871_v62 = vadd.f32 1.0, %v2711_v61  ;;  %v1759_v61 = vld [vmem:[%s3542_s0 + $0x60] sm:$0xff] }
 0x6db   :  { %2712 = vrcp.f32 %v849_v58 }
 0x6dc   :  { %2714 = vrcp.f32 %v871_v62 }
 0x6e5   :  { %v2713_v0 = vpop.eup %2712 }
 0x6e6   :  { %v852_v7 = vmul.f32 %v2713_v0, %v767_v45  ;;  %v2715_v12 = vpop.eup %2714  ;;  %v855_v29 = vsub.f32 1.0, %v2713_v0  ;;  %v865_v37 = vmul.f32 %v2713_v0, %v863_v34 }
 0x6e7   :  { %v881_v17 = vmul.f32 %v2715_v12, %v836_v44 }
 0x6e8   :  { %v853_v8 = vadd.f32 %v3314_v1, %v852_v7  ;;  %v1762_v7 = vld [vmem:[%s3542_s0 + $0x58] sm:$0xff] }
 0x6e9   :  { %v882_v19 = vadd.f32 %v1753_v36, %v881_v17 }
 0x6ea   :  { %2716 = vtanh.f32 %v853_v8 }
 0x6eb   :  { %2718 = vtanh.f32 %v882_v19 }
 0x6ec   :  { %2720 = vpow2.f32 %v1756_v26 }
 0x6f4   :  { %v2717_v20 = vpop.eup %2716 }
 0x6f5   :  { %857 = vrot.lane.b32.xlu0 %v2717_v20, %s2791_s15  ;;  %v2719_v23 = vpop.eup %2718 }
 0x6f6   :  { %v2721_v27 = vpop.eup %2720 }
 0x6f7   :  { %v878_v28 = vadd.f32 1.0, %v2721_v27 }
 0x6f9   :  { %886 = vrot.lane.b32.xlu0 %v2719_v23, %s2791_s15  ;;  %2722 = vrcp.f32 %v878_v28 }
 0x703   :  { %v2723_v30 = vpop.eup %2722 }
 0x704   :  { %v884_v36 = vsub.f32 1.0, %v2723_v30  ;;  %v890_v48 = vmul.f32 %v2723_v30, %v863_v34 }
 0x767   :  { %v858_v35 = vpop.permute.xlu0 %857 }
 0x768   :  { %v860_v44 = vmul.f32 %v858_v35, %v855_v29 }
 0x76a   :  { %v866_v45 = vadd.f32 %v865_v37, %v860_v44 }
 0x76b   :  { %v887_v46 = vpop.permute.xlu0 %886 }
 0x76c   :  { %v889_v52 = vmul.f32 %v887_v46, %v884_v36  ;;  %893 = vrot.lane.b32.xlu1 %v866_v45, %s2791_s15 }
 0x76e   :  { %v891_v54 = vadd.f32 %v890_v48, %v889_v52 }
 0x770   :  { %899 = vrot.lane.b32.xlu0 %v891_v54, %s2791_s15 }
 0x7de   :  { %v894_v49 = vpop.permute.xlu1 %893 }
 0x7df   :  { %1757 = vst.msk [vmem:[%s3543_s3 + $0x18] sm:$0xff] %vm274_vm1, %v894_v49 }
 0x7e2   :  { %v900_v55 = vpop.permute.xlu0 %899 }
 0x7e3   :  { %1758 = vst.msk [vmem:[%s3543_s3 + $0x20] sm:$0xff] %vm281_vm2, %v900_v55  ;;  %v904_v57 = vsel %vm274_vm1, %v894_v49, %v900_v55 }
 0x7e4   :  { %1067 = vrot.lane.b32.xlu0 %v904_v57, %s2791_s15  ;;  %970 = vmatmul.mubr.f32.vlgmr.msra.gmra.mrb[8].mxu0 %v904_v57 }
 0x7e5   :  { %2101 = vmatmul.mubr.f32.vlgmr.msra.gmra.mrb[8].mxu1 %v904_v57  ;;  %2491 = vmatpush1.bf16.msra.mxu0 %v2841_v9 }
 0x7e6   :  { %2522 = vmatpush3.bf16.msra.mxu1 %v2909_v32  ;;  %2493 = vmatprep.subr.bf16.mxu0 %v2843_v10 }
 0x7e7   :  { %2523 = vmatprep.subr.bf16.mxu1 %v2788_v3  ;;  %1172 = vmatprep.mubr.f32.mxu0 %v2789_v4 }
 0x7e8   :  { %2135 = vmatprep.mubr.msk.f32.mxu1 %vm2790_vm0, %v2789_v4 }
 0x7e9   :  { %2495 = vmatpush1.bf16.msra.mxu0 %v2859_v15 }
 0x7ea   :  { %2525 = vmatpush3.bf16.msra.mxu1 %v2927_v38  ;;  %2497 = vmatprep.subr.bf16.mxu0 %v2862_v16 }
 0x7eb   :  { %2526 = vmatprep.subr.bf16.mxu1 %v2788_v3 }
 0x7ed   :  { %2499 = vmatpush1.bf16.msra.mxu0 %v2877_v21 }
 0x7ee   :  { %2528 = vmatpush3.bf16.msra.mxu1 %v2955_v47  ;;  %2501 = vmatprep.subr.bf16.mxu0 %v2880_v22 }
 0x7ef   :  { %2529 = vmatprep.subr.bf16.mxu1 %v2788_v3 }
 0x7f1   :  { %2503 = vmatpush1.bf16.msra.mxu0 %v2907_v31 }
 0x7f2   :  { %2531 = vmatpush3.bf16.msra.mxu1 %v2983_v56  ;;  %2505 = vmatprep.subr.bf16.mxu0 %v2912_v33 }
 0x7f3   :  { %2532 = vmatprep.subr.bf16.mxu1 %v2788_v3 }
 0x7f5   :  { %2507 = vmatpush1.bf16.msra.mxu0 %v2937_v41 }
 0x7f6   :  { %2534 = vmatpush3.bf16.msra.mxu1 %v3005_v63  ;;  %2509 = vmatprep.subr.bf16.mxu0 %v2940_v42 }
 0x7f7   :  { %2535 = vmatprep.subr.bf16.mxu1 %v2788_v3 }
 0x7f9   :  { %2511 = vmatpush1.bf16.msra.mxu0 %v2965_v50 }
 0x7fa   :  { %2537 = vmatpush3.bf16.msra.mxu1 %v3019_v6  ;;  %2513 = vmatprep.subr.bf16.mxu0 %v2968_v51 }
 0x7fb   :  { %2538 = vmatprep.subr.bf16.mxu1 %v2788_v3 }
 0x7fd   :  { %2515 = vmatpush1.bf16.msra.mxu0 %v2993_v59 }
 0x7fe   :  { %2540 = vmatpush3.bf16.msra.mxu1 %v3031_v11  ;;  %2517 = vmatprep.subr.bf16.mxu0 %v2996_v60 }
 0x7ff   :  { %2541 = vmatprep.subr.bf16.mxu1 %v2788_v3 }
 0x801   :  { %2519 = vmatpush1.bf16.msra.mxu0 %v3015_v2 }
 0x802   :  { %2543 = vmatpush3.bf16.msra.mxu1 %v3045_v14  ;;  %2545 = vmatprep.subr.bf16.mxu0 %v2828_v5 }
 0x803   :  { %2576 = vmatprep.subr.bf16.mxu1 %v2788_v3 }
 0x8b7   :  { %v971_v58 = vpop.f32.mrb[8].mxu0 }
 0x8b8   :  { %v972_v62 = vadd.f32 %v971_v58, %v3086_v24  ;;  %v1042_v0 = vpop.f32.mrb[8].mxu1  ;;  %v973_v12 = vpop.f32.mrb[9].mxu0 }
 0x8b9   :  { %v1043_v8 = vadd.f32 %v1042_v0, %v3098_v43  ;;  %v974_v17 = vadd.f32 %v973_v12, %v3088_v25  ;;  %v2102_v19 = vpop.f32.mrb[9].mxu1 }
 0x8ba   :  { %v1050_v20 = vadd.f32 %v1759_v61, %v972_v62  ;;  %v1068_v61 = vpop.permute.xlu0 %1067 }
 0x8bb   :  { %v1079_v23 = vadd.f32 %v1762_v7, %v1043_v8  ;;  %v1072_v26 = vadd.f32 %v3314_v1, %v974_v17 }
 0x8bc   :  { %v1763_v27 = vmul.f32 -1.442695, %v1050_v20 }
 0x8bd   :  { %v1764_v28 = vmul.f32 -1.442695, %v1072_v26  ;;  %v1765_v54 = vmul.f32 -1.442695, %v1079_v23 }
 0x8be   :  { %2724 = vpow2.f32 %v1763_v27 }
 0x8bf   :  { %2726 = vpow2.f32 %v1764_v28 }
 0x8c8   :  { %v2725_v29 = vpop.eup %2724 }
 0x8c9   :  { %v1054_v30 = vadd.f32 1.0, %v2725_v29  ;;  %v2727_v34 = vpop.eup %2726  ;;  %v1768_v29 = vld [vmem:[%s3542_s0 + $0x78] sm:$0xff] }
 0x8ca   :  { %v1076_v35 = vadd.f32 1.0, %v2727_v34 }
 0x8cb   :  { %2728 = vrcp.f32 %v1054_v30 }
 0x8cc   :  { %2730 = vrcp.f32 %v1076_v35  ;;  %v1771_v35 = vld [vmem:[%s3542_s0 + $0x40] sm:$0xff] }
 0x8d5   :  { %v2729_v37 = vpop.eup %2728 }
 0x8d6   :  { %v1057_v44 = vmul.f32 %v2729_v37, %v974_v17  ;;  %v2731_v45 = vpop.eup %2730  ;;  %v1060_v57 = vsub.f32 1.0, %v2729_v37 }
 0x8d7   :  { %v1086_v46 = vmul.f32 %v2731_v45, %v1043_v8 }
 0x8d8   :  { %v1058_v36 = vadd.f32 %v3306_v40, %v1057_v44  ;;  %v1070_v40 = vmul.f32 %v2729_v37, %v1068_v61 }
 0x8d9   :  { %v1087_v48 = vadd.f32 %v1762_v7, %v1086_v46 }
 0x8da   :  { %2732 = vtanh.f32 %v1058_v36 }
 0x8db   :  { %2734 = vtanh.f32 %v1087_v48 }
 0x8dc   :  { %2736 = vpow2.f32 %v1765_v54 }
 0x8e4   :  { %v2733_v1 = vpop.eup %2732 }
 0x8e5   :  { %1062 = vrot.lane.b32.xlu1 %v2733_v1, %s2791_s15  ;;  %v2735_v52 = vpop.eup %2734 }
 0x8e6   :  { %v2737_v49 = vpop.eup %2736 }
 0x8e7   :  { %v1083_v55 = vadd.f32 1.0, %v2737_v49 }
 0x8e9   :  { %1091 = vrot.lane.b32.xlu1 %v2735_v52, %s2791_s15  ;;  %2738 = vrcp.f32 %v1083_v55 }
 0x8f3   :  { %v2739_v58 = vpop.eup %2738 }
 0x8f4   :  { %v1089_v7 = vsub.f32 1.0, %v2739_v58  ;;  %v1095_v17 = vmul.f32 %v2739_v58, %v1068_v61 }
 0x957   :  { %v1063_v62 = vpop.permute.xlu1 %1062 }
 0x958   :  { %v1065_v0 = vmul.f32 %v1063_v62, %v1060_v57 }
 0x95a   :  { %v1071_v12 = vadd.f32 %v1070_v40, %v1065_v0 }
 0x95b   :  { %v1092_v8 = vpop.permute.xlu1 %1091 }
 0x95c   :  { %v1094_v19 = vmul.f32 %v1092_v8, %v1089_v7  ;;  %1098 = vrot.lane.b32.xlu0 %v1071_v12, %s2791_s15 }
 0x95e   :  { %v1096_v20 = vadd.f32 %v1095_v17, %v1094_v19 }
 0x960   :  { %1103 = vrot.lane.b32.xlu1 %v1096_v20, %s2791_s15 }
 0x9ce   :  { %v1099_v23 = vpop.permute.xlu0 %1098 }
 0x9cf   :  { %1766 = vst.msk [vmem:[%s3543_s3 + $0x20] sm:$0xff] %vm274_vm1, %v1099_v23 }
 0x9d2   :  { %v1104_v26 = vpop.permute.xlu1 %1103 }
 0x9d3   :  { %1767 = vst.msk [vmem:[%s3543_s3 + $0x18] sm:$0xff] %vm281_vm2, %v1104_v26  ;;  %v1107_v27 = vsel %vm274_vm1, %v1099_v23, %v1104_v26 }
 0x9d4   :  { %1270 = vrot.lane.b32.xlu1 %v1107_v27, %s2791_s15  ;;  %1173 = vmatmul.mubr.f32.vlgmr.msra.gmra.mrb[10].mxu0 %v1107_v27 }
 0x9d5   :  { %2136 = vmatmul.mubr.f32.vlgmr.msra.gmra.mrb[10].mxu1 %v1107_v27  ;;  %2547 = vmatpush1.bf16.msra.mxu0 %v2841_v9 }
 0x9d6   :  { %2578 = vmatpush3.bf16.msra.mxu1 %v2909_v32  ;;  %2549 = vmatprep.subr.bf16.mxu0 %v2843_v10 }
 0x9d7   :  { %2579 = vmatprep.subr.bf16.mxu1 %v2788_v3  ;;  %1375 = vmatprep.mubr.f32.mxu0 %v2789_v4 }
 0x9d8   :  { %2170 = vmatprep.mubr.msk.f32.mxu1 %vm2790_vm0, %v2789_v4 }
 0x9d9   :  { %2551 = vmatpush1.bf16.msra.mxu0 %v2859_v15 }
 0x9da   :  { %2581 = vmatpush3.bf16.msra.mxu1 %v2927_v38  ;;  %2553 = vmatprep.subr.bf16.mxu0 %v2862_v16 }
 0x9db   :  { %2582 = vmatprep.subr.bf16.mxu1 %v2788_v3 }
 0x9dd   :  { %2555 = vmatpush1.bf16.msra.mxu0 %v2877_v21 }
 0x9de   :  { %2584 = vmatpush3.bf16.msra.mxu1 %v2955_v47  ;;  %2557 = vmatprep.subr.bf16.mxu0 %v2880_v22 }
 0x9df   :  { %2585 = vmatprep.subr.bf16.mxu1 %v2788_v3 }
 0x9e1   :  { %2559 = vmatpush1.bf16.msra.mxu0 %v2907_v31 }
 0x9e2   :  { %2587 = vmatpush3.bf16.msra.mxu1 %v2983_v56  ;;  %2561 = vmatprep.subr.bf16.mxu0 %v2912_v33 }
 0x9e3   :  { %2588 = vmatprep.subr.bf16.mxu1 %v2788_v3 }
 0x9e5   :  { %2563 = vmatpush1.bf16.msra.mxu0 %v2937_v41 }
 0x9e6   :  { %2590 = vmatpush3.bf16.msra.mxu1 %v3005_v63  ;;  %2565 = vmatprep.subr.bf16.mxu0 %v2940_v42 }
 0x9e7   :  { %2591 = vmatprep.subr.bf16.mxu1 %v2788_v3 }
 0x9e9   :  { %2567 = vmatpush1.bf16.msra.mxu0 %v2965_v50 }
 0x9ea   :  { %2593 = vmatpush3.bf16.msra.mxu1 %v3019_v6  ;;  %2569 = vmatprep.subr.bf16.mxu0 %v2968_v51 }
 0x9eb   :  { %2594 = vmatprep.subr.bf16.mxu1 %v2788_v3 }
 0x9ed   :  { %2571 = vmatpush1.bf16.msra.mxu0 %v2993_v59 }
 0x9ee   :  { %2596 = vmatpush3.bf16.msra.mxu1 %v3031_v11  ;;  %2573 = vmatprep.subr.bf16.mxu0 %v2996_v60 }
 0x9ef   :  { %2597 = vmatprep.subr.bf16.mxu1 %v2788_v3 }
 0x9f1   :  { %2575 = vmatpush1.bf16.msra.mxu0 %v3015_v2 }
 0x9f2   :  { %2599 = vmatpush3.bf16.msra.mxu1 %v3045_v14  ;;  %2601 = vmatprep.subr.bf16.mxu0 %v2828_v5 }
 0x9f3   :  { %2632 = vmatprep.subr.bf16.mxu1 %v2788_v3 }
 0xa46   :  { %v1271_v26 = vpop.permute.xlu1 %1270 }
 0xaa7   :  { %v1174_v28 = vpop.f32.mrb[10].mxu0 }
 0xaa8   :  { %v1175_v30 = vadd.f32 %v1174_v28, %v3086_v24  ;;  %v1245_v34 = vpop.f32.mrb[10].mxu1  ;;  %v1176_v37 = vpop.f32.mrb[11].mxu0 }
 0xaa9   :  { %v1246_v44 = vadd.f32 %v1245_v34, %v3098_v43  ;;  %v1177_v45 = vadd.f32 %v1176_v37, %v3088_v25  ;;  %v2137_v5 = vpop.f32.mrb[11].mxu1 }
 0xaaa   :  { %v1253_v36 = vadd.f32 %v1768_v29, %v1175_v30 }
 0xaab   :  { %v1282_v46 = vadd.f32 %v1771_v35, %v1246_v44  ;;  %v1275_v48 = vadd.f32 %v3244_v39, %v1177_v45 }
 0xaac   :  { %v1772_v1 = vmul.f32 -1.442695, %v1253_v36 }
 0xaad   :  { %v1773_v52 = vmul.f32 -1.442695, %v1275_v48  ;;  %v1774_v8 = vmul.f32 -1.442695, %v1282_v46 }
 0xaae   :  { %2740 = vpow2.f32 %v1772_v1 }
 0xaaf   :  { %2742 = vpow2.f32 %v1773_v52 }
 0xab8   :  { %v2741_v54 = vpop.eup %2740 }
 0xab9   :  { %v1257_v49 = vadd.f32 1.0, %v2741_v54  ;;  %v2743_v55 = vpop.eup %2742 }
 0xaba   :  { %v1279_v57 = vadd.f32 1.0, %v2743_v55 }
 0xabb   :  { %2744 = vrcp.f32 %v1257_v49 }
 0xabc   :  { %2746 = vrcp.f32 %v1279_v57 }
 0xac5   :  { %v2745_v58 = vpop.eup %2744 }
 0xac6   :  { %v1260_v61 = vmul.f32 %v2745_v58, %v1177_v45  ;;  %v2747_v62 = vpop.eup %2746  ;;  %v1263_v20 = vsub.f32 1.0, %v2745_v58 }
 0xac7   :  { %v1289_v0 = vmul.f32 %v2747_v62, %v1246_v44 }
 0xac8   :  { %v1261_v40 = vadd.f32 %v3236_v13, %v1260_v61  ;;  %v1273_v13 = vmul.f32 %v2745_v58, %v1271_v26 }
 0xac9   :  { %v1290_v12 = vadd.f32 %v1771_v35, %v1289_v0 }
 0xaca   :  { %2748 = vtanh.f32 %v1261_v40 }
 0xacb   :  { %2750 = vtanh.f32 %v1290_v12 }
 0xacc   :  { %2752 = vpow2.f32 %v1774_v8 }
 0xad4   :  { %v2749_v39 = vpop.eup %2748 }
 0xad5   :  { %1265 = vrot.lane.b32.xlu0 %v2749_v39, %s2791_s15  ;;  %v2751_v7 = vpop.eup %2750 }
 0xad6   :  { %v2753_v17 = vpop.eup %2752 }
 0xad7   :  { %v1286_v19 = vadd.f32 1.0, %v2753_v17 }
 0xad9   :  { %1294 = vrot.lane.b32.xlu0 %v2751_v7, %s2791_s15  ;;  %2754 = vrcp.f32 %v1286_v19  ;;  %v1786_v19 = vld [vmem:[%s3542_s0 + $0xa8] sm:$0xff] }
 0xae3   :  { %v2755_v23 = vpop.eup %2754 }
 0xae4   :  { %v1292_v30 = vsub.f32 1.0, %v2755_v23  ;;  %v1298_v35 = vmul.f32 %v2755_v23, %v1271_v26  ;;  %v1658_v26 = vld [vmem:[%s3542_s0 + $0x10] sm:$0xff] }
 0xb47   :  { %v1266_v27 = vpop.permute.xlu0 %1265 }
 0xb48   :  { %v1268_v28 = vmul.f32 %v1266_v27, %v1263_v20 }
 0xb4a   :  { %v1274_v29 = vadd.f32 %v1273_v13, %v1268_v28  ;;  %v1657_v13 = vld [vmem:[%s3542_s0 + $0x8] sm:$0xff] }
 0xb4b   :  { %v1295_v34 = vpop.permute.xlu0 %1294 }
 0xb4c   :  { %v1297_v37 = vmul.f32 %v1295_v34, %v1292_v30  ;;  %1301 = vrot.lane.b32.xlu1 %v1274_v29, %s2791_s15 }
 0xb4e   :  { %v1299_v44 = vadd.f32 %v1298_v35, %v1297_v37 }
 0xb50   :  { %1306 = vrot.lane.b32.xlu0 %v1299_v44, %s2791_s15 }
 0xbbe   :  { %v1302_v45 = vpop.permute.xlu1 %1301 }
 0xbbf   :  { %1775 = vst.msk [vmem:[%s3543_s3 + $0x28] sm:$0xff] %vm274_vm1, %v1302_v45 }
 0xbc2   :  { %v1307_v5 = vpop.permute.xlu0 %1306 }
 0xbc3   :  { %1776 = vst.msk [vmem:[%s3543_s3 + $0x10] sm:$0xff] %vm281_vm2, %v1307_v5  ;;  %v1310_v36 = vsel %vm274_vm1, %v1302_v45, %v1307_v5 }
 0xbc4   :  { %1473 = vrot.lane.b32.xlu0 %v1310_v36, %s2791_s15  ;;  %1376 = vmatmul.mubr.f32.vlgmr.msra.gmra.mrb[12].mxu0 %v1310_v36 }
 0xbc5   :  { %2171 = vmatmul.mubr.f32.vlgmr.msra.gmra.mrb[12].mxu1 %v1310_v36  ;;  %2603 = vmatpush1.bf16.msra.mxu0 %v2841_v9  ;;  %v1777_v9 = vld [vmem:[%s3542_s0 + $0x90] sm:$0xff] }
 0xbc6   :  { %2634 = vmatpush3.bf16.msra.mxu1 %v2909_v32  ;;  %2605 = vmatprep.subr.bf16.mxu0 %v2843_v10 }
 0xbc7   :  { %2635 = vmatprep.subr.bf16.mxu1 %v2788_v3  ;;  %1578 = vmatprep.mubr.f32.mxu0 %v2789_v4 }
 0xbc8   :  { %2205 = vmatprep.mubr.msk.f32.mxu1 %vm2790_vm0, %v2789_v4 }
 0xbc9   :  { %2607 = vmatpush1.bf16.msra.mxu0 %v2859_v15 }
 0xbca   :  { %2637 = vmatpush3.bf16.msra.mxu1 %v2927_v38  ;;  %2609 = vmatprep.subr.bf16.mxu0 %v2862_v16  ;;  %v1780_v16 = vld [vmem:[%s3542_s0 + $0x28] sm:$0xff] }
 0xbcb   :  { %2638 = vmatprep.subr.bf16.mxu1 %v2788_v3 }
 0xbcd   :  { %2611 = vmatpush1.bf16.msra.mxu0 %v2877_v21 }
 0xbce   :  { %2640 = vmatpush3.bf16.msra.mxu1 %v2955_v47  ;;  %2613 = vmatprep.subr.bf16.mxu0 %v2880_v22 }
 0xbcf   :  { %2641 = vmatprep.subr.bf16.mxu1 %v2788_v3 }
 0xbd1   :  { %2615 = vmatpush1.bf16.msra.mxu0 %v2907_v31 }
 0xbd2   :  { %2643 = vmatpush3.bf16.msra.mxu1 %v2983_v56  ;;  %2617 = vmatprep.subr.bf16.mxu0 %v2912_v33 }
 0xbd3   :  { %2644 = vmatprep.subr.bf16.mxu1 %v2788_v3 }
 0xbd5   :  { %2619 = vmatpush1.bf16.msra.mxu0 %v2937_v41 }
 0xbd6   :  { %2646 = vmatpush3.bf16.msra.mxu1 %v3005_v63  ;;  %2621 = vmatprep.subr.bf16.mxu0 %v2940_v42 }
 0xbd7   :  { %2647 = vmatprep.subr.bf16.mxu1 %v2788_v3 }
 0xbd9   :  { %2623 = vmatpush1.bf16.msra.mxu0 %v2965_v50 }
 0xbda   :  { %2649 = vmatpush3.bf16.msra.mxu1 %v3019_v6  ;;  %2625 = vmatprep.subr.bf16.mxu0 %v2968_v51 }
 0xbdb   :  { %2650 = vmatprep.subr.bf16.mxu1 %v2788_v3 }
 0xbdd   :  { %2627 = vmatpush1.bf16.msra.mxu0 %v2993_v59 }
 0xbde   :  { %2652 = vmatpush3.bf16.msra.mxu1 %v3031_v11  ;;  %2629 = vmatprep.subr.bf16.mxu0 %v2996_v60 }
 0xbdf   :  { %2653 = vmatprep.subr.bf16.mxu1 %v2788_v3 }
 0xbe1   :  { %2631 = vmatpush1.bf16.msra.mxu0 %v3015_v2 }
 0xbe2   :  { %2655 = vmatpush3.bf16.msra.mxu1 %v3045_v14 }
 0xc36   :  { %v1474_v49 = vpop.permute.xlu0 %1473 }
 0xc97   :  { %v1377_v4 = vpop.f32.mrb[12].mxu0 }
 0xc98   :  { %v1378_v10 = vadd.f32 %v1377_v4, %v3086_v24  ;;  %v1448_v15 = vpop.f32.mrb[12].mxu1  ;;  %v1379_v21 = vpop.f32.mrb[13].mxu0 }
 0xc99   :  { %v1449_v22 = vadd.f32 %v1448_v15, %v3098_v43  ;;  %v1380_v3 = vadd.f32 %v1379_v21, %v3088_v25  ;;  %v2172_v31 = vpop.f32.mrb[13].mxu1 }
 0xc9a   :  { %v1456_v32 = vadd.f32 %v1777_v9, %v1378_v10 }
 0xc9b   :  { %v1485_v33 = vadd.f32 %v1780_v16, %v1449_v22  ;;  %v1478_v38 = vadd.f32 %v3174_v18, %v1380_v3 }
 0xc9c   :  { %v1781_v41 = vmul.f32 -1.442695, %v1456_v32 }
 0xc9d   :  { %v1782_v42 = vmul.f32 -1.442695, %v1478_v38  ;;  %v1783_v46 = vmul.f32 -1.442695, %v1485_v33 }
 0xc9e   :  { %2756 = vpow2.f32 %v1781_v41 }
 0xc9f   :  { %2758 = vpow2.f32 %v1782_v42 }
 0xca8   :  { %v2757_v47 = vpop.eup %2756 }
 0xca9   :  { %v1460_v50 = vadd.f32 1.0, %v2757_v47  ;;  %v2759_v51 = vpop.eup %2758 }
 0xcaa   :  { %v1482_v56 = vadd.f32 1.0, %v2759_v51 }
 0xcab   :  { %2760 = vrcp.f32 %v1460_v50 }
 0xcac   :  { %2762 = vrcp.f32 %v1482_v56 }
 0xcb5   :  { %v2761_v59 = vpop.eup %2760 }
 0xcb6   :  { %v1463_v60 = vmul.f32 %v2761_v59, %v1380_v3  ;;  %v2763_v63 = vpop.eup %2762  ;;  %v1466_v52 = vsub.f32 1.0, %v2761_v59 }
 0xcb7   :  { %v1492_v6 = vmul.f32 %v2763_v63, %v1449_v22 }
 0xcb8   :  { %v1464_v2 = vadd.f32 %v3166_v53, %v1463_v60  ;;  %v1476_v53 = vmul.f32 %v2761_v59, %v1474_v49 }
 0xcb9   :  { %v1493_v11 = vadd.f32 %v1780_v16, %v1492_v6 }
 0xcba   :  { %2764 = vtanh.f32 %v1464_v2 }
 0xcbb   :  { %2766 = vtanh.f32 %v1493_v11 }
 0xcbc   :  { %2768 = vpow2.f32 %v1783_v46 }
 0xcc4   :  { %v2765_v14 = vpop.eup %2764 }
 0xcc5   :  { %1468 = vrot.lane.b32.xlu1 %v2765_v14, %s2791_s15  ;;  %v2767_v18 = vpop.eup %2766 }
 0xcc6   :  { %v2769_v48 = vpop.eup %2768 }
 0xcc7   :  { %v1489_v1 = vadd.f32 1.0, %v2769_v48 }
 0xcc9   :  { %1497 = vrot.lane.b32.xlu1 %v2767_v18, %s2791_s15  ;;  %2770 = vrcp.f32 %v1489_v1 }
 0xcd3   :  { %v2771_v54 = vpop.eup %2770 }
 0xcd4   :  { %v1495_v61 = vsub.f32 1.0, %v2771_v54  ;;  %v1501_v40 = vmul.f32 %v2771_v54, %v1474_v49 }
 0xd37   :  { %v1469_v55 = vpop.permute.xlu1 %1468 }
 0xd38   :  { %v1471_v57 = vmul.f32 %v1469_v55, %v1466_v52 }
 0xd3a   :  { %v1477_v58 = vadd.f32 %v1476_v53, %v1471_v57 }
 0xd3b   :  { %v1498_v62 = vpop.permute.xlu1 %1497 }
 0xd3c   :  { %v1500_v0 = vmul.f32 %v1498_v62, %v1495_v61  ;;  %1504 = vrot.lane.b32.xlu0 %v1477_v58, %s2791_s15 }
 0xd3e   :  { %v1502_v12 = vadd.f32 %v1501_v40, %v1500_v0 }
 0xd40   :  { %1509 = vrot.lane.b32.xlu1 %v1502_v12, %s2791_s15 }
 0xdae   :  { %v1505_v39 = vpop.permute.xlu0 %1504 }
 0xdaf   :  { %1784 = vst.msk [vmem:[%s3543_s3 + $0x30] sm:$0xff] %vm274_vm1, %v1505_v39 }
 0xdb2   :  { %v1510_v7 = vpop.permute.xlu1 %1509 }
 0xdb3   :  { %1785 = vst.msk [vmem:[%s3543_s3 + $0x8] sm:$0xff] %vm281_vm2, %v1510_v7  ;;  %v1513_v8 = vsel %vm274_vm1, %v1505_v39, %v1510_v7 }
 0xdb4   :  { %1676 = vrot.lane.b32.xlu1 %v1513_v8, %s2791_s15  ;;  %1579 = vmatmul.mubr.f32.vlgmr.msra.gmra.mrb[14].mxu0 %v1513_v8 }
 0xdb5   :  { %2206 = vmatmul.mubr.f32.vlgmr.msra.gmra.mrb[14].mxu1 %v1513_v8 }
 0xe26   :  { %v1677_v42 = vpop.permute.xlu1 %1676 }
 0xe87   :  { %v1580_v17 = vpop.f32.mrb[14].mxu0 }
 0xe88   :  { %v1581_v20 = vadd.f32 %v1580_v17, %v3086_v24  ;;  %v1651_v23 = vpop.f32.mrb[14].mxu1  ;;  %v1582_v27 = vpop.f32.mrb[15].mxu0 }
 0xe89   :  { %v1652_v28 = vadd.f32 %v1651_v23, %v3098_v43  ;;  %v1583_v29 = vadd.f32 %v1582_v27, %v3088_v25  ;;  %v2207_v30 = vpop.f32.mrb[15].mxu1  ;;  %v1787_v43 = vld [vmem:[%s3542_s0 + $0xb0] sm:$0xff] }
 0xe8a   :  { %v1659_v34 = vadd.f32 %v1786_v19, %v1581_v20 }
 0xe8b   :  { %v1688_v35 = vadd.f32 %v1658_v26, %v1652_v28  ;;  %v1681_v37 = vadd.f32 %v1657_v13, %v1583_v29 }
 0xe8c   :  { %v1788_v44 = vmul.f32 -1.442695, %v1659_v34 }
 0xe8d   :  { %v1789_v24 = vmul.f32 -1.442695, %v1681_v37  ;;  %v1790_v31 = vmul.f32 -1.442695, %v1688_v35 }
 0xe8e   :  { %2772 = vpow2.f32 %v1788_v44 }
 0xe8f   :  { %2774 = vpow2.f32 %v1789_v24 }
 0xe98   :  { %v2773_v45 = vpop.eup %2772 }
 0xe99   :  { %v1663_v5 = vadd.f32 1.0, %v2773_v45  ;;  %v2775_v36 = vpop.eup %2774 }
 0xe9a   :  { %v1685_v4 = vadd.f32 1.0, %v2775_v36 }
 0xe9b   :  { %2776 = vrcp.f32 %v1663_v5 }
 0xe9c   :  { %2778 = vrcp.f32 %v1685_v4 }
 0xea5   :  { %v2777_v9 = vpop.eup %2776 }
 0xea6   :  { %v1666_v25 = vmul.f32 %v2777_v9, %v1583_v29  ;;  %v2779_v10 = vpop.eup %2778  ;;  %v1669_v38 = vsub.f32 1.0, %v2777_v9  ;;  %v1679_v50 = vmul.f32 %v2777_v9, %v1677_v42 }
 0xea7   :  { %v1695_v16 = vmul.f32 %v2779_v10, %v1652_v28 }
 0xea8   :  { %v1667_v15 = vadd.f32 %v1787_v43, %v1666_v25 }
 0xea9   :  { %v1696_v21 = vadd.f32 %v1695_v16, %v1658_v26 }
 0xeaa   :  { %2780 = vtanh.f32 %v1667_v15 }
 0xeab   :  { %2782 = vtanh.f32 %v1696_v21 }
 0xeac   :  { %2784 = vpow2.f32 %v1790_v31 }
 0xeb4   :  { %v2781_v22 = vpop.eup %2780 }
 0xeb5   :  { %1671 = vrot.lane.b32.xlu0 %v2781_v22, %s2791_s15  ;;  %v2783_v3 = vpop.eup %2782 }
 0xeb6   :  { %v2785_v32 = vpop.eup %2784 }
 0xeb7   :  { %v1692_v33 = vadd.f32 1.0, %v2785_v32 }
 0xeb9   :  { %1700 = vrot.lane.b32.xlu0 %v2783_v3, %s2791_s15  ;;  %2786 = vrcp.f32 %v1692_v33 }
 0xec3   :  { %v2787_v41 = vpop.eup %2786 }
 0xec4   :  { %v1698_v59 = vsub.f32 1.0, %v2787_v41  ;;  %v1704_v63 = vmul.f32 %v2787_v41, %v1677_v42 }
 0xf27   :  { %v1672_v47 = vpop.permute.xlu0 %1671 }
 0xf28   :  { %v1674_v51 = vmul.f32 %v1672_v47, %v1669_v38 }
 0xf2a   :  { %v1680_v56 = vadd.f32 %v1679_v50, %v1674_v51 }
 0xf2b   :  { %v1701_v60 = vpop.permute.xlu0 %1700 }
 0xf2c   :  { %v1703_v2 = vmul.f32 %v1701_v60, %v1698_v59  ;;  %1707 = vrot.lane.b32.xlu1 %v1680_v56, %s2791_s15 }
 0xf2e   :  { %v1705_v6 = vadd.f32 %v1704_v63, %v1703_v2 }
 0xf30   :  { %1712 = vrot.lane.b32.xlu0 %v1705_v6, %s2791_s15 }
 0xf9e   :  { %v1708_v11 = vpop.permute.xlu1 %1707 }
 0xf9f   :  { %1791 = vst.msk [vmem:[%s3543_s3 + $0x38] sm:$0xff] %vm274_vm1, %v1708_v11 }
 0xfa2   :  { %v1713_v14 = vpop.permute.xlu0 %1712 }
 0xfa3   :  { %1715 = vst.msk [vmem:[%s3543_s3] sm:$0xff] %vm281_vm2, %v1713_v14  ;;  %v1716_v18 = vsel %vm274_vm1, %v1708_v11, %v1713_v14 }
 0xfa4   :  { %1717 = vst [vmem:[%s3544_s4] sm:$0xff] %v1716_v18 }

</bundles_post_ra>
